<compile_context>
chip_gen: v7x
topology: tpu7x:2x2x1
jax: 0.10.0
libtpu: 0.0.40
codegen_flags: <defaults>
</compile_context>

<pallas_src>
import functools

import numpy as np
import jax
import jax.numpy as jnp
from jax import lax
from jax.experimental import pallas as pl
from jax.experimental.pallas import tpu as pltpu

EPS = 1e-5  # PyTorch InstanceNorm2d default eps


# ----------------------------- in-kernel helpers -----------------------------

_A1, _A2, _A3, _A4, _A5 = (0.254829592, -0.284496736, 1.421413741,
                           -1.453152027, 1.061405429)
_P = 0.3275911
_INV_SQRT2 = 0.7071067811865476


def _gelu_exact(x):
    # Exact (erf) GELU. Phi(z) via Abramowitz & Stegun 7.1.26 (|err| < 1.5e-7),
    # odd-symmetric form: one abs + one select; exp / divide ride the EUP slot.
    z = x * np.float32(_INV_SQRT2)
    az = jnp.abs(z)
    t = 1.0 / (1.0 + np.float32(_P) * az)
    poly = ((((np.float32(_A5) * t + np.float32(_A4)) * t + np.float32(_A3)) * t
             + np.float32(_A2)) * t + np.float32(_A1)) * t
    g = 0.5 * poly * jnp.exp(-az * az)          # = 0.5 * erfc(|z|)
    phi = jnp.where(z >= 0.0, 1.0 - g, g)       # = 0.5 * (1 + erf(z))
    return x * phi


# --------------------------------- kernel ------------------------------------

def _layer_kernel(x_ref, w_ref, o_ref, *, H, W, fuse_input_norm):
    # x_ref: (1, Cin, H*W)   channel-major activation (f32 first layer, bf16 after)
    # w_ref: (9*Cin, Cout)   3x3 taps flattened (dy*3+dx major, cin minor), MXU dtype
    # o_ref: (1, Cout, H*W)  channel-major output (lane-dense H*W on the lane axis)
    _, Cin, HW = x_ref.shape
    _, Cout, _ = o_ref.shape

    x = x_ref[0].astype(jnp.float32)                       # (Cin, H*W)

    if fuse_input_norm:
        # Leading InstanceNorm2d(in_dim), fused: per-channel stats over H*W.
        m = jnp.mean(x, axis=1, keepdims=True)
        v = jnp.mean((x - m) ** 2, axis=1, keepdims=True)  # biased variance
        x = (x - m) * lax.rsqrt(v + EPS)

    # Channels-last view for the conv, built in VMEM (no HBM transpose pass).
    xt = x.T.reshape(H, W, Cin)                            # (H, W, Cin)

    # Zero padding=1 on H and W, value-level in VMEM (no wrapper jnp.pad).
    zr = jnp.zeros((1, W, Cin), jnp.float32)
    xp = jnp.concatenate([zr, xt, zr], axis=0)             # (H+2, W, Cin)
    zc = jnp.zeros((H + 2, 1, Cin), jnp.float32)
    xp = jnp.concatenate([zc, xp, zc], axis=1)             # (H+2, W+2, Cin)

    # im2col: one (H*W, 9*Cin) patch -> a single well-fed MXU matmul.
    cols = [xp[dy:dy + H, dx:dx + W, :].reshape(HW, Cin)
            for dy in range(3) for dx in range(3)]
    patch = jnp.concatenate(cols, axis=-1)                 # (H*W, 9*Cin) f32

    acc = jnp.dot(patch.astype(w_ref.dtype), w_ref[...],
                  preferred_element_type=jnp.float32)      # (H*W, Cout) f32
    # Conv bias omitted: a per-channel constant is cancelled by the IN mean-subtract.

    # InstanceNorm2d(Cout): per-channel over H*W, biased var, eps=1e-5.
    m = jnp.mean(acc, axis=0, keepdims=True)
    v = jnp.mean((acc - m) ** 2, axis=0, keepdims=True)
    y = (acc - m) * lax.rsqrt(v + EPS)

    y = _gelu_exact(y)                                     # f32 elementwise

    o_ref[0] = y.T.astype(o_ref.dtype)                     # (Cout, H*W) lane-dense store


# --------------------------------- wrappers ----------------------------------

def _rem_layer(x, w, H, W, *, fuse_input_norm, out_dtype):
    # x: (N, Cin, H*W) channel-major, w: (9*Cin, Cout) in MXU dtype.
    N, Cin, HW = x.shape
    K, Cout = w.shape
    kern = functools.partial(_layer_kernel, H=H, W=W,
                             fuse_input_norm=fuse_input_norm)
    return pl.pallas_call(
        kern,
        out_shape=jax.ShapeDtypeStruct((N, Cout, HW), out_dtype),
        grid=(N,),
        in_specs=[
            pl.BlockSpec((1, Cin, HW), lambda n: (n, 0, 0)),
            pl.BlockSpec((K, Cout), lambda n: (0, 0)),
        ],
        out_specs=pl.BlockSpec((1, Cout, HW), lambda n: (n, 0, 0)),
        compiler_params=pltpu.CompilerParams(
            dimension_semantics=("parallel",)),
    )(x, w)


def rem_forward(x_nchw, params, *, mxu_dtype=jnp.bfloat16):
    """REM forward. x_nchw: (N, in_dim, H, W) -> (N, out_dim, H, W).

    mxu_dtype: dtype of the matmul operands and of the inter-layer activation
    storage (bf16 = fast path; f32 = exactness-check path).
    """
    N, C0, H, W = x_nchw.shape
    x = x_nchw.reshape(N, C0, H * W)          # free: NCHW row-major == (N, C, H*W)
    n_layers = len(params)
    for i, (w_hwio, _b) in enumerate(params):  # bias dropped: cancelled by InstanceNorm
        cout = w_hwio.shape[-1]
        w = w_hwio.reshape(-1, cout).astype(mxu_dtype)     # (9*Cin, Cout)
        out_dtype = x_nchw.dtype if i == n_layers - 1 else mxu_dtype
        x = _rem_layer(x, w, H, W, fuse_input_norm=(i == 0), out_dtype=out_dtype)
    return x.reshape(N, x.shape[1], H, W)     # free: (N, C, H*W) -> NCHW


# ----------------------- deterministic parameter setup ------------------------

def init_rem_params(key, in_dim, out_dim):
    # Conv2d-style init: U(-1/sqrt(fan_in), 1/sqrt(fan_in)) for weights and bias.
    dims = [in_dim, 32, 64, out_dim]
    params = []
    for i in range(3):
        cin, cout = dims[i], dims[i + 1]
        key, kw, kb = jax.random.split(key, 3)
        bound = 1.0 / np.sqrt(cin * 9)
        w = jax.random.uniform(kw, (3, 3, cin, cout), jnp.float32, -bound, bound)
        b = jax.random.uniform(kb, (cout,), jnp.float32, -bound, bound)
        params.append((w, b))
    return params


# ------------------------------ pure-JAX reference ----------------------------

def ref_forward(x_nchw, params):
    def inorm(x):
        m = jnp.mean(x, axis=(2, 3), keepdims=True)
        v = jnp.mean((x - m) ** 2, axis=(2, 3), keepdims=True)
        return (x - m) / jnp.sqrt(v + EPS)

    x = inorm(x_nchw)
    for w_hwio, b in params:
        x = lax.conv_general_dilated(
            x, w_hwio, window_strides=(1, 1), padding=((1, 1), (1, 1)),
            dimension_numbers=('NCHW', 'HWIO', 'NCHW'),
            precision=lax.Precision.HIGHEST)
        x = x + b[None, :, None, None]
        x = inorm(x)
        x = jax.nn.gelu(x, approximate=False)
    return x


if __name__ == "__main__":
    key = jax.random.PRNGKey(0)
    N, in_dim, H, W, out_dim = 2, 4, 16, 16, 32
    kx, kp = jax.random.split(key)
    x = jax.random.normal(kx, (N, in_dim, H, W), jnp.float32)
    params = init_rem_params(kp, in_dim, out_dim)

    ref = ref_forward(x, params)

    # Exactness check: f32 MXU path must match the f32 reference tightly.
    out_f32 = jax.block_until_ready(rem_forward(x, params, mxu_dtype=jnp.float32))
    assert out_f32.shape == (N, out_dim, H, W) and out_f32.dtype == jnp.float32
    np.testing.assert_allclose(np.asarray(out_f32), np.asarray(ref),
                               rtol=2e-3, atol=2e-3)

    # Performance path: bf16 MXU operands + bf16 inter-layer activation storage
    # (f32 accumulation / IN / GELU). Looser tolerance accounts for bf16 rounding.
    out = jax.block_until_ready(rem_forward(x, params))
    assert out.shape == (N, out_dim, H, W) and out.dtype == jnp.float32
    np.testing.assert_allclose(np.asarray(out), np.asarray(ref),
                               rtol=2e-2, atol=2e-2)

    print("KERNEL_OK")
</pallas_src>

<mosaic_0001>
module attributes {stable_mosaic.version = 11 : i64} {
  func.func @_layer_kernel(%arg0: i32, %arg1: memref<1x4x256xf32, #tpu.memory_space<vmem>>, %arg2: memref<36x32xf32, #tpu.memory_space<vmem>>, %arg3: memref<1x32x256xf32, #tpu.memory_space<vmem>>) attributes {dimension_semantics = [#tpu.dimension_semantics<parallel>], iteration_bounds = array<i64: 2>, scalar_prefetch = 0 : i64, scratch_operands = 0 : i64, tpu.core_type = #tpu.core_type<tc>, window_params = [{transform_indices = @transform_0, window_bounds = array<i64: 1, 4, 256>}, {pipeline_mode = #tpu.pipeline_mode<synchronous>, transform_indices = @transform_1, window_bounds = array<i64: 36, 32>}, {transform_indices = @transform_2, window_bounds = array<i64: 1, 32, 256>}]} {
    %c0 = arith.constant 0 : index
    %c0_0 = arith.constant 0 : index
    %c0_1 = arith.constant 0 : index
    %0 = vector.load %arg1[%c0, %c0_0, %c0_1] : memref<1x4x256xf32, #tpu.memory_space<vmem>>, vector<1x4x256xf32>
    %1 = vector.shape_cast %0 : vector<1x4x256xf32> to vector<4x256xf32>
    %cst = arith.constant dense<0.000000e+00> : vector<4xf32>
    %2 = vector.multi_reduction <add>, %1, %cst [1] : vector<4x256xf32> to vector<4xf32>
    %3 = vector.shape_cast %2 : vector<4xf32> to vector<4x1xf32>
    %cst_2 = arith.constant 2.560000e+02 : f32
    %4 = vector.broadcast %cst_2 : f32 to vector<4x1xf32>
    %5 = arith.divf %3, %4 : vector<4x1xf32>
    %6 = vector.broadcast %5 : vector<4x1xf32> to vector<4x256xf32>
    %7 = arith.subf %1, %6 : vector<4x256xf32>
    %8 = arith.mulf %7, %7 : vector<4x256xf32>
    %cst_3 = arith.constant dense<0.000000e+00> : vector<4xf32>
    %9 = vector.multi_reduction <add>, %8, %cst_3 [1] : vector<4x256xf32> to vector<4xf32>
    %10 = vector.shape_cast %9 : vector<4xf32> to vector<4x1xf32>
    %cst_4 = arith.constant 2.560000e+02 : f32
    %11 = vector.broadcast %cst_4 : f32 to vector<4x1xf32>
    %12 = arith.divf %10, %11 : vector<4x1xf32>
    %13 = vector.broadcast %5 : vector<4x1xf32> to vector<4x256xf32>
    %14 = arith.subf %1, %13 : vector<4x256xf32>
    %cst_5 = arith.constant 9.99999974E-6 : f32
    %15 = vector.broadcast %cst_5 : f32 to vector<4x1xf32>
    %16 = arith.addf %12, %15 : vector<4x1xf32>
    %17 = math.rsqrt %16 : vector<4x1xf32>
    %18 = vector.broadcast %17 : vector<4x1xf32> to vector<4x256xf32>
    %19 = arith.mulf %14, %18 : vector<4x256xf32>
    %20 = tpu.transpose %19, [1, 0] : vector<4x256xf32> -> vector<256x4xf32>
    %21 = vector.shape_cast %20 : vector<256x4xf32> to vector<16x16x4xf32>
    %cst_6 = arith.constant 0.000000e+00 : f32
    %22 = vector.broadcast %cst_6 : f32 to vector<1x16x4xf32>
    %23 = tpu.concatenate %22, %21, %22 in 0 : vector<1x16x4xf32>, vector<16x16x4xf32>, vector<1x16x4xf32> -> vector<18x16x4xf32>
    %cst_7 = arith.constant 0.000000e+00 : f32
    %24 = vector.broadcast %cst_7 : f32 to vector<18x1x4xf32>
    %25 = tpu.concatenate %24, %23, %24 in 1 : vector<18x1x4xf32>, vector<18x16x4xf32>, vector<18x1x4xf32> -> vector<18x18x4xf32>
    %26 = vector.extract_strided_slice %25 {offsets = [0, 0, 0], sizes = [16, 16, 4], strides = [1, 1, 1]} : vector<18x18x4xf32> to vector<16x16x4xf32>
    %27 = vector.shape_cast %26 : vector<16x16x4xf32> to vector<256x4xf32>
    %28 = vector.extract_strided_slice %25 {offsets = [0, 1, 0], sizes = [16, 16, 4], strides = [1, 1, 1]} : vector<18x18x4xf32> to vector<16x16x4xf32>
    %29 = vector.shape_cast %28 : vector<16x16x4xf32> to vector<256x4xf32>
    %30 = vector.extract_strided_slice %25 {offsets = [0, 2, 0], sizes = [16, 16, 4], strides = [1, 1, 1]} : vector<18x18x4xf32> to vector<16x16x4xf32>
    %31 = vector.shape_cast %30 : vector<16x16x4xf32> to vector<256x4xf32>
    %32 = vector.extract_strided_slice %25 {offsets = [1, 0, 0], sizes = [16, 16, 4], strides = [1, 1, 1]} : vector<18x18x4xf32> to vector<16x16x4xf32>
    %33 = vector.shape_cast %32 : vector<16x16x4xf32> to vector<256x4xf32>
    %34 = vector.extract_strided_slice %25 {offsets = [1, 1, 0], sizes = [16, 16, 4], strides = [1, 1, 1]} : vector<18x18x4xf32> to vector<16x16x4xf32>
    %35 = vector.shape_cast %34 : vector<16x16x4xf32> to vector<256x4xf32>
    %36 = vector.extract_strided_slice %25 {offsets = [1, 2, 0], sizes = [16, 16, 4], strides = [1, 1, 1]} : vector<18x18x4xf32> to vector<16x16x4xf32>
    %37 = vector.shape_cast %36 : vector<16x16x4xf32> to vector<256x4xf32>
    %38 = vector.extract_strided_slice %25 {offsets = [2, 0, 0], sizes = [16, 16, 4], strides = [1, 1, 1]} : vector<18x18x4xf32> to vector<16x16x4xf32>
    %39 = vector.shape_cast %38 : vector<16x16x4xf32> to vector<256x4xf32>
    %40 = vector.extract_strided_slice %25 {offsets = [2, 1, 0], sizes = [16, 16, 4], strides = [1, 1, 1]} : vector<18x18x4xf32> to vector<16x16x4xf32>
    %41 = vector.shape_cast %40 : vector<16x16x4xf32> to vector<256x4xf32>
    %42 = vector.extract_strided_slice %25 {offsets = [2, 2, 0], sizes = [16, 16, 4], strides = [1, 1, 1]} : vector<18x18x4xf32> to vector<16x16x4xf32>
    %43 = vector.shape_cast %42 : vector<16x16x4xf32> to vector<256x4xf32>
    %44 = tpu.concatenate %27, %29, %31, %33, %35, %37, %39, %41, %43 in 1 : vector<256x4xf32>, vector<256x4xf32>, vector<256x4xf32>, vector<256x4xf32>, vector<256x4xf32>, vector<256x4xf32>, vector<256x4xf32>, vector<256x4xf32>, vector<256x4xf32> -> vector<256x36xf32>
    %c0_8 = arith.constant 0 : index
    %c0_9 = arith.constant 0 : index
    %45 = vector.load %arg2[%c0_8, %c0_9] : memref<36x32xf32, #tpu.memory_space<vmem>>, vector<36x32xf32>
    %cst_10 = arith.constant dense<0.000000e+00> : vector<256x32xf32>
    %46 = tpu.matmul %44, %45, %cst_10 {dimension_numbers = #tpu.dot_dimension_numbers<[1], [0], [0], [1], [0, 0, 1, 1], [], []>} : vector<256x36xf32>, vector<36x32xf32>, vector<256x32xf32> -> vector<256x32xf32>
    %cst_11 = arith.constant dense<0.000000e+00> : vector<32xf32>
    %47 = vector.multi_reduction <add>, %46, %cst_11 [0] : vector<256x32xf32> to vector<32xf32>
    %48 = vector.shape_cast %47 : vector<32xf32> to vector<1x32xf32>
    %cst_12 = arith.constant 2.560000e+02 : f32
    %49 = vector.broadcast %cst_12 : f32 to vector<1x32xf32>
    %50 = arith.divf %48, %49 : vector<1x32xf32>
    %51 = vector.broadcast %50 : vector<1x32xf32> to vector<256x32xf32>
    %52 = arith.subf %46, %51 : vector<256x32xf32>
    %53 = arith.mulf %52, %52 : vector<256x32xf32>
    %cst_13 = arith.constant dense<0.000000e+00> : vector<32xf32>
    %54 = vector.multi_reduction <add>, %53, %cst_13 [0] : vector<256x32xf32> to vector<32xf32>
    %55 = vector.shape_cast %54 : vector<32xf32> to vector<1x32xf32>
    %cst_14 = arith.constant 2.560000e+02 : f32
    %56 = vector.broadcast %cst_14 : f32 to vector<1x32xf32>
    %57 = arith.divf %55, %56 : vector<1x32xf32>
    %58 = vector.broadcast %50 : vector<1x32xf32> to vector<256x32xf32>
    %59 = arith.subf %46, %58 : vector<256x32xf32>
    %cst_15 = arith.constant 9.99999974E-6 : f32
    %60 = vector.broadcast %cst_15 : f32 to vector<1x32xf32>
    %61 = arith.addf %57, %60 : vector<1x32xf32>
    %62 = math.rsqrt %61 : vector<1x32xf32>
    %63 = vector.broadcast %62 : vector<1x32xf32> to vector<256x32xf32>
    %64 = arith.mulf %59, %63 : vector<256x32xf32>
    %cst_16 = arith.constant 0.707106769 : f32
    %65 = vector.broadcast %cst_16 : f32 to vector<256x32xf32>
    %66 = arith.mulf %64, %65 : vector<256x32xf32>
    %67 = math.absf %66 : vector<256x32xf32>
    %cst_17 = arith.constant 0.327591091 : f32
    %68 = vector.broadcast %cst_17 : f32 to vector<256x32xf32>
    %69 = arith.mulf %68, %67 : vector<256x32xf32>
    %cst_18 = arith.constant 1.000000e+00 : f32
    %70 = vector.broadcast %cst_18 : f32 to vector<256x32xf32>
    %71 = arith.addf %70, %69 : vector<256x32xf32>
    %cst_19 = arith.constant 1.000000e+00 : f32
    %72 = vector.broadcast %cst_19 : f32 to vector<256x32xf32>
    %73 = arith.divf %72, %71 : vector<256x32xf32>
    %cst_20 = arith.constant 1.06140542 : f32
    %74 = vector.broadcast %cst_20 : f32 to vector<256x32xf32>
    %75 = arith.mulf %74, %73 : vector<256x32xf32>
    %cst_21 = arith.constant -1.45315206 : f32
    %76 = vector.broadcast %cst_21 : f32 to vector<256x32xf32>
    %77 = arith.addf %75, %76 : vector<256x32xf32>
    %78 = arith.mulf %77, %73 : vector<256x32xf32>
    %cst_22 = arith.constant 1.42141378 : f32
    %79 = vector.broadcast %cst_22 : f32 to vector<256x32xf32>
    %80 = arith.addf %78, %79 : vector<256x32xf32>
    %81 = arith.mulf %80, %73 : vector<256x32xf32>
    %cst_23 = arith.constant -0.284496725 : f32
    %82 = vector.broadcast %cst_23 : f32 to vector<256x32xf32>
    %83 = arith.addf %81, %82 : vector<256x32xf32>
    %84 = arith.mulf %83, %73 : vector<256x32xf32>
    %cst_24 = arith.constant 0.254829586 : f32
    %85 = vector.broadcast %cst_24 : f32 to vector<256x32xf32>
    %86 = arith.addf %84, %85 : vector<256x32xf32>
    %87 = arith.mulf %86, %73 : vector<256x32xf32>
    %cst_25 = arith.constant 5.000000e-01 : f32
    %88 = vector.broadcast %cst_25 : f32 to vector<256x32xf32>
    %89 = arith.mulf %88, %87 : vector<256x32xf32>
    %cst_26 = arith.constant 0.000000e+00 : f32
    %90 = vector.broadcast %cst_26 : f32 to vector<256x32xf32>
    %91 = arith.subf %90, %67 : vector<256x32xf32>
    %92 = arith.mulf %91, %67 : vector<256x32xf32>
    %93 = math.exp %92 : vector<256x32xf32>
    %94 = arith.mulf %89, %93 : vector<256x32xf32>
    %cst_27 = arith.constant 0.000000e+00 : f32
    %95 = vector.broadcast %cst_27 : f32 to vector<256x32xf32>
    %96 = arith.cmpf oge, %66, %95 : vector<256x32xf32>
    %cst_28 = arith.constant 1.000000e+00 : f32
    %97 = vector.broadcast %cst_28 : f32 to vector<256x32xf32>
    %98 = arith.subf %97, %94 : vector<256x32xf32>
    %99 = arith.select %96, %98, %94 : vector<256x32xi1>, vector<256x32xf32>
    %100 = arith.mulf %64, %99 : vector<256x32xf32>
    %101 = tpu.transpose %100, [1, 0] : vector<256x32xf32> -> vector<32x256xf32>
    %c0_29 = arith.constant 0 : index
    %c0_30 = arith.constant 0 : index
    %c0_31 = arith.constant 0 : index
    %102 = vector.load %arg3[%c0_29, %c0_30, %c0_31] : memref<1x32x256xf32, #tpu.memory_space<vmem>>, vector<1x32x256xf32>
    %103 = vector.shape_cast %102 : vector<1x32x256xf32> to vector<32x256xf32>
    %104 = vector.shape_cast %101 : vector<32x256xf32> to vector<1x32x256xf32>
    tpu.vector_store %arg3[%c0_29, %c0_30, %c0_31], %104 {strides = array<i32>} : memref<1x32x256xf32, #tpu.memory_space<vmem>>, vector<1x32x256xf32>,
    return
  }
  func.func @transform_0(%arg0: i32) -> (i32, i32, i32) {
    %c0_i32 = arith.constant 0 : i32
    %c0_i32_0 = arith.constant 0 : i32
    %c0_i32_1 = arith.constant 0 : i32
    return %arg0, %c0_i32, %c0_i32_0 : i32, i32, i32
  }
  func.func @transform_1(%arg0: i32) -> (i32, i32) {
    %c0_i32 = arith.constant 0 : i32
    %c0_i32_0 = arith.constant 0 : i32
    %c0_i32_1 = arith.constant 0 : i32
    return %c0_i32, %c0_i32_0 : i32, i32
  }
  func.func @transform_2(%arg0: i32) -> (i32, i32, i32) {
    %c0_i32 = arith.constant 0 : i32
    %c0_i32_0 = arith.constant 0 : i32
    %c0_i32_1 = arith.constant 0 : i32
    return %arg0, %c0_i32, %c0_i32_0 : i32, i32, i32
  }
}

</mosaic_0001>

<bundles_post_ra>
// kernel: tpu_custom_call.1
= control target key start
LH: loop header
LB: loop body
LE: loop exit
PB: predicated region body
PF: predicated region fallthrough
CT: control target
= control target key end

     0   :  { %7 = vsyncpa [#allocation3], 0  ;;  %s6921_s0 = inlined_call_operand.vmem [shape: f32[2,4,256], index: 0, kind: input, shape index: {}]   ;;  %s6922_s1 = inlined_call_operand.vmem [shape: f32[36,32], index: 1, kind: input, shape index: {}]   ;;  %s6923_s2 = inlined_call_operand.hbm [shape: f32[2,32,256], index: 2, kind: output, shape index: {}]  }
   0x1   :  { %9 = vsyncpa [#allocation3 + $0x1], 0  ;;  %s3629_s9 = smov 0   ;;  %s3631_s10 = smov 0  }
   0x2   :  { %s3633_s11 = smov 0   ;;  %s3635_s12 = smov 0  }
   0x3 LB: > { %s3650_s13 = sadd.s32 4294967295, %s3600_s12   ;;  %s3174_s14 = sadd.s32 4294967294, %s3600_s12   ;;  %s3600_s12 = sphi %s3635_s12, %s7466_s12   ;;  %s3596_s11 = sphi %s3633_s11, %s7465_s11   ;;  %s3592_s10 = sphi %s3631_s10, %s7464_s10   ;;  %s3588_s9 = sphi %s3629_s9, %s7463_s9  }
   0x4   : > { %s3654_s15 = sadd.s32 1, %s3600_s12   ;;  %s69_s16 = sadd.s32 1, %s3596_s11 }
   0x5   : > { %s66_s17 = ssub.s32 %s3600_s12, %s3654_s15  ;;  %p79_p0 = scmp.ne.s32.totalorder %s3596_s11, %s3592_s10 }
   0x6   : > { %p67_p1 = scmp.eq.s32.totalorder %s66_s17, 0  ;;  %p80_p2 = scmp.eq.s32.totalorder %s3650_s13, 1 }
   0x7   : > { %p85_p3 = scmp.ne.s32.totalorder %s3592_s10, %s3588_s9  ;;  %p86_p4 = scmp.eq.s32.totalorder %s3174_s14, 1 }
   0x8   : > { %s3665_s18 = scalar_select %p67_p1, %s3596_s11, %s69_s16  }
   0x9   : > { %p3667_p5 = por %p80_p2, %p79_p0  ;;  %p3671_p6 = por %p86_p4, %p85_p3 }
   0xa   : > { %p3177_p7 = scmp.ge.s32.totalorder %s3600_s12, 1  ;;  %p115_p8 = scmp.lt.s32.totalorder %s3600_s12, 3 }
   0xc   : > { %p116_p9 = pnand %p3177_p7, %p115_p8 }
   0xe   : > { %119 = sbr.rel (%p116_p9) target bundleno = 1868 (0x74c), region = 28 }
  0x15   : > { %p137_p10 = scmp.lt.s32.totalorder %s3650_s13, 1  ;;  %vm286_vm0 = vcmask 1040384   ;;  %v3602_v0 = vmov 0.0   ;;  %vm146_vm1 = vcmask 1043456   ;;  %vm452_vm2 = vcmask 1046528   ;;  %s3603_s26 = smov 4  }
  0x16   : > { %v3678_v1 = vrot.slane %v3602_v0, 7  ;;  %vm533_vm3 = vcmask 1045504   ;;  %s3604_s27 = smov 8   ;;  %v3605_v21 = vmov 839922192   ;;  %v158_v23 = vlaneseq  ;;  %s3606_s28 = smov 12  }
  0x17   : > { %s138_s21 = scalar_select %p137_p10, %s3650_s13, 1  ;;  %v156_v22 = vunpack.c.l.s4 %v3605_v21  ;;  %vm1394_vm4 = vcmask 31744   ;;  %vm1427_vm5 = vcmask 64512   ;;  %vm1460_vm6 = vcmask 97280  }
  0x18   : > { %v3683_v2 = vsel %vm286_vm0, 0.0, %v3678_v1  ;;  %v403_v3 = vsel %vm286_vm0, %v3678_v1, 0.0  ;;  %v454_v4 = vrot.slane %v3678_v1, 1  ;;  %v535_v5 = vrot.slane %v3678_v1, 2  ;;  %s3607_s29 = smov 24   ;;  %s3608_s30 = smov 28  }
  0x19   : > { %7045 = vst [vmem:[#allocation5_spill] sm:$0xff] %v3683_v2  ;;  %s3219_s22 = sshll.u32 %s138_s21, 3  ;;  %v453_v6 = vrot.slane %v3683_v2, 1  ;;  %v456_v7 = vrot.slane %v403_v3, 1  ;;  %v534_v8 = vrot.slane %v3683_v2, 2  ;;  %v537_v9 = vrot.slane %v403_v3, 2 }
  0x1a   : > { %s141_s25 = scalar_lea.vmem %s6921_s0, %s3219_s22  ;;  %v157_v24 = vunpack.c.0.s8 %v156_v22  ;;  %v159_v25 = vshrl.u32 %v158_v23, 7  ;;  %s3609_s3 = smov 16   ;;  %vm1493_vm7 = vcmask 130048   ;;  %vm1526_vm8 = vcmask 162816  }
  0x1b   : > { %v142_v10 = vld [vmem:[%s141_s25] sm:$0xff]  ;;  %v455_v11 = vsel %vm452_vm2, %v453_v6, %v454_v4  ;;  %v457_v12 = vsel %vm452_vm2, %v454_v4, %v456_v7  ;;  %v536_v13 = vsel %vm533_vm3, %v534_v8, %v535_v5  ;;  %v538_v17 = vsel %vm533_vm3, %v535_v5, %v537_v9  ;;  %s3610_s4 = smov 20   ;;  %s3611_s5 = smov 32  }
  0x1c   : > { %v144_v14 = vcombine.high %v142_v10, %v142_v10  ;;  %v147_v15 = vsel %vm146_vm1, %v142_v10, 0.0  ;;  %v3698_v16 = vpack.i.bf16 %v457_v12, %v455_v11  ;;  %v3701_v18 = vpack.i.bf16 %v538_v17, %v536_v13  ;;  %s134_s25 = sand.u32 1, %s3592_s10  }
  0x1d   : > { %v160_v26 = vsub.s32 %v157_v24, %v159_v25  ;;  %vm1559_vm9 = vcmask 195584   ;;  %vm1592_vm10 = vcmask 228352   ;;  %vm1625_vm11 = vcmask 261120   ;;  %s6879_s6 = scalar_lea.sflag [#allocation3], %s134_s25 }
  0x1e   : > { %7046 = vst [vmem:[#allocation6_spill] sm:$0xff] %v3698_v16  ;;  %7047 = vst [vmem:[#allocation7_spill] sm:$0xff] %v3701_v18  ;;  %v148_v19 = vsel %vm146_vm1, %v144_v14, 0.0  ;;  %vm1663_vm12 = vcmask 293888  }
  0x1f   : > { %v149_v20 = vadd.f32 %v148_v19, %v147_v15 }
  0x21   : > { %150 = vadd.xlane.f32.xlu0 %v149_v20 }
  0x37   : > { %3381 = vrot.lane.b32.xlu0 %v3698_v16, %s3603_s26 }
  0x3b   : > { %3386 = vrot.lane.b32.xlu0 %v3701_v18, %s3604_s27 }
  0xae   : > { %v151_v27 = vpop.xlane.xlu0 %150 }
  0xaf   : > { %v153_v28 = vmul.f32 0.00390625, %v151_v27 }
  0xb1   : > { %v161_v29 = vrot.slane %v153_v28, %v160_v26 }
  0xb2   : > { %v3710_v36 = vpop.permute.xlu0 %3381 }
  0xb3   : > { %v163_v30 = vsub.f32 %v142_v10, %v161_v29 }
  0xb5   : > { %v164_v31 = vmul.f32 %v163_v30, %v163_v30 }
  0xb6   : > { %v3712_v37 = vpop.permute.xlu0 %3386 }
  0xb7   : > { %v166_v32 = vcombine.high %v164_v31, %v164_v31  ;;  %v168_v33 = vsel %vm146_vm1, %v164_v31, 0.0 }
  0xb9   : > { %v169_v34 = vsel %vm146_vm1, %v166_v32, 0.0 }
  0xba   : > { %v170_v35 = vadd.f32 %v169_v34, %v168_v33 }
  0xbc   : > { %171 = vadd.xlane.f32.xlu0 %v170_v35 }
 0x149   : > { %v172_v38 = vpop.xlane.xlu0 %171 }
 0x14a   : > { %v173_v39 = vmul.f32 0.00390625, %v172_v38 }
 0x14c   : > { %v174_v40 = vadd.f32 1e-05, %v173_v39 }
 0x14e   : > { %3406 = vrsqrt.f32 %v174_v40 }
 0x158   : > { %v3407_v41 = vpop.eup %3406 }
 0x159   : > { %v183_v42 = vrot.slane %v3407_v41, %v160_v26 }
 0x15b   : > { %v185_v43 = vmul.f32 %v183_v42, %v163_v30 }
 0x15d   : > { %189 = vxpose.xlu1.b32.start.end [1/1] (short) %v185_v43, 128  ;;  %v187_v44 = vcombine.high %v185_v43, %v185_v43 }
 0x19a   : > { %221 = vxpose.xlu1.b32.start.end [1/1] (short) %v187_v44, 128 }
 0x1dd   : > { %v205_v45 = vpop.trf.xlu1 }
 0x1de   : > { %v289_v46 = vrot.slane %v205_v45, 7 }
 0x1e0   : > { %v3715_v47 = vsel %vm286_vm0, 0.0, %v289_v46 }
 0x1e1   : > { %818 = vrot.lane.b32.xlu0 %v3715_v47, %s3606_s28  ;;  %v206_v48 = vpop.trf.xlu1  ;;  %v458_v24 = vrot.slane %v3715_v47, 1  ;;  %v539_v41 = vrot.slane %v3715_v47, 2 }
 0x1e2   : > { %v290_v52 = vrot.slane %v206_v48, 7 }
 0x1e4   : > { %v3727_v56 = vsel %vm286_vm0, %v289_v46, %v290_v52  ;;  %v404_v22 = vsel %vm286_vm0, %v290_v52, 0.0 }
 0x1e5   : > { %v3719_v49 = vpop.trf.xlu1  ;;  %v459_v21 = vrot.slane %v3727_v56, 1  ;;  %v461_v25 = vrot.slane %v404_v22, 1  ;;  %v540_v40 = vrot.slane %v3727_v56, 2  ;;  %v542_v45 = vrot.slane %v404_v22, 2 }
 0x1e7   : > { %v460_v27 = vsel %vm452_vm2, %v458_v24, %v459_v21  ;;  %v462_v29 = vsel %vm452_vm2, %v459_v21, %v461_v25  ;;  %v541_v43 = vsel %vm533_vm3, %v539_v41, %v540_v40 }
 0x1e9   : > { %v3721_v50 = vpop.trf.xlu1 }
 0x1ed   : > { %v3723_v51 = vpop.trf.xlu1 }
 0x1ee   : > { %v295_v54 = vrot.slane %v3723_v51, 7 }
 0x1f1   : > { %v210_v53 = vpop.trf.xlu1 }
 0x1f2   : > { %v296_v55 = vrot.slane %v210_v53, 7 }
 0x1f4   : > { %v3732_v57 = vsel %vm286_vm0, %v295_v54, %v296_v55  ;;  %v406_v58 = vsel %vm286_vm0, %v296_v55, 0.0  ;;  %820 = vrot.lane.b32.xlu1 %v3727_v56, %s3606_s28  ;;  %v543_v55 = vsel %vm533_vm3, %v540_v40, %v542_v45 }
 0x1f5   : > { %7048 = vst [vmem:[#allocation8_spill] sm:$0xff] %v3732_v57  ;;  %v471_v59 = vrot.slane %v406_v58, 1  ;;  %v552_v60 = vrot.slane %v406_v58, 2  ;;  %v3737_v61 = vpop.trf.xlu1  ;;  %v469_v62 = vrot.slane %v3732_v57, 1  ;;  %v550_v63 = vrot.slane %v3732_v57, 2 }
 0x1f7   : > { %v3744_v0 = vsel %vm452_vm2, %v469_v62, %v471_v59  ;;  %v3749_v3 = vsel %vm533_vm3, %v550_v63, %v552_v60  ;;  %v292_v60 = vrot.slane %v3719_v49, 7 }
 0x1f9   : > { %v3751_v4 = vpop.trf.xlu1  ;;  %v3837_v21 = vsel %vm286_vm0, 0.0, %v292_v60 }
 0x1fd   : > { %v3753_v5 = vpop.trf.xlu1 }
 0x201   : > { %v3755_v6 = vpop.trf.xlu1 }
 0x205   : > { %v3757_v7 = vpop.trf.xlu1 }
 0x209   : > { %v3759_v8 = vpop.trf.xlu1 }
 0x20d   : > { %v3761_v9 = vpop.trf.xlu1 }
 0x211   : > { %v3763_v10 = vpop.trf.xlu1 }
 0x215   : > { %v3765_v11 = vpop.trf.xlu1 }
 0x219   : > { %v3767_v12 = vpop.trf.xlu1 }
 0x21d   : > { %v237_v13 = vpop.trf.xlu1 }
 0x21e   : > { %v313_v14 = vrot.slane %v237_v13, 7 }
 0x220   : > { %v3770_v15 = vsel %vm286_vm0, 0.0, %v313_v14 }
 0x221   : > { %7049 = vst [vmem:[#allocation9_spill] sm:$0xff] %v3770_v15  ;;  %1134 = vrot.lane.b32.xlu0 %v3770_v15, %s3607_s29  ;;  %v238_v17 = vpop.trf.xlu1  ;;  %v498_v32 = vrot.slane %v3770_v15, 1  ;;  %v579_v35 = vrot.slane %v3770_v15, 2 }
 0x222   : > { %v314_v19 = vrot.slane %v238_v17, 7 }
 0x224   : > { %v3775_v20 = vsel %vm286_vm0, %v313_v14, %v314_v19  ;;  %v412_v23 = vsel %vm286_vm0, %v314_v19, 0.0 }
 0x225   : > { %7050 = vst [vmem:[#allocation10_spill] sm:$0xff] %v3775_v20  ;;  %850 = vrot.lane.b32.xlu0 %v3770_v15, %s3606_s28  ;;  %1136 = vrot.lane.b32.xlu1 %v3775_v20, %s3607_s29  ;;  %v501_v26 = vrot.slane %v412_v23, 1  ;;  %v499_v28 = vrot.slane %v3775_v20, 1  ;;  %v239_v31 = vpop.trf.xlu1  ;;  %v580_v34 = vrot.slane %v3775_v20, 2  ;;  %v582_v42 = vrot.slane %v412_v23, 2 }
 0x226   : > { %v316_v48 = vrot.slane %v239_v31, 7 }
 0x227   : > { %v3792_v30 = vsel %vm452_vm2, %v499_v28, %v501_v26  ;;  %v500_v33 = vsel %vm452_vm2, %v498_v32, %v499_v28  ;;  %v581_v39 = vsel %vm533_vm3, %v579_v35, %v580_v34  ;;  %v583_v46 = vsel %vm533_vm3, %v580_v34, %v582_v42 }
 0x228   : > { %v3834_v19 = vsel %vm286_vm0, 0.0, %v316_v48 }
 0x229   : > { %630 = vrot.lane.b32.xlu0 %v460_v27, %s3603_s26  ;;  %852 = vrot.lane.b32.xlu1 %v3775_v20, %s3606_s28  ;;  %v240_v38 = vpop.trf.xlu1  ;;  %7052 = vst [vmem:[#allocation12_spill] sm:$0xff] %v3834_v19  ;;  %v503_v22 = vrot.slane %v3834_v19, 1  ;;  %v584_v25 = vrot.slane %v3834_v19, 2 }
 0x22a   : > { %v317_v52 = vrot.slane %v240_v38, 7 }
 0x22c   : > { %v3823_v58 = vsel %vm286_vm0, %v316_v48, %v317_v52  ;;  %v413_v59 = vsel %vm286_vm0, %v317_v52, 0.0  ;;  %v463_v48 = vrot.slane %v3837_v21, 1 }
 0x22d   : > { %632 = vrot.lane.b32.xlu0 %v462_v29, %s3603_s26  ;;  %1232 = vrot.lane.b32.xlu1 %v3792_v30, %s3608_s30  ;;  %v3809_v44 = vpop.trf.xlu1  ;;  %7051 = vst [vmem:[#allocation11_spill] sm:$0xff] %v3823_v58  ;;  %v506_v14 = vrot.slane %v413_v59, 1  ;;  %v504_v17 = vrot.slane %v3823_v58, 1  ;;  %v585_v26 = vrot.slane %v3823_v58, 2 }
 0x22f   : > { %v3844_v49 = vsel %vm452_vm2, %v504_v17, %v506_v14  ;;  %v3854_v24 = vsel %vm452_vm2, %v503_v22, %v504_v17  ;;  %v3864_v28 = vsel %vm533_vm3, %v584_v25, %v585_v26 }
 0x231   : > { %914 = vrot.lane.b32.xlu0 %v460_v27, %s3609_s3  ;;  %662 = vrot.lane.b32.xlu1 %v500_v33, %s3603_s26  ;;  %v3817_v53 = vpop.trf.xlu1 }
 0x232   : > { %v320_v35 = vrot.slane %v3817_v53, 7 }
 0x234   : > { %v414_v17 = vsel %vm286_vm0, %v320_v35, 0.0 }
 0x235   : > { %916 = vrot.lane.b32.xlu0 %v462_v29, %s3609_s3  ;;  %1042 = vrot.lane.b32.xlu1 %v581_v39, %s3610_s4  ;;  %v3827_v13 = vpop.trf.xlu1  ;;  %v587_v29 = vrot.slane %v413_v59, 2 }
 0x237   : > { %v3875_v32 = vsel %vm533_vm3, %v585_v26, %v587_v29  ;;  %v1658_v29 = vld [vmem:[%s6922_s1] sm:$0xff] }
 0x239   : > { %1010 = vrot.lane.b32.xlu0 %v541_v43, %s3610_s4  ;;  %664 = vrot.lane.b32.xlu1 %v3792_v30, %s3603_s26  ;;  %v3847_v23 = vpop.trf.xlu1 }
 0x23a   : > { %v323_v16 = vrot.slane %v3847_v23, 7 }
 0x23d   : > { %726 = vrot.lane.b32.xlu0 %v541_v43, %s3604_s27  ;;  %1044 = vrot.lane.b32.xlu1 %v583_v46, %s3610_s4  ;;  %v3858_v27 = vpop.trf.xlu1 }
 0x241   : > { %1012 = vrot.lane.b32.xlu0 %v543_v55, %s3610_s4  ;;  %760 = vrot.lane.b32.xlu1 %v583_v46, %s3604_s27  ;;  %v3869_v31 = vpop.trf.xlu1 }
 0x245   : > { %728 = vrot.lane.b32.xlu0 %v543_v55, %s3604_s27  ;;  %1140 = vrot.lane.b32.xlu1 %v3823_v58, %s3607_s29  ;;  %v3877_v34 = vpop.trf.xlu1  ;;  %v6927_v55 = vrot.slane %v3737_v61, 7 }
 0x246   : > { %7053 = vst [vmem:[#allocation13_spill] sm:$0xff] %v3877_v34 }
 0x247   : > { %v3954_v22 = vsel %vm286_vm0, 0.0, %v6927_v55 }
 0x248   : > { %7061 = vst [vmem:[#allocation21_spill] sm:$0xff] %v3954_v22 }
 0x249   : > { %1106 = vrot.lane.b32.xlu0 %v3837_v21, %s3607_s29  ;;  %856 = vrot.lane.b32.xlu1 %v3823_v58, %s3606_s28  ;;  %v3891_v40 = vpop.trf.xlu1 }
 0x24a   : > { %7055 = vst [vmem:[#allocation15_spill] sm:$0xff] %v3891_v40  ;;  %v305_v40 = vrot.slane %v3759_v8, 7 }
 0x24c   : > { %v409_v34 = vsel %vm286_vm0, %v305_v40, 0.0 }
 0x24d   : > { %822 = vrot.lane.b32.xlu0 %v3837_v21, %s3606_s28  ;;  %1236 = vrot.lane.b32.xlu1 %v3844_v49, %s3608_s30  ;;  %v3901_v41 = vpop.trf.xlu1 }
 0x24e   : > { %7057 = vst [vmem:[#allocation17_spill] sm:$0xff] %v3901_v41 }
 0x251   : > { %1230 = vrot.lane.b32.xlu0 %v500_v33, %s3608_s30  ;;  %666 = vrot.lane.b32.xlu1 %v3854_v24, %s3603_s26  ;;  %v3918_v51 = vpop.trf.xlu1 }
 0x252   : > { %7058 = vst [vmem:[#allocation18_spill] sm:$0xff] %v3918_v51 }
 0x255   : > { %946 = vrot.lane.b32.xlu0 %v500_v33, %s3609_s3  ;;  %1046 = vrot.lane.b32.xlu1 %v3864_v28, %s3610_s4  ;;  %v319_v33 = vrot.slane %v3809_v44, 7 }
 0x257   : > { %v3889_v38 = vsel %vm286_vm0, %v319_v33, %v320_v35  ;;  %v1659_v35 = vld [vmem:[%s6922_s1 + $0x8] sm:$0xff] }
 0x258   : > { %7054 = vst [vmem:[#allocation14_spill] sm:$0xff] %v3889_v38 }
 0x259   : > { %1326 = vrot.lane.b32.xlu0 %v581_v39, %s3611_s5  ;;  %668 = vrot.lane.b32.xlu1 %v3844_v49, %s3603_s26 }
 0x25d   : > { %948 = vrot.lane.b32.xlu0 %v3792_v30, %s3609_s3  ;;  %1048 = vrot.lane.b32.xlu1 %v3875_v32, %s3610_s4  ;;  %v3899_v30 = vsel %vm286_vm0, 0.0, %v295_v54 }
 0x25e   : > { %7056 = vst [vmem:[#allocation16_spill] sm:$0xff] %v3899_v30  ;;  %v468_v42 = vrot.slane %v3899_v30, 1 }
 0x260   : > { %v3912_v43 = vsel %vm452_vm2, %v468_v42, %v469_v62 }
 0x261   : > { %1328 = vrot.lane.b32.xlu0 %v583_v46, %s3611_s5  ;;  %764 = vrot.lane.b32.xlu1 %v3875_v32, %s3604_s27  ;;  %v251_v46 = vpop.trf.xlu1 }
 0x262   : > { %v334_v59 = vrot.slane %v251_v46, 7  ;;  %v509_v46 = vrot.slane %v3889_v38, 1 }
 0x264   : > { %v3962_v26 = vsel %vm286_vm0, 0.0, %v334_v59 }
 0x265   : > { %758 = vrot.lane.b32.xlu0 %v581_v39, %s3604_s27  ;;  %1144 = vrot.lane.b32.xlu1 %v3889_v38, %s3607_s29  ;;  %v293_v39 = vrot.slane %v3721_v50, 7  ;;  %v549_v50 = vrot.slane %v3899_v30, 2  ;;  %7063 = vst [vmem:[#allocation23_spill] sm:$0xff] %v3962_v26 }
 0x267   : > { %v3921_v54 = vsel %vm286_vm0, %v292_v60, %v293_v39  ;;  %v551_v62 = vsel %vm533_vm3, %v549_v50, %v550_v63  ;;  %v3933_v45 = vsel %vm286_vm0, %v293_v39, 0.0  ;;  %v3943_v63 = vpop.trf.xlu1  ;;  %v616_v50 = vrot.slane %v3962_v26, 1 }
 0x268   : > { %7059 = vst [vmem:[#allocation19_spill] sm:$0xff] %v3921_v54  ;;  %v464_v44 = vrot.slane %v3921_v54, 1  ;;  %v466_v52 = vrot.slane %v3933_v45, 1  ;;  %7060 = vst [vmem:[#allocation20_spill] sm:$0xff] %v3943_v63  ;;  %v6924_v60 = vrot.slane %v3943_v63, 7 }
 0x269   : > { %1138 = vrot.lane.b32.xlu0 %v3834_v19, %s3607_s29  ;;  %860 = vrot.lane.b32.xlu1 %v3889_v38, %s3606_s28 }
 0x26a   : > { %v465_v53 = vsel %vm452_vm2, %v463_v48, %v464_v44  ;;  %v467_v14 = vsel %vm452_vm2, %v464_v44, %v466_v52  ;;  %v3959_v25 = vsel %vm286_vm0, %v334_v59, %v6924_v60  ;;  %v511_v44 = vrot.slane %v414_v17, 1 }
 0x26b   : > { %7062 = vst [vmem:[#allocation22_spill] sm:$0xff] %v3959_v25  ;;  %v6926_v42 = vrot.slane %v3959_v25, 1  ;;  %v6925_v39 = vrot.slane %v3959_v25, 2  ;;  %v3316_v48 = vpack.c.bf16 %v1659_v35, %v1658_v29  ;;  %v3979_v52 = vsel %vm286_vm0, 0.0, %v319_v33  ;;  %v1660_v33 = vld [vmem:[%s6922_s1 + $0x10] sm:$0xff]  ;;  %v1661_v29 = vld [vmem:[%s6922_s1 + $0x18] sm:$0xff] }
 0x26c   : > { %7064 = vst [vmem:[#allocation24_spill] sm:$0xff] %v3979_v52  ;;  %v4001_v35 = vsel %vm452_vm2, %v509_v46, %v511_v44  ;;  %v544_v44 = vrot.slane %v3837_v21, 2 }
 0x26d   : > { %854 = vrot.lane.b32.xlu0 %v3834_v19, %s3606_s28  ;;  %1206 = vrot.lane.b32.xlu1 %v3912_v43, %s3608_s30  ;;  %v3984_v59 = vsel %vm452_vm2, %v616_v50, %v6926_v42  ;;  %v508_v50 = vrot.slane %v3979_v52, 1 }
 0x26e   : > { %7065 = vst [vmem:[#allocation25_spill] sm:$0xff] %v3984_v59  ;;  %3317 = vmatprep.subr.bf16.mxu0 %v3316_v48  ;;  %3324 = vmatprep.subr.bf16.mxu1 %v3316_v48 }
 0x26f   : > { %3319 = vmatpush3.bf16.msra.mxu0 %v3316_v48  ;;  %3327 = vmatpush3.bf16.msra.mxu1 %v3316_v48  ;;  %v4013_v42 = vsel %vm452_vm2, %v508_v50, %v509_v46  ;;  %v589_v48 = vrot.slane %v3979_v52, 2  ;;  %v4028_v50 = vpop.permute.xlu0 %818 }
 0x271   : > { %1108 = vrot.lane.b32.xlu0 %v3921_v54, %s3607_s29  ;;  %922 = vrot.lane.b32.xlu1 %v3912_v43, %s3609_s3 }
 0x275   : > { %824 = vrot.lane.b32.xlu0 %v3921_v54, %s3606_s28  ;;  %1302 = vrot.lane.b32.xlu1 %v551_v62, %s3611_s5 }
 0x279   : > { %634 = vrot.lane.b32.xlu0 %v465_v53, %s3603_s26  ;;  %1018 = vrot.lane.b32.xlu1 %v551_v62, %s3610_s4 }
 0x27d   : > { %636 = vrot.lane.b32.xlu0 %v467_v14, %s3603_s26  ;;  %734 = vrot.lane.b32.xlu1 %v551_v62, %s3604_s27  ;;  %v621_v62 = vrot.slane %v3962_v26, 2 }
 0x27f   : > { %v3989_v60 = vsel %vm533_vm3, %v621_v62, %v6925_v39  ;;  %v3320_v62 = vpack.c.bf16 %v1661_v29, %v1660_v33  ;;  %v1662_v39 = vld [vmem:[%s6922_s1 + $0x20] sm:$0xf]  ;;  %v590_v33 = vrot.slane %v3889_v38, 2  ;;  %v547_v38 = vrot.slane %v3933_v45, 2 }
 0x280   : > { %7066 = vst [vmem:[#allocation26_spill] sm:$0xff] %v3989_v60  ;;  %v322_v45 = vrot.slane %v3827_v13, 7  ;;  %v7073_v13 = vrot.slane %v3737_v61, 7  ;;  %v473_v61 = vrot.slane %v3954_v22, 1 }
 0x281   : > { %1202 = vrot.lane.b32.xlu0 %v465_v53, %s3608_s30  ;;  %1114 = vrot.lane.b32.xlu1 %v3954_v22, %s3607_s29  ;;  %v4024_v46 = vsel %vm533_vm3, %v589_v48, %v590_v33 }
 0x282   : > { %3321 = vmatprep.subr.bf16.mxu0 %v3320_v62  ;;  %3325 = vmatprep.subr.bf16.mxu1 %v3320_v62 }
 0x283   : > { %3323 = vmatpush3.bf16.msra.mxu0 %v3320_v62  ;;  %3328 = vmatpush3.bf16.msra.mxu1 %v3320_v62  ;;  %v592_v62 = vrot.slane %v414_v17, 2 }
 0x284   : > { %3266 = vmatprep.subr.msk.mxu0 %vm146_vm1, %v1662_v39  ;;  %3326 = vmatprep.subr.msk.mxu1 %vm146_vm1, %v1662_v39 }
 0x285   : > { %918 = vrot.lane.b32.xlu0 %v465_v53, %s3609_s3  ;;  %830 = vrot.lane.b32.xlu1 %v3954_v22, %s3606_s28  ;;  %v545_v53 = vrot.slane %v3921_v54, 2 }
 0x287   : > { %v546_v29 = vsel %vm533_vm3, %v544_v44, %v545_v53  ;;  %3267 = vmatpush3.msk.msra.mxu0 %vm146_vm1, %v1662_v39  ;;  %3329 = vmatpush3.msk.msra.mxu1 %vm146_vm1, %v1662_v39  ;;  %v4033_v44 = vpop.permute.xlu1 %820  ;;  %v4042_v39 = vsel %vm533_vm3, %v590_v33, %v592_v62  ;;  %v548_v17 = vsel %vm533_vm3, %v545_v53, %v547_v38  ;;  %v299_v33 = vrot.slane %v3751_v4, 7 }
 0x288   : > { %v4063_v38 = vsel %vm286_vm0, %v322_v45, %v323_v16 }
 0x289   : > { %1204 = vrot.lane.b32.xlu0 %v467_v14, %s3608_s30  ;;  %1240 = vrot.lane.b32.xlu1 %v4001_v35, %s3608_s30  ;;  %7071 = vst [vmem:[#allocation31_spill] sm:$0xff] %v4063_v38  ;;  %v4072_v23 = vsel %vm286_vm0, %v7073_v13, %v299_v33 }
 0x28a   : > { %v555_v60 = vrot.slane %v4072_v23, 2 }
 0x28d   : > { %1298 = vrot.lane.b32.xlu0 %v546_v29, %s3611_s5  ;;  %670 = vrot.lane.b32.xlu1 %v4013_v42, %s3603_s26 }
 0x291   : > { %920 = vrot.lane.b32.xlu0 %v467_v14, %s3609_s3  ;;  %1050 = vrot.lane.b32.xlu1 %v4024_v46, %s3610_s4 }
 0x293   : > { %v4035_v55 = vpop.permute.xlu0 %1134 }
 0x294   : > { %7067 = vst [vmem:[#allocation27_spill] sm:$0xff] %v4035_v55 }
 0x295   : > { %1014 = vrot.lane.b32.xlu0 %v546_v29, %s3610_s4  ;;  %672 = vrot.lane.b32.xlu1 %v4001_v35, %s3603_s26 }
 0x297   : > { %v4044_v48 = vpop.permute.xlu0 %850  ;;  %v4046_v14 = vpop.permute.xlu1 %1136 }
 0x298   : > { %7068 = vst [vmem:[#allocation28_spill] sm:$0xff] %v4044_v48  ;;  %7069 = vst [vmem:[#allocation29_spill] sm:$0xff] %v4046_v14  ;;  %v474_v48 = vrot.slane %v4072_v23, 1 }
 0x299   : > { %1300 = vrot.lane.b32.xlu0 %v548_v17, %s3611_s5  ;;  %1052 = vrot.lane.b32.xlu1 %v4042_v39, %s3610_s4 }
 0x29b   : > { %v4054_v19 = vpop.permute.xlu0 %630  ;;  %v4056_v58 = vpop.permute.xlu1 %852 }
 0x29c   : > { %7070 = vst [vmem:[#allocation30_spill] sm:$0xff] %v4056_v58  ;;  %v407_v58 = vsel %vm286_vm0, %v299_v33, 0.0 }
 0x29d   : > { %730 = vrot.lane.b32.xlu0 %v546_v29, %s3604_s27  ;;  %768 = vrot.lane.b32.xlu1 %v4042_v39, %s3604_s27  ;;  %v476_v59 = vrot.slane %v407_v58, 1 }
 0x29f   : > { %v4065_v53 = vpop.permute.xlu0 %632  ;;  %v4067_v62 = vpop.permute.xlu1 %1232  ;;  %v4132_v26 = vsel %vm452_vm2, %v474_v48, %v476_v59  ;;  %v514_v59 = vrot.slane %v4063_v38, 1 }
 0x2a0   : > { %7072 = vst [vmem:[#allocation32_spill] sm:$0xff] %v4067_v62  ;;  %v4091_v62 = vsel %vm452_vm2, %v473_v61, %v474_v48  ;;  %v554_v61 = vrot.slane %v3954_v22, 2  ;;  %v4152_v48 = vsel %vm286_vm0, 0.0, %v322_v45 }
 0x2a1   : > { %1016 = vrot.lane.b32.xlu0 %v548_v17, %s3610_s4  ;;  %1148 = vrot.lane.b32.xlu1 %v4063_v38, %s3607_s29  ;;  %7081 = vst [vmem:[#allocation40_spill] sm:$0xff] %v4152_v48  ;;  %v594_v45 = vrot.slane %v4152_v48, 2 }
 0x2a2   : > { %v4112_v14 = vsel %vm533_vm3, %v554_v61, %v555_v60 }
 0x2a3   : > { %v4077_v4 = vpop.permute.xlu0 %914  ;;  %v4079_v29 = vpop.permute.xlu1 %662 }
 0x2a4   : > { %7074 = vst [vmem:[#allocation33_spill] sm:$0xff] %v4079_v29 }
 0x2a5   : > { %732 = vrot.lane.b32.xlu0 %v548_v17, %s3604_s27  ;;  %864 = vrot.lane.b32.xlu1 %v4063_v38, %s3606_s28 }
 0x2a7   : > { %v4086_v13 = vpop.permute.xlu0 %916  ;;  %v4088_v15 = vpop.permute.xlu1 %1042 }
 0x2a8   : > { %7075 = vst [vmem:[#allocation34_spill] sm:$0xff] %v4088_v15 }
 0x2a9   : > { %1110 = vrot.lane.b32.xlu0 %v3899_v30, %s3607_s29  ;;  %1210 = vrot.lane.b32.xlu1 %v4091_v62, %s3608_s30 }
 0x2ab   : > { %v4097_v29 = vpop.permute.xlu0 %1010  ;;  %v4099_v17 = vpop.permute.xlu1 %664 }
 0x2ac   : > { %7076 = vst [vmem:[#allocation35_spill] sm:$0xff] %v4099_v17 }
 0x2ad   : > { %826 = vrot.lane.b32.xlu0 %v3899_v30, %s3606_s28  ;;  %926 = vrot.lane.b32.xlu1 %v4091_v62, %s3609_s3 }
 0x2af   : > { %v4107_v15 = vpop.permute.xlu0 %726  ;;  %v4109_v20 = vpop.permute.xlu1 %1044 }
 0x2b0   : > { %7077 = vst [vmem:[#allocation36_spill] sm:$0xff] %v4109_v20  ;;  %v557_v20 = vrot.slane %v407_v58, 2 }
 0x2b1   : > { %1234 = vrot.lane.b32.xlu0 %v3854_v24, %s3608_s30  ;;  %1306 = vrot.lane.b32.xlu1 %v4112_v14, %s3611_s5 }
 0x2b2   : > { %v4144_v18 = vsel %vm533_vm3, %v555_v60, %v557_v20 }
 0x2b3   : > { %v4119_v17 = vpop.permute.xlu0 %1012  ;;  %v4121_v55 = vpop.permute.xlu1 %760 }
 0x2b4   : > { %7078 = vst [vmem:[#allocation37_spill] sm:$0xff] %v4121_v55  ;;  %v415_v55 = vsel %vm286_vm0, %v323_v16, 0.0 }
 0x2b5   : > { %950 = vrot.lane.b32.xlu0 %v3854_v24, %s3609_s3  ;;  %1022 = vrot.lane.b32.xlu1 %v4112_v14, %s3610_s4  ;;  %v516_v58 = vrot.slane %v415_v55, 1 }
 0x2b7   : > { %v4127_v61 = vpop.permute.xlu0 %728  ;;  %v4129_v33 = vpop.permute.xlu1 %1140  ;;  %v4163_v20 = vsel %vm452_vm2, %v514_v59, %v516_v58  ;;  %v595_v58 = vrot.slane %v4063_v38, 2 }
 0x2b8   : > { %7079 = vst [vmem:[#allocation38_spill] sm:$0xff] %v4129_v33 }
 0x2b9   : > { %1330 = vrot.lane.b32.xlu0 %v3864_v28, %s3611_s5  ;;  %644 = vrot.lane.b32.xlu1 %v4132_v26, %s3603_s26 }
 0x2bb   : > { %v4139_v24 = vpop.permute.xlu0 %1106  ;;  %v4141_v22 = vpop.permute.xlu1 %856 }
 0x2bc   : > { %7080 = vst [vmem:[#allocation39_spill] sm:$0xff] %v4141_v22 }
 0x2bd   : > { %952 = vrot.lane.b32.xlu0 %v3844_v49, %s3609_s3  ;;  %1024 = vrot.lane.b32.xlu1 %v4144_v18, %s3610_s4  ;;  %v513_v49 = vrot.slane %v4152_v48, 1 }
 0x2bf   : > { %v4154_v16 = vpop.permute.xlu0 %822  ;;  %v4156_v33 = vpop.permute.xlu1 %1236 }
 0x2c0   : > { %7082 = vst [vmem:[#allocation41_spill] sm:$0xff] %v4156_v33 }
 0x2c1   : > { %1332 = vrot.lane.b32.xlu0 %v3875_v32, %s3611_s5  ;;  %740 = vrot.lane.b32.xlu1 %v4144_v18, %s3604_s27  ;;  %v4175_v32 = vsel %vm452_vm2, %v513_v49, %v514_v59  ;;  %v597_v49 = vrot.slane %v415_v55, 2 }
 0x2c3   : > { %v4166_v60 = vpop.permute.xlu0 %1230  ;;  %v4168_v22 = vpop.permute.xlu1 %666 }
 0x2c4   : > { %7083 = vst [vmem:[#allocation42_spill] sm:$0xff] %v4166_v60  ;;  %7084 = vst [vmem:[#allocation43_spill] sm:$0xff] %v4168_v22 }
 0x2c5   : > { %762 = vrot.lane.b32.xlu0 %v3864_v28, %s3604_s27  ;;  %1244 = vrot.lane.b32.xlu1 %v4163_v20, %s3608_s30  ;;  %v4188_v28 = vsel %vm533_vm3, %v594_v45, %v595_v58  ;;  %v4207_v45 = vsel %vm533_vm3, %v595_v58, %v597_v49  ;;  %v301_v58 = vrot.slane %v3753_v5, 7 }
 0x2c7   : > { %v4179_v33 = vpop.permute.xlu0 %946  ;;  %v4181_v30 = vpop.permute.xlu1 %1046 }
 0x2c8   : > { %7085 = vst [vmem:[#allocation44_spill] sm:$0xff] %v4179_v33  ;;  %7086 = vst [vmem:[#allocation45_spill] sm:$0xff] %v4181_v30 }
 0x2c9   : > { %1142 = vrot.lane.b32.xlu0 %v3979_v52, %s3607_s29  ;;  %674 = vrot.lane.b32.xlu1 %v4175_v32, %s3603_s26 }
 0x2cb   : > { %v4190_v22 = vpop.permute.xlu0 %1326  ;;  %v4192_v59 = vpop.permute.xlu1 %668 }
 0x2cc   : > { %7087 = vst [vmem:[#allocation46_spill] sm:$0xff] %v4190_v22  ;;  %7088 = vst [vmem:[#allocation47_spill] sm:$0xff] %v4192_v59  ;;  %v302_v59 = vrot.slane %v3755_v6, 7 }
 0x2cd   : > { %858 = vrot.lane.b32.xlu0 %v3979_v52, %s3606_s28  ;;  %1054 = vrot.lane.b32.xlu1 %v4188_v28, %s3610_s4 }
 0x2cf   : > { %v4198_v38 = vpop.permute.xlu0 %948  ;;  %v4200_v30 = vpop.permute.xlu1 %1048 }
 0x2d0   : > { %7089 = vst [vmem:[#allocation48_spill] sm:$0xff] %v4198_v38  ;;  %7090 = vst [vmem:[#allocation49_spill] sm:$0xff] %v4200_v30 }
 0x2d1   : > { %1112 = vrot.lane.b32.xlu0 %v3732_v57, %s3607_s29  ;;  %676 = vrot.lane.b32.xlu1 %v4163_v20, %s3603_s26 }
 0x2d3   : > { %v4209_v33 = vpop.permute.xlu0 %1328  ;;  %v4211_v52 = vpop.permute.xlu1 %764 }
 0x2d4   : > { %7091 = vst [vmem:[#allocation50_spill] sm:$0xff] %v4209_v33  ;;  %7092 = vst [vmem:[#allocation51_spill] sm:$0xff] %v4211_v52  ;;  %v4232_v33 = vsel %vm286_vm0, %v301_v58, %v302_v59 }
 0x2d5   : > { %828 = vrot.lane.b32.xlu0 %v3732_v57, %s3606_s28  ;;  %1056 = vrot.lane.b32.xlu1 %v4207_v45, %s3610_s4  ;;  %7097 = vst [vmem:[#allocation56_spill] sm:$0xff] %v4232_v33  ;;  %v560_v57 = vrot.slane %v4232_v33, 2 }
 0x2d7   : > { %v4217_v55 = vpop.permute.xlu0 %758  ;;  %v4219_v30 = vpop.permute.xlu1 %1144 }
 0x2d8   : > { %7093 = vst [vmem:[#allocation52_spill] sm:$0xff] %v4217_v55  ;;  %7094 = vst [vmem:[#allocation53_spill] sm:$0xff] %v4219_v30  ;;  %v408_v55 = vsel %vm286_vm0, %v302_v59, 0.0  ;;  %v479_v30 = vrot.slane %v4232_v33, 1  ;;  %v4249_v59 = vsel %vm286_vm0, 0.0, %v301_v58 }
 0x2d9   : > { %638 = vrot.lane.b32.xlu0 %v3912_v43, %s3603_s26  ;;  %772 = vrot.lane.b32.xlu1 %v4207_v45, %s3604_s27  ;;  %v481_v5 = vrot.slane %v408_v55, 1  ;;  %v478_v22 = vrot.slane %v4249_v59, 1 }
 0x2db   : > { %v4227_v49 = vpop.permute.xlu0 %1138  ;;  %v4229_v52 = vpop.permute.xlu1 %860  ;;  %v4268_v58 = vsel %vm452_vm2, %v478_v22, %v479_v30 }
 0x2dc   : > { %7095 = vst [vmem:[#allocation54_spill] sm:$0xff] %v4227_v49  ;;  %7096 = vst [vmem:[#allocation55_spill] sm:$0xff] %v4229_v52 }
 0x2dd   : > { %640 = vrot.lane.b32.xlu0 %v3744_v0, %s3603_s26  ;;  %1120 = vrot.lane.b32.xlu1 %v4232_v33, %s3607_s29 }
 0x2df   : > { %v4239_v6 = vpop.permute.xlu0 %854  ;;  %v4241_v43 = vpop.permute.xlu1 %1206 }
 0x2e0   : > { %7098 = vst [vmem:[#allocation57_spill] sm:$0xff] %v4239_v6  ;;  %v4256_v6 = vsel %vm452_vm2, %v479_v30, %v481_v5 }
 0x2e1   : > { %1208 = vrot.lane.b32.xlu0 %v3744_v0, %s3608_s30  ;;  %836 = vrot.lane.b32.xlu1 %v4232_v33, %s3606_s28  ;;  %v562_v33 = vrot.slane %v408_v55, 2 }
 0x2e3   : > { %v4251_v49 = vpop.permute.xlu0 %1108  ;;  %v4253_v52 = vpop.permute.xlu1 %922  ;;  %v4299_v54 = vsel %vm533_vm3, %v560_v57, %v562_v33 }
 0x2e5   : > { %924 = vrot.lane.b32.xlu0 %v3744_v0, %s3609_s3  ;;  %1216 = vrot.lane.b32.xlu1 %v4256_v6, %s3608_s30  ;;  %v559_v0 = vrot.slane %v4249_v59, 2 }
 0x2e7   : > { %v4263_v38 = vpop.permute.xlu0 %824  ;;  %v4265_v60 = vpop.permute.xlu1 %1302  ;;  %v4281_v63 = vsel %vm533_vm3, %v559_v0, %v560_v57  ;;  %v3383_v0 = vunpack.i.l.bf16 %v3710_v36  ;;  %v304_v57 = vrot.slane %v3757_v7, 7 }
 0x2e9   : > { %1304 = vrot.lane.b32.xlu0 %v3749_v3, %s3611_s5  ;;  %646 = vrot.lane.b32.xlu1 %v4268_v58, %s3603_s26  ;;  %v1395_v55 = vsel %vm1394_vm4, %v3683_v2, %v3383_v0 }
 0x2eb   : > { %v4276_v5 = vpop.permute.xlu0 %634  ;;  %v4278_v25 = vpop.permute.xlu1 %1018 }
 0x2ed   : > { %1020 = vrot.lane.b32.xlu0 %v3749_v3, %s3610_s4  ;;  %1026 = vrot.lane.b32.xlu1 %v4281_v63, %s3610_s4 }
 0x2ef   : > { %v4287_v30 = vpop.permute.xlu0 %636  ;;  %v4289_v22 = vpop.permute.xlu1 %734 }
 0x2f0   : > { %7099 = vst [vmem:[#allocation58_spill] sm:$0xff] %v4287_v30  ;;  %7100 = vst [vmem:[#allocation59_spill] sm:$0xff] %v4289_v22 }
 0x2f1   : > { %736 = vrot.lane.b32.xlu0 %v3749_v3, %s3604_s27  ;;  %648 = vrot.lane.b32.xlu1 %v4256_v6, %s3603_s26  ;;  %v3388_v3 = vunpack.i.l.bf16 %v3712_v37 }
 0x2f3   : > { %v1203_v51 = vpop.permute.xlu0 %1202  ;;  %v4296_v41 = vpop.permute.xlu1 %1114  ;;  %v1428_v33 = vsel %vm1427_vm5, %v1395_v55, %v3388_v3 }
 0x2f4   : > { %v1461_v0 = vsel %vm1460_vm6, %v1428_v33, %v4028_v50 }
 0x2f5   : > { %1238 = vrot.lane.b32.xlu0 %v4013_v42, %s3608_s30  ;;  %1028 = vrot.lane.b32.xlu1 %v4299_v54, %s3610_s4  ;;  %v1494_v8 = vsel %vm1493_vm7, %v1461_v0, %v4077_v4  ;;  %v3384_v4 = vunpack.i.h.bf16 %v3710_v36  ;;  %v4350_v36 = vsel %vm286_vm0, 0.0, %v304_v57 }
 0x2f6   : > { %v1527_v7 = vsel %vm1526_vm8, %v1494_v8, %v4097_v29 }
 0x2f7   : > { %v4308_v22 = vpop.permute.xlu0 %918  ;;  %v4310_v30 = vpop.permute.xlu1 %830  ;;  %v1560_v50 = vsel %vm1559_vm9, %v1527_v7, %v4139_v24  ;;  %v3389_v24 = vunpack.i.h.bf16 %v3712_v37 }
 0x2f8   : > { %7101 = vst [vmem:[#allocation60_spill] sm:$0xff] %v4310_v30  ;;  %v1593_v3 = vsel %vm1592_vm10, %v1560_v50, %v1203_v51  ;;  %v1396_v51 = vsel %vm1394_vm4, %v3678_v1, %v3384_v4 }
 0x2f9   : > { %954 = vrot.lane.b32.xlu0 %v4013_v42, %s3609_s3  ;;  %744 = vrot.lane.b32.xlu1 %v4299_v54, %s3604_s27  ;;  %v4326_v42 = vsel %vm286_vm0, %v304_v57, %v305_v40  ;;  %v486_v40 = vrot.slane %v409_v34, 1  ;;  %v1429_v37 = vsel %vm1427_vm5, %v1396_v51, %v3389_v24  ;;  %v564_v24 = vrot.slane %v4350_v36, 2 }
 0x2fa   : > { %7103 = vst [vmem:[#allocation62_spill] sm:$0xff] %v4326_v42  ;;  %v484_v0 = vrot.slane %v4326_v42, 1  ;;  %v1462_v57 = vsel %vm1460_vm6, %v1429_v37, %v4033_v44 }
 0x2fb   : > { %v1205_v2 = vpop.permute.xlu0 %1204  ;;  %v4321_v30 = vpop.permute.xlu1 %1240 }
 0x2fc   : > { %7102 = vst [vmem:[#allocation61_spill] sm:$0xff] %v4321_v30  ;;  %v4359_v50 = vsel %vm452_vm2, %v484_v0, %v486_v40 }
 0x2fd   : > { %1334 = vrot.lane.b32.xlu0 %v4024_v46, %s3611_s5  ;;  %1124 = vrot.lane.b32.xlu1 %v4326_v42, %s3607_s29 }
 0x2ff   : > { %v1299_v55 = vpop.permute.xlu0 %1298  ;;  %v4339_v33 = vpop.permute.xlu1 %670 }
 0x300   : > { %7104 = vst [vmem:[#allocation63_spill] sm:$0xff] %v4339_v33  ;;  %v1626_v29 = vsel %vm1625_vm11, %v1593_v3, %v1299_v55  ;;  %v1495_v55 = vsel %vm1493_vm7, %v1462_v57, %v4086_v13 }
 0x301   : > { %956 = vrot.lane.b32.xlu0 %v4001_v35, %s3609_s3  ;;  %840 = vrot.lane.b32.xlu1 %v4326_v42, %s3606_s28  ;;  %v483_v35 = vrot.slane %v4350_v36, 1 }
 0x302   : > { %3268 = vmatprep.mubr.msk.f32.mxu0 %vm1663_vm12, %v1626_v29  ;;  %v1528_v29 = vsel %vm1526_vm8, %v1495_v55, %v4119_v17 }
 0x303   : > { %v4354_v8 = vpop.permute.xlu0 %920  ;;  %v4356_v7 = vpop.permute.xlu1 %1050  ;;  %v4374_v40 = vsel %vm452_vm2, %v483_v35, %v484_v0  ;;  %v1561_v44 = vsel %vm1559_vm9, %v1528_v29, %v4251_v49 }
 0x304   : > { %7105 = vst [vmem:[#allocation64_spill] sm:$0xff] %v4356_v7  ;;  %v1594_v13 = vsel %vm1592_vm10, %v1561_v44, %v1205_v2  ;;  %v567_v2 = vrot.slane %v409_v34, 2  ;;  %v1397_v34 = vsel %vm1394_vm4, %v3715_v47, %v4054_v19  ;;  %v307_v47 = vrot.slane %v3761_v9, 7 }
 0x305   : > { %1336 = vrot.lane.b32.xlu0 %v4042_v39, %s3611_s5  ;;  %1220 = vrot.lane.b32.xlu1 %v4359_v50, %s3608_s30  ;;  %v565_v39 = vrot.slane %v4326_v42, 2 }
 0x307   : > { %v1015_v4 = vpop.permute.xlu0 %1014  ;;  %v4369_v3 = vpop.permute.xlu1 %672  ;;  %v4391_v17 = vsel %vm533_vm3, %v564_v24, %v565_v39  ;;  %v4411_v55 = vsel %vm533_vm3, %v565_v39, %v567_v2  ;;  %v308_v24 = vrot.slane %v3763_v10, 7  ;;  %v1430_v39 = vsel %vm1427_vm5, %v1397_v34, %v4107_v15 }
 0x308   : > { %7106 = vst [vmem:[#allocation65_spill] sm:$0xff] %v4369_v3 }
 0x309   : > { %766 = vrot.lane.b32.xlu0 %v4024_v46, %s3604_s27  ;;  %650 = vrot.lane.b32.xlu1 %v4374_v40, %s3603_s26  ;;  %v410_v2 = vsel %vm286_vm0, %v308_v24, 0.0 }
 0x30b   : > { %v1301_v0 = vpop.permute.xlu0 %1300  ;;  %v4387_v51 = vpop.permute.xlu1 %1052 }
 0x30c   : > { %7107 = vst [vmem:[#allocation66_spill] sm:$0xff] %v4387_v51  ;;  %v1627_v37 = vsel %vm1625_vm11, %v1594_v13, %v1301_v0  ;;  %v1463_v13 = vsel %vm1460_vm6, %v1430_v39, %v4154_v16  ;;  %v4441_v16 = vsel %vm286_vm0, %v307_v47, %v308_v24  ;;  %v491_v39 = vrot.slane %v410_v2, 1 }
 0x30d   : > { %1146 = vrot.lane.b32.xlu0 %v4152_v48, %s3607_s29  ;;  %1030 = vrot.lane.b32.xlu1 %v4391_v17, %s3610_s4  ;;  %v1496_v19 = vsel %vm1493_vm7, %v1463_v13, %v4308_v22  ;;  %7111 = vst [vmem:[#allocation70_spill] sm:$0xff] %v4441_v16  ;;  %v489_v24 = vrot.slane %v4441_v16, 1 }
 0x30e   : > { %3269 = vmatmul.mubr.msk.f32.vlgmr.msra.gmra.mrb[0].mxu0 %vm1663_vm12, %v1627_v37  ;;  %v1529_v0 = vsel %vm1526_vm8, %v1496_v19, %v1015_v4 }
 0x30f   : > { %v4398_v46 = vpop.permute.xlu0 %730  ;;  %v4400_v49 = vpop.permute.xlu1 %768  ;;  %v4470_v13 = vsel %vm452_vm2, %v489_v24, %v491_v39 }
 0x310   : > { %7108 = vst [vmem:[#allocation67_spill] sm:$0xff] %v4400_v49  ;;  %v311_v49 = vrot.slane %v3767_v12, 7 }
 0x311   : > { %862 = vrot.lane.b32.xlu0 %v4152_v48, %s3606_s28  ;;  %652 = vrot.lane.b32.xlu1 %v4359_v50, %s3603_s26 }
 0x312   : > { %v411_v30 = vsel %vm286_vm0, %v311_v49, 0.0 }
 0x313   : > { %v4406_v35 = vpop.permute.xlu0 %1016  ;;  %v4408_v57 = vpop.permute.xlu1 %1148 }
 0x314   : > { %7109 = vst [vmem:[#allocation68_spill] sm:$0xff] %v4408_v57 }
 0x315   : > { %1116 = vrot.lane.b32.xlu0 %v4072_v23, %s3607_s29  ;;  %1032 = vrot.lane.b32.xlu1 %v4411_v55, %s3610_s4 }
 0x317   : > { %v4420_v29 = vpop.permute.xlu0 %732  ;;  %v4422_v44 = vpop.permute.xlu1 %864 }
 0x318   : > { %7110 = vst [vmem:[#allocation69_spill] sm:$0xff] %v4422_v44 }
 0x319   : > { %832 = vrot.lane.b32.xlu0 %v4072_v23, %s3606_s28  ;;  %748 = vrot.lane.b32.xlu1 %v4411_v55, %s3604_s27 }
 0x31b   : > { %v1111_v10 = vpop.permute.xlu0 %1110  ;;  %v4437_v37 = vpop.permute.xlu1 %1210 }
 0x31c   : > { %v1562_v15 = vsel %vm1559_vm9, %v1529_v0, %v1111_v10 }
 0x31d   : > { %v1595_v34 = vsel %vm1592_vm10, %v1562_v15, %v4241_v43  ;;  %642 = vrot.lane.b32.xlu0 %v4091_v62, %s3603_s26  ;;  %1128 = vrot.lane.b32.xlu1 %v4441_v16, %s3607_s29  ;;  %v4463_v62 = vsel %vm286_vm0, 0.0, %v307_v47  ;;  %v570_v15 = vrot.slane %v4441_v16, 2 }
 0x31e   : > { %v1628_v9 = vsel %vm1625_vm11, %v1595_v34, %v4265_v60  ;;  %7112 = vst [vmem:[#allocation71_spill] sm:$0xff] %v4463_v62  ;;  %v488_v19 = vrot.slane %v4463_v62, 1 }
 0x31f   : > { %v4452_v22 = vpop.permute.xlu0 %826  ;;  %v4454_v4 = vpop.permute.xlu1 %926  ;;  %3271 = vmatprep.mubr.msk.f32.mxu0 %vm1663_vm12, %v1628_v9 }
 0x320   : > { %v4482_v47 = vsel %vm452_vm2, %v488_v19, %v489_v24  ;;  %v572_v19 = vrot.slane %v410_v2, 2 }
 0x321   : > { %1212 = vrot.lane.b32.xlu0 %v4132_v26, %s3608_s30  ;;  %844 = vrot.lane.b32.xlu1 %v4441_v16, %s3606_s28 }
 0x323   : > { %v4465_v43 = vpop.permute.xlu0 %1234  ;;  %v4467_v60 = vpop.permute.xlu1 %1306 }
 0x324   : > { %7113 = vst [vmem:[#allocation72_spill] sm:$0xff] %v4465_v43 }
 0x325   : > { %928 = vrot.lane.b32.xlu0 %v4132_v26, %s3609_s3  ;;  %1224 = vrot.lane.b32.xlu1 %v4470_v13, %s3608_s30  ;;  %v569_v26 = vrot.slane %v4463_v62, 2 }
 0x327   : > { %v4477_v0 = vpop.permute.xlu0 %950  ;;  %v4479_v10 = vpop.permute.xlu1 %1022  ;;  %v4495_v39 = vsel %vm533_vm3, %v569_v26, %v570_v15 }
 0x328   : > { %7114 = vst [vmem:[#allocation73_spill] sm:$0xff] %v4477_v0 }
 0x329   : > { %1308 = vrot.lane.b32.xlu0 %v4144_v18, %s3611_s5  ;;  %654 = vrot.lane.b32.xlu1 %v4482_v47, %s3603_s26 }
 0x32b   : > { %v4490_v34 = vpop.permute.xlu0 %1330  ;;  %v4492_v9 = vpop.permute.xlu1 %644 }
 0x32c   : > { %7115 = vst [vmem:[#allocation74_spill] sm:$0xff] %v4490_v34 }
 0x32d   : > { %738 = vrot.lane.b32.xlu0 %v4112_v14, %s3604_s27  ;;  %1034 = vrot.lane.b32.xlu1 %v4495_v39, %s3610_s4  ;;  %v4514_v14 = vsel %vm533_vm3, %v570_v15, %v572_v19  ;;  %v310_v15 = vrot.slane %v3765_v11, 7  ;;  %v496_v11 = vrot.slane %v411_v30, 1 }
 0x32f   : > { %v4501_v24 = vpop.permute.xlu0 %952  ;;  %v4503_v18 = vpop.permute.xlu1 %1024  ;;  %v4535_v57 = vsel %vm286_vm0, %v310_v15, %v311_v49  ;;  %v4552_v49 = vsel %vm286_vm0, 0.0, %v310_v15 }
 0x330   : > { %7116 = vst [vmem:[#allocation75_spill] sm:$0xff] %v4501_v24  ;;  %7122 = vst [vmem:[#allocation81_spill] sm:$0xff] %v4535_v57  ;;  %v494_v7 = vrot.slane %v4535_v57, 1 }
 0x331   : > { %1118 = vrot.lane.b32.xlu0 %v4249_v59, %s3607_s29  ;;  %656 = vrot.lane.b32.xlu1 %v4470_v13, %s3603_s26  ;;  %7125 = vst [vmem:[#allocation84_spill] sm:$0xff] %v4552_v49 }
 0x332   : > { %v4557_v51 = vsel %vm452_vm2, %v494_v7, %v496_v11 }
 0x333   : > { %v4509_v48 = vpop.permute.xlu0 %1332  ;;  %v4511_v26 = vpop.permute.xlu1 %740 }
 0x334   : > { %7117 = vst [vmem:[#allocation76_spill] sm:$0xff] %v4509_v48 }
 0x335   : > { %834 = vrot.lane.b32.xlu0 %v4249_v59, %s3606_s28  ;;  %1036 = vrot.lane.b32.xlu1 %v4514_v14, %s3610_s4 }
 0x337   : > { %v4520_v2 = vpop.permute.xlu0 %762  ;;  %v4522_v44 = vpop.permute.xlu1 %1244 }
 0x338   : > { %7118 = vst [vmem:[#allocation77_spill] sm:$0xff] %v4520_v2  ;;  %7119 = vst [vmem:[#allocation78_spill] sm:$0xff] %v4522_v44  ;;  %v7143_v2 = vld [vmem:[#allocation19_spill] sm:$0xff] }
 0x339   : > { %1242 = vrot.lane.b32.xlu0 %v4175_v32, %s3608_s30  ;;  %752 = vrot.lane.b32.xlu1 %v4514_v14, %s3604_s27 }
 0x33b   : > { %v4530_v19 = vpop.permute.xlu0 %1142  ;;  %v4532_v3 = vpop.permute.xlu1 %674 }
 0x33c   : > { %7120 = vst [vmem:[#allocation79_spill] sm:$0xff] %v4530_v19  ;;  %7121 = vst [vmem:[#allocation80_spill] sm:$0xff] %v4532_v3  ;;  %v325_v19 = vrot.slane %v3858_v27, 7 }
 0x33d   : > { %958 = vrot.lane.b32.xlu0 %v4175_v32, %s3609_s3  ;;  %1132 = vrot.lane.b32.xlu1 %v4535_v57, %s3607_s29 }
 0x33e   : > { %v4601_v43 = vsel %vm286_vm0, 0.0, %v325_v19 }
 0x33f   : > { %v4542_v12 = vpop.permute.xlu0 %858  ;;  %v4544_v44 = vpop.permute.xlu1 %1054 }
 0x340   : > { %7123 = vst [vmem:[#allocation82_spill] sm:$0xff] %v4542_v12  ;;  %7124 = vst [vmem:[#allocation83_spill] sm:$0xff] %v4544_v44  ;;  %v493_v44 = vrot.slane %v4552_v49, 1  ;;  %v7142_v12 = vld [vmem:[#allocation58_spill] sm:$0xff] }
 0x341   : > { %1338 = vrot.lane.b32.xlu0 %v4188_v28, %s3611_s5  ;;  %848 = vrot.lane.b32.xlu1 %v4535_v57, %s3606_s28  ;;  %v1400_v0 = vsel %vm1394_vm4, %v7143_v2, %v7142_v12 }
 0x342   : > { %v4569_v15 = vsel %vm452_vm2, %v493_v44, %v494_v7  ;;  %v1399_v7 = vsel %vm1394_vm4, %v3837_v21, %v4276_v5 }
 0x343   : > { %v1113_v32 = vpop.permute.xlu0 %1112  ;;  %v4554_v3 = vpop.permute.xlu1 %676 }
 0x344   : > { %7126 = vst [vmem:[#allocation85_spill] sm:$0xff] %v4554_v3  ;;  %v575_v3 = vrot.slane %v4535_v57, 2  ;;  %v7145_v57 = vld [vmem:[#allocation18_spill] sm:$0xff] }
 0x345   : > { %960 = vrot.lane.b32.xlu0 %v4163_v20, %s3609_s3  ;;  %1228 = vrot.lane.b32.xlu1 %v4557_v51, %s3608_s30  ;;  %v574_v20 = vrot.slane %v4552_v49, 2  ;;  %v332_v42 = vrot.slane %v7145_v57, 7 }
 0x347   : > { %v4564_v48 = vpop.permute.xlu0 %828  ;;  %v4566_v33 = vpop.permute.xlu1 %1056 }
 0x348   : > { %7127 = vst [vmem:[#allocation86_spill] sm:$0xff] %v4566_v33  ;;  %v4583_v33 = vsel %vm533_vm3, %v574_v20, %v575_v3 }
 0x349   : > { %1340 = vrot.lane.b32.xlu0 %v4207_v45, %s3611_s5  ;;  %658 = vrot.lane.b32.xlu1 %v4569_v15, %s3603_s26  ;;  %v1432_v45 = vsel %vm1427_vm5, %v1399_v7, %v4398_v46 }
 0x34a   : > { %v1465_v44 = vsel %vm1460_vm6, %v1432_v45, %v4452_v22 }
 0x34b   : > { %v4577_v11 = vpop.permute.xlu0 %638  ;;  %v4579_v34 = vpop.permute.xlu1 %772  ;;  %v1498_v21 = vsel %vm1493_vm7, %v1465_v44, %v4253_v52 }
 0x34c   : > { %7128 = vst [vmem:[#allocation87_spill] sm:$0xff] %v4579_v34  ;;  %v577_v34 = vrot.slane %v411_v30, 2  ;;  %v1398_v30 = vsel %vm1394_vm4, %v3727_v56, %v4065_v53  ;;  %v1531_v22 = vsel %vm1526_vm8, %v1498_v21, %v4278_v25  ;;  %v326_v56 = vrot.slane %v3869_v31, 7 }
 0x34d   : > { %770 = vrot.lane.b32.xlu0 %v4188_v28, %s3604_s27  ;;  %1038 = vrot.lane.b32.xlu1 %v4583_v33, %s3610_s4  ;;  %v1431_v52 = vsel %vm1427_vm5, %v1398_v30, %v4127_v61  ;;  %v1564_v53 = vsel %vm1559_vm9, %v1531_v22, %v4296_v41 }
 0x34e   : > { %v4612_v46 = vsel %vm533_vm3, %v575_v3, %v577_v34  ;;  %v1464_v3 = vsel %vm1460_vm6, %v1431_v52, %v4263_v38  ;;  %v1597_v31 = vsel %vm1592_vm10, %v1564_v53, %v4437_v37  ;;  %v518_v52 = vrot.slane %v4601_v43, 1 }
 0x34f   : > { %v4596_v27 = vpop.permute.xlu0 %640  ;;  %v4598_v20 = vpop.permute.xlu1 %1120  ;;  %v1497_v25 = vsel %vm1493_vm7, %v1464_v3, %v4354_v8  ;;  %v1630_v37 = vsel %vm1625_vm11, %v1597_v31, %v4467_v60 }
 0x350   : > { %v1530_v45 = vsel %vm1526_vm8, %v1497_v25, %v4406_v35  ;;  %v4650_v35 = vsel %vm286_vm0, %v325_v19, %v326_v56  ;;  %v599_v25 = vrot.slane %v4601_v43, 2 }
 0x351   : > { %1150 = vrot.lane.b32.xlu0 %v4601_v43, %s3607_s29  ;;  %660 = vrot.lane.b32.xlu1 %v4557_v51, %s3603_s26  ;;  %v1563_v38 = vsel %vm1559_vm9, %v1530_v45, %v1113_v32  ;;  %7129 = vst [vmem:[#allocation88_spill] sm:$0xff] %v4650_v35  ;;  %v600_v53 = vrot.slane %v4650_v35, 2 }
 0x353   : > { %v1209_v28 = vpop.permute.xlu0 %1208  ;;  %v4609_v5 = vpop.permute.xlu1 %836  ;;  %v4698_v45 = vsel %vm533_vm3, %v599_v25, %v600_v53 }
 0x354   : > { %v1596_v61 = vsel %vm1592_vm10, %v1563_v38, %v1209_v28  ;;  %v519_v28 = vrot.slane %v4650_v35, 1 }
 0x355   : > { %1214 = vrot.lane.b32.xlu0 %v4268_v58, %s3608_s30  ;;  %1040 = vrot.lane.b32.xlu1 %v4612_v46, %s3610_s4 }
 0x357   : > { %v4627_v34 = vpop.permute.xlu0 %924  ;;  %v4629_v7 = vpop.permute.xlu1 %1216 }
 0x359   : > { %930 = vrot.lane.b32.xlu0 %v4268_v58, %s3609_s3  ;;  %756 = vrot.lane.b32.xlu1 %v4612_v46, %s3604_s27  ;;  %v416_v58 = vsel %vm286_vm0, %v326_v56, 0.0  ;;  %v4687_v56 = vsel %vm452_vm2, %v518_v52, %v519_v28 }
 0x35a   : > { %v521_v19 = vrot.slane %v416_v58, 1 }
 0x35b   : > { %v1305_v8 = vpop.permute.xlu0 %1304  ;;  %v4646_v44 = vpop.permute.xlu1 %646 }
 0x35c   : > { %v1629_v41 = vsel %vm1625_vm11, %v1596_v61, %v1305_v8  ;;  %v4675_v22 = vsel %vm452_vm2, %v519_v28, %v521_v19  ;;  %v602_v61 = vrot.slane %v416_v58, 2  ;;  %v7136_v28 = vld [vmem:[#allocation15_spill] sm:$0xff] }
 0x35d   : > { %1310 = vrot.lane.b32.xlu0 %v4281_v63, %s3611_s5  ;;  %1152 = vrot.lane.b32.xlu1 %v4650_v35, %s3607_s29  ;;  %v329_v52 = vrot.slane %v7136_v28, 7 }
 0x35e   : > { %3272 = vmatmul.mubr.msk.f32.gmra.mrb[2].mxu0 %vm1663_vm12, %v1629_v41  ;;  %v4717_v41 = vsel %vm533_vm3, %v600_v53, %v602_v61 }
 0x35f   : > { %3274 = vmatprep.mubr.msk.f32.mxu0 %vm1663_vm12, %v1630_v37  ;;  %v4661_v32 = vpop.permute.xlu0 %1020  ;;  %v4663_v21 = vpop.permute.xlu1 %1026  ;;  %v7135_v37 = vld [vmem:[#allocation13_spill] sm:$0xff] }
 0x360   : > { %v328_v19 = vrot.slane %v7135_v37, 7 }
 0x361   : > { %932 = vrot.lane.b32.xlu0 %v4256_v6, %s3609_s3  ;;  %868 = vrot.lane.b32.xlu1 %v4650_v35, %s3606_s28  ;;  %v417_v35 = vsel %vm286_vm0, %v329_v52, 0.0 }
 0x362   : > { %v4736_v61 = vsel %vm286_vm0, %v328_v19, %v329_v52 }
 0x363   : > { %v4670_v30 = vpop.permute.xlu0 %736  ;;  %v4672_v60 = vpop.permute.xlu1 %648  ;;  %7138 = vst [vmem:[#allocation15_spill] sm:$0xff] %v4736_v61 }
 0x365   : > { %1312 = vrot.lane.b32.xlu0 %v4299_v54, %s3611_s5  ;;  %1248 = vrot.lane.b32.xlu1 %v4675_v22, %s3608_s30 }
 0x367   : > { %v4682_v3 = vpop.permute.xlu0 %1238  ;;  %v4684_v6 = vpop.permute.xlu1 %1028 }
 0x368   : > { %7130 = vst [vmem:[#allocation89_spill] sm:$0xff] %v4682_v3 }
 0x369   : > { %742 = vrot.lane.b32.xlu0 %v4281_v63, %s3604_s27  ;;  %678 = vrot.lane.b32.xlu1 %v4687_v56, %s3603_s26 }
 0x36b   : > { %v4695_v54 = vpop.permute.xlu0 %954  ;;  %v4704_v38 = vpop.permute.xlu1 %744 }
 0x36c   : > { %7131 = vst [vmem:[#allocation90_spill] sm:$0xff] %v4695_v54 }
 0x36d   : > { %1122 = vrot.lane.b32.xlu0 %v4350_v36, %s3607_s29  ;;  %1058 = vrot.lane.b32.xlu1 %v4698_v45, %s3610_s4 }
 0x36f   : > { %v4706_v31 = vpop.permute.xlu0 %1334  ;;  %v4714_v8 = vpop.permute.xlu1 %1124 }
 0x370   : > { %7132 = vst [vmem:[#allocation91_spill] sm:$0xff] %v4706_v31 }
 0x371   : > { %838 = vrot.lane.b32.xlu0 %v4350_v36, %s3606_s28  ;;  %680 = vrot.lane.b32.xlu1 %v4675_v22, %s3603_s26 }
 0x373   : > { %v4712_v63 = vpop.permute.xlu0 %956  ;;  %v4731_v25 = vpop.permute.xlu1 %840 }
 0x374   : > { %7133 = vst [vmem:[#allocation92_spill] sm:$0xff] %v4712_v63 }
 0x375   : > { %1218 = vrot.lane.b32.xlu0 %v4374_v40, %s3608_s30  ;;  %1060 = vrot.lane.b32.xlu1 %v4717_v41, %s3610_s4 }
 0x377   : > { %v4723_v58 = vpop.permute.xlu0 %1336  ;;  %v4745_v28 = vpop.permute.xlu1 %1220 }
 0x378   : > { %7134 = vst [vmem:[#allocation93_spill] sm:$0xff] %v4723_v58  ;;  %v524_v58 = vrot.slane %v4736_v61, 1 }
 0x379   : > { %934 = vrot.lane.b32.xlu0 %v4374_v40, %s3609_s3  ;;  %776 = vrot.lane.b32.xlu1 %v4717_v41, %s3604_s27  ;;  %v526_v40 = vrot.slane %v417_v35, 1 }
 0x37b   : > { %v4733_v53 = vpop.permute.xlu0 %766  ;;  %v4758_v31 = vsel %vm452_vm2, %v524_v58, %v526_v40 }
 0x37c   : > { %7137 = vst [vmem:[#allocation13_spill] sm:$0xff] %v4733_v53  ;;  %v4749_v53 = vsel %vm286_vm0, 0.0, %v328_v19  ;;  %v4765_v19 = vpop.permute.xlu1 %650 }
 0x37d   : > { %1314 = vrot.lane.b32.xlu0 %v4391_v17, %s3611_s5  ;;  %1156 = vrot.lane.b32.xlu1 %v4736_v61, %s3607_s29  ;;  %v604_v54 = vrot.slane %v4749_v53, 2 }
 0x37f   : > { %v4743_v37 = vpop.permute.xlu0 %1146 }
 0x380   : > { %7139 = vst [vmem:[#allocation94_spill] sm:$0xff] %v4743_v37  ;;  %v523_v37 = vrot.slane %v4749_v53, 1  ;;  %v4778_v40 = vpop.permute.xlu1 %1030 }
 0x381   : > { %936 = vrot.lane.b32.xlu0 %v4359_v50, %s3609_s3  ;;  %872 = vrot.lane.b32.xlu1 %v4736_v61, %s3606_s28 }
 0x382   : > { %v4768_v50 = vsel %vm452_vm2, %v523_v37, %v524_v58  ;;  %v607_v37 = vrot.slane %v417_v35, 2  ;;  %v1433_v35 = vsel %vm1427_vm5, %v1400_v0, %v4420_v29 }
 0x383   : > { %v4755_v52 = vpop.permute.xlu0 %862  ;;  %v1466_v24 = vsel %vm1460_vm6, %v1433_v35, %v4564_v48 }
 0x384   : > { %7140 = vst [vmem:[#allocation95_spill] sm:$0xff] %v4755_v52  ;;  %v605_v52 = vrot.slane %v4736_v61, 2  ;;  %v1499_v2 = vsel %vm1493_vm7, %v1466_v24, %v4627_v34  ;;  %v418_v34 = vsel %vm286_vm0, %v332_v42, 0.0 }
 0x385   : > { %1316 = vrot.lane.b32.xlu0 %v4411_v55, %s3611_s5  ;;  %1252 = vrot.lane.b32.xlu1 %v4758_v31, %s3608_s30 }
 0x386   : > { %v4781_v63 = vsel %vm533_vm3, %v604_v54, %v605_v52  ;;  %v4796_v54 = vsel %vm533_vm3, %v605_v52, %v607_v37  ;;  %v7144_v52 = vld [vmem:[#allocation17_spill] sm:$0xff] }
 0x387   : > { %v1117_v3 = vpop.permute.xlu0 %1116  ;;  %v331_v37 = vrot.slane %v7144_v52, 7 }
 0x389   : > { %746 = vrot.lane.b32.xlu0 %v4391_v17, %s3604_s27  ;;  %682 = vrot.lane.b32.xlu1 %v4768_v50, %s3603_s26  ;;  %v4793_v17 = vpop.permute.xlu1 %652  ;;  %v4827_v24 = vsel %vm286_vm0, %v331_v37, %v332_v42 }
 0x38a   : > { %7141 = vst [vmem:[#allocation96_spill] sm:$0xff] %v4793_v17  ;;  %v1532_v17 = vsel %vm1526_vm8, %v1499_v2, %v4661_v32  ;;  %7146 = vst [vmem:[#allocation58_spill] sm:$0xff] %v4827_v24 }
 0x38b   : > { %v4776_v55 = vpop.permute.xlu0 %832  ;;  %v1565_v48 = vsel %vm1559_vm9, %v1532_v17, %v1117_v3  ;;  %v531_v3 = vrot.slane %v418_v34, 1  ;;  %v4841_v17 = vsel %vm286_vm0, 0.0, %v331_v37 }
 0x38c   : > { %v528_v2 = vrot.slane %v4841_v17, 1 }
 0x38d   : > { %1126 = vrot.lane.b32.xlu0 %v4463_v62, %s3607_s29  ;;  %1062 = vrot.lane.b32.xlu1 %v4781_v63, %s3610_s4  ;;  %v4815_v12 = vpop.permute.xlu1 %1032 }
 0x38f   : > { %v4787_v58 = vpop.permute.xlu0 %642 }
 0x391   : > { %842 = vrot.lane.b32.xlu0 %v4463_v62, %s3606_s28  ;;  %684 = vrot.lane.b32.xlu1 %v4758_v31, %s3603_s26 }
 0x393   : > { %v1213_v61 = vpop.permute.xlu0 %1212 }
 0x394   : > { %v1598_v29 = vsel %vm1592_vm10, %v1565_v48, %v1213_v61  ;;  %v529_v61 = vrot.slane %v4827_v24, 1  ;;  %v609_v48 = vrot.slane %v4841_v17, 2 }
 0x395   : > { %1222 = vrot.lane.b32.xlu0 %v4482_v47, %s3608_s30  ;;  %1064 = vrot.lane.b32.xlu1 %v4796_v54, %s3610_s4 }
 0x396   : > { %v4852_v52 = vsel %vm452_vm2, %v529_v61, %v531_v3 }
 0x397   : > { %v4809_v16 = vpop.permute.xlu0 %928 }
 0x399   : > { %938 = vrot.lane.b32.xlu0 %v4482_v47, %s3609_s3  ;;  %780 = vrot.lane.b32.xlu1 %v4796_v54, %s3604_s27  ;;  %v4834_v47 = vpop.permute.xlu1 %748 }
 0x39a   : > { %7147 = vst [vmem:[#allocation19_spill] sm:$0xff] %v4834_v47 }
 0x39b   : > { %v1309_v0 = vpop.permute.xlu0 %1308 }
 0x39c   : > { %v1631_v57 = vsel %vm1625_vm11, %v1598_v29, %v1309_v0  ;;  %v610_v29 = vrot.slane %v4827_v24, 2 }
 0x39d   : > { %1318 = vrot.lane.b32.xlu0 %v4495_v39, %s3611_s5  ;;  %1160 = vrot.lane.b32.xlu1 %v4827_v24, %s3607_s29  ;;  %v4849_v35 = vpop.permute.xlu1 %1128 }
 0x39e   : > { %3275 = vmatmul.mubr.msk.f32.gmra.mrb[4].mxu0 %vm1663_vm12, %v1631_v57  ;;  %v4875_v57 = vsel %vm533_vm3, %v609_v48, %v610_v29 }
 0x39f   : > { %v4837_v32 = vpop.permute.xlu0 %738 }
 0x3a1   : > { %940 = vrot.lane.b32.xlu0 %v4470_v13, %s3609_s3  ;;  %876 = vrot.lane.b32.xlu1 %v4827_v24, %s3606_s28  ;;  %v4862_v13 = vsel %vm452_vm2, %v528_v2, %v529_v61  ;;  %v4870_v0 = vpop.permute.xlu1 %844  ;;  %v612_v61 = vrot.slane %v418_v34, 2 }
 0x3a2   : > { %7148 = vst [vmem:[#allocation17_spill] sm:$0xff] %v4870_v0  ;;  %v7160_v0 = vld [vmem:[#allocation16_spill] sm:$0xff] }
 0x3a3   : > { %v4847_v42 = vpop.permute.xlu0 %1118  ;;  %v4892_v48 = vsel %vm533_vm3, %v610_v29, %v612_v61  ;;  %v7156_v61 = vld [vmem:[#allocation20_spill] sm:$0xff]  ;;  %v1401_v47 = vsel %vm1394_vm4, %v7160_v0, %v4577_v11 }
 0x3a5   : > { %1320 = vrot.lane.b32.xlu0 %v4514_v14, %s3611_s5  ;;  %1256 = vrot.lane.b32.xlu1 %v4852_v52, %s3608_s30 }
 0x3a7   : > { %v4859_v37 = vpop.permute.xlu0 %834 }
 0x3a9   : > { %750 = vrot.lane.b32.xlu0 %v4495_v39, %s3604_s27  ;;  %686 = vrot.lane.b32.xlu1 %v4862_v13, %s3603_s26  ;;  %v4883_v39 = vpop.permute.xlu1 %1224 }
 0x3ab   : > { %v4872_v14 = vpop.permute.xlu0 %1242 }
 0x3ac   : > { %7149 = vst [vmem:[#allocation18_spill] sm:$0xff] %v4872_v14  ;;  %v7157_v14 = vrot.slane %v7156_v61, 7 }
 0x3ad   : > { %1130 = vrot.lane.b32.xlu0 %v4552_v49, %s3607_s29  ;;  %1066 = vrot.lane.b32.xlu1 %v4875_v57, %s3610_s4  ;;  %v4898_v34 = vpop.permute.xlu1 %654 }
 0x3ae   : > { %7152 = vst [vmem:[#allocation99_spill] sm:$0xff] %v4898_v34 }
 0x3af   : > { %v4881_v3 = vpop.permute.xlu0 %958 }
 0x3b0   : > { %7150 = vst [vmem:[#allocation97_spill] sm:$0xff] %v4881_v3  ;;  %v419_v3 = vsel %vm286_vm0, %v7157_v14, 0.0 }
 0x3b1   : > { %846 = vrot.lane.b32.xlu0 %v4552_v49, %s3606_s28  ;;  %688 = vrot.lane.b32.xlu1 %v4852_v52, %s3603_s26  ;;  %v4908_v29 = vpop.permute.xlu1 %1034  ;;  %v7158_v49 = vld [vmem:[#allocation22_spill] sm:$0xff]  ;;  %v624_v34 = vrot.slane %v419_v3, 2  ;;  %s3178_s26 = sshll.u32 %s134_s25, 6 }
 0x3b2   : > { %7155 = vst [vmem:[#allocation102_spill] sm:$0xff] %v4908_v29 }
 0x3b3   : > { %v4889_v2 = vpop.permute.xlu0 %1338 }
 0x3b4   : > { %7151 = vst [vmem:[#allocation98_spill] sm:$0xff] %v4889_v2 }
 0x3b5   : > { %1226 = vrot.lane.b32.xlu0 %v4569_v15, %s3608_s30  ;;  %1068 = vrot.lane.b32.xlu1 %v4892_v48, %s3610_s4  ;;  %v4926_v14 = vpop.permute.xlu1 %656 }
 0x3b6   : > { %7161 = vst [vmem:[#allocation22_spill] sm:$0xff] %v4926_v14 }
 0x3b7   : > { %v4900_v24 = vpop.permute.xlu0 %960 }
 0x3b8   : > { %7153 = vst [vmem:[#allocation100_spill] sm:$0xff] %v4900_v24 }
 0x3b9   : > { %942 = vrot.lane.b32.xlu0 %v4569_v15, %s3609_s3  ;;  %784 = vrot.lane.b32.xlu1 %v4892_v48, %s3604_s27  ;;  %v619_v15 = vrot.slane %v419_v3, 1  ;;  %v4940_v14 = vpop.permute.xlu1 %1036  ;;  %v7166_v3 = vrot.slane %v7158_v49, 2 }
 0x3bb   : > { %v4906_v2 = vpop.permute.xlu0 %1340 }
 0x3bc   : > { %7154 = vst [vmem:[#allocation101_spill] sm:$0xff] %v4906_v2  ;;  %v7162_v2 = vld [vmem:[#allocation59_spill] sm:$0xff] }
 0x3bd   : > { %1322 = vrot.lane.b32.xlu0 %v4583_v33, %s3611_s5  ;;  %1164 = vrot.lane.b32.xlu1 %v7158_v49, %s3607_s29  ;;  %v1434_v29 = vsel %vm1427_vm5, %v1401_v47, %v7162_v2  ;;  %v7165_v47 = vld [vmem:[#allocation8_spill] sm:$0xff] }
 0x3bf   : > { %v4917_v24 = vpop.permute.xlu0 %770 }
 0x3c0   : > { %7159 = vst [vmem:[#allocation20_spill] sm:$0xff] %v4917_v24  ;;  %v7163_v24 = vrot.slane %v7158_v49, 1 }
 0x3c1   : > { %944 = vrot.lane.b32.xlu0 %v4557_v51, %s3609_s3  ;;  %880 = vrot.lane.b32.xlu1 %v7158_v49, %s3606_s28  ;;  %v7164_v51 = vld [vmem:[#allocation60_spill] sm:$0xff] }
 0x3c2   : > { %v620_v62 = vsel %vm452_vm2, %v7163_v24, %v619_v15  ;;  %v1467_v11 = vsel %vm1460_vm6, %v1434_v29, %v7164_v51  ;;  %v4955_v15 = vsel %vm533_vm3, %v7166_v3, %v624_v34 }
 0x3c3   : > { %v4928_v61 = vpop.permute.xlu0 %1150  ;;  %v1500_v24 = vsel %vm1493_vm7, %v1467_v11, %v4454_v4 }
 0x3c5   : > { %1324 = vrot.lane.b32.xlu0 %v4612_v46, %s3611_s5  ;;  %1260 = vrot.lane.b32.xlu1 %v620_v62, %s3608_s30  ;;  %v1402_v46 = vsel %vm1394_vm4, %v7165_v47, %v4596_v27  ;;  %v4969_v27 = vpop.permute.xlu1 %752 }
 0x3c6   : > { %v1435_v29 = vsel %vm1427_vm5, %v1402_v46, %v4670_v30  ;;  %v7167_v30 = vld [vmem:[#allocation5_spill] sm:$0xff] }
 0x3c7   : > { %v1215_v0 = vpop.permute.xlu0 %1214 }
 0x3c9   : > { %754 = vrot.lane.b32.xlu0 %v4583_v33, %s3604_s27  ;;  %976 = vrot.lane.b32.xlu1 %v620_v62, %s3609_s3  ;;  %v1468_v33 = vsel %vm1460_vm6, %v1435_v29, %v4776_v55  ;;  %v1533_v62 = vsel %vm1526_vm8, %v1500_v24, %v4479_v10  ;;  %v3390_v55 = vpack.i.bf16 %v3678_v1, %v7167_v30  ;;  %v7169_v30 = vld [vmem:[#allocation21_spill] sm:$0xff] }
 0x3ca   : > { %v1501_v4 = vsel %vm1493_vm7, %v1468_v33, %v4809_v16  ;;  %v1566_v49 = vsel %vm1559_vm9, %v1533_v62, %v4847_v42  ;;  %v4981_v42 = vpop.permute.xlu1 %1132 }
 0x3cb   : > { %v931_v2 = vpop.permute.xlu0 %930  ;;  %v1599_v34 = vsel %vm1592_vm10, %v1566_v49, %v1215_v0  ;;  %v1534_v11 = vsel %vm1526_vm8, %v1501_v4, %v4503_v18  ;;  %v7168_v0 = vld [vmem:[#allocation7_spill] sm:$0xff] }
 0x3cc   : > { %v1567_v1 = vsel %vm1559_vm9, %v1534_v11, %v4598_v20 }
 0x3cd   : > { %866 = vrot.lane.b32.xlu0 %v4601_v43, %s3606_s28  ;;  %1356 = vrot.lane.b32.xlu1 %v4955_v15, %s3611_s5  ;;  %v1600_v24 = vsel %vm1592_vm10, %v1567_v1, %v4629_v7 }
 0x3ce   : > { %v4995_v46 = vpop.permute.xlu1 %848 }
 0x3cf   : > { %v1311_v10 = vpop.permute.xlu0 %1310 }
 0x3d0   : > { %v1632_v51 = vsel %vm1625_vm11, %v1599_v34, %v1311_v10 }
 0x3d1   : > { %1246 = vrot.lane.b32.xlu0 %v4687_v56, %s3608_s30  ;;  %3277 = vmatprep.mubr.msk.f32.mxu0 %vm1663_vm12, %v1632_v51 }
 0x3d2   : > { %3391 = vrot.lane.b32.xlu1 %v3390_v55, %s3607_s29  ;;  %v4999_v29 = vpop.permute.xlu1 %1228 }
 0x3d3   : > { %v933_v16 = vpop.permute.xlu0 %932 }
 0x3d5   : > { %962 = vrot.lane.b32.xlu0 %v4687_v56, %s3609_s3 }
 0x3d6   : > { %3401 = vrot.lane.b32.xlu1 %v7168_v0, %s3611_s5 }
 0x3d7   : > { %v1313_v18 = vpop.permute.xlu0 %1312 }
 0x3d8   : > { %v1633_v47 = vsel %vm1625_vm11, %v1600_v24, %v1313_v18 }
 0x3d9   : > { %1342 = vrot.lane.b32.xlu0 %v4698_v45, %s3611_s5  ;;  %3278 = vmatmul.mubr.msk.f32.gmra.mrb[6].mxu0 %vm1663_vm12, %v1633_v47 }
 0x3db   : > { %v743_v20 = vpop.permute.xlu0 %742 }
 0x3dd   : > { %964 = vrot.lane.b32.xlu0 %v4675_v22, %s3609_s3  ;;  %v5015_v22 = vpop.permute.xlu1 %658 }
 0x3df   : > { %v1123_v56 = vpop.permute.xlu0 %1122 }
 0x3e1   : > { %v5001_v3 = vpop.f32.mrb[0].mxu0  ;;  %1344 = vrot.lane.b32.xlu0 %v4717_v41, %s3611_s5  ;;  %v1403_v41 = vsel %vm1394_vm4, %v7169_v30, %v4787_v58  ;;  %v5032_v1 = vpop.permute.xlu1 %1038  ;;  %v1405_v30 = vsel %vm1394_vm4, %v4249_v59, %v4646_v44 }
 0x3e2   : > { %v1989_v7 = vsel %vm1625_vm11, %v5001_v3, 0.0  ;;  %v5007_v33 = vpop.f32.mrb[1].mxu0  ;;  %v1436_v34 = vsel %vm1427_vm5, %v1403_v41, %v4837_v32 }
 0x3e3   : > { %v1988_v62 = vsel %vm1625_vm11, %v5007_v33, 0.0  ;;  %v839_v4 = vpop.permute.xlu0 %838  ;;  %v1469_v10 = vsel %vm1460_vm6, %v1436_v34, %v4859_v37 }
 0x3e4   : > { %v5011_v49 = vadd.f32 %v1989_v7, %v1988_v62  ;;  %v1502_v51 = vsel %vm1493_vm7, %v1469_v10, %v931_v2  ;;  %v7170_v10 = vld [vmem:[#allocation56_spill] sm:$0xff] }
 0x3e5   : > { %774 = vrot.lane.b32.xlu0 %v4698_v45, %s3604_s27  ;;  %v1404_v45 = vsel %vm1394_vm4, %v4072_v23, %v4492_v9  ;;  %v1535_v37 = vsel %vm1526_vm8, %v1502_v51, %v4663_v21 }
 0x3e6   : > { %v1437_v58 = vsel %vm1427_vm5, %v1404_v45, %v4511_v26  ;;  %v1568_v0 = vsel %vm1559_vm9, %v1535_v37, %v1123_v56 }
 0x3e7   : > { %v1219_v55 = vpop.permute.xlu0 %1218  ;;  %v1470_v32 = vsel %vm1460_vm6, %v1437_v58, %v4609_v5  ;;  %v5049_v5 = vpop.permute.xlu1 %660 }
 0x3e8   : > { %v1503_v2 = vsel %vm1493_vm7, %v1470_v32, %v933_v16  ;;  %v1601_v23 = vsel %vm1592_vm10, %v1568_v0, %v1219_v55  ;;  %v1438_v55 = vsel %vm1427_vm5, %v1405_v30, %v743_v20  ;;  %v7175_v30 = vld [vmem:[#allocation62_spill] sm:$0xff] }
 0x3e9   : > { %1154 = vrot.lane.b32.xlu0 %v4749_v53, %s3607_s29  ;;  %v1536_v18 = vsel %vm1526_vm8, %v1503_v2, %v4684_v6 }
 0x3ea   : > { %v1569_v16 = vsel %vm1559_vm9, %v1536_v18, %v4714_v8 }
 0x3eb   : > { %v935_v11 = vpop.permute.xlu0 %934  ;;  %v1602_v47 = vsel %vm1592_vm10, %v1569_v16, %v4745_v28  ;;  %v5057_v56 = vpop.permute.xlu1 %1040 }
 0x3ed   : > { %870 = vrot.lane.b32.xlu0 %v4749_v53, %s3606_s28 }
 0x3ef   : > { %v1315_v9 = vpop.permute.xlu0 %1314  ;;  %v5065_v8 = vpop.permute.xlu1 %756 }
 0x3f0   : > { %v1634_v26 = vsel %vm1625_vm11, %v1601_v23, %v1315_v9 }
 0x3f1   : > { %1250 = vrot.lane.b32.xlu0 %v4768_v50, %s3608_s30  ;;  %3280 = vmatprep.mubr.msk.f32.mxu0 %vm1663_vm12, %v1634_v26  ;;  %v1407_v26 = vsel %vm1394_vm4, %v4350_v36, %v4765_v19 }
 0x3f3   : > { %v937_v21 = vpop.permute.xlu0 %936  ;;  %v5069_v62 = vpop.permute.xlu1 %1152 }
 0x3f5   : > { %966 = vrot.lane.b32.xlu0 %v4768_v50, %s3609_s3 }
 0x3f7   : > { %v1317_v24 = vpop.permute.xlu0 %1316  ;;  %v5080_v34 = vpop.permute.xlu1 %868 }
 0x3f8   : > { %v1635_v6 = vsel %vm1625_vm11, %v1602_v47, %v1317_v24  ;;  %v7171_v24 = vld [vmem:[#allocation23_spill] sm:$0xff] }
 0x3f9   : > { %1346 = vrot.lane.b32.xlu0 %v4781_v63, %s3611_s5  ;;  %3281 = vmatmul.mubr.msk.f32.gmra.mrb[8].mxu0 %vm1663_vm12, %v1635_v6  ;;  %v7173_v47 = vld [vmem:[#allocation71_spill] sm:$0xff] }
 0x3fb   : > { %v747_v7 = vpop.permute.xlu0 %746  ;;  %v5097_v58 = vpop.permute.xlu1 %1248 }
 0x3fc   : > { %v1440_v16 = vsel %vm1427_vm5, %v1407_v26, %v747_v7  ;;  %v7183_v26 = vld [vmem:[#allocation27_spill] sm:$0xff] }
 0x3fd   : > { %968 = vrot.lane.b32.xlu0 %v4758_v31, %s3609_s3  ;;  %v1471_v31 = vsel %vm1460_vm6, %v1438_v55, %v839_v4  ;;  %v7176_v55 = vld [vmem:[#allocation19_spill] sm:$0xff] }
 0x3ff   : > { %v1127_v50 = vpop.permute.xlu0 %1126  ;;  %v5109_v37 = vpop.permute.xlu1 %678 }
 0x401   : > { %1348 = vrot.lane.b32.xlu0 %v4796_v54, %s3611_s5  ;;  %v1504_v54 = vsel %vm1493_vm7, %v1471_v31, %v935_v11  ;;  %v7177_v31 = vld [vmem:[#allocation17_spill] sm:$0xff] }
 0x402   : > { %v1537_v20 = vsel %vm1526_vm8, %v1504_v54, %v4778_v40 }
 0x403   : > { %v843_v28 = vpop.permute.xlu0 %842  ;;  %v1570_v45 = vsel %vm1559_vm9, %v1537_v20, %v1127_v50  ;;  %v5117_v9 = vpop.permute.xlu1 %1058  ;;  %v7174_v50 = vld [vmem:[#allocation96_spill] sm:$0xff] }
 0x404   : > { %v1408_v36 = vsel %vm1394_vm4, %v7175_v30, %v7174_v50  ;;  %v7186_v30 = vld [vmem:[#allocation42_spill] sm:$0xff] }
 0x405   : > { %778 = vrot.lane.b32.xlu0 %v4781_v63, %s3604_s27  ;;  %v1406_v63 = vsel %vm1394_vm4, %v7170_v10, %v4672_v60  ;;  %v1441_v7 = vsel %vm1427_vm5, %v1408_v36, %v7176_v55  ;;  %v7178_v10 = vld [vmem:[#allocation102_spill] sm:$0xff] }
 0x406   : > { %v1439_v59 = vsel %vm1427_vm5, %v1406_v63, %v4704_v38  ;;  %v1474_v54 = vsel %vm1460_vm6, %v1441_v7, %v7177_v31  ;;  %v7188_v7 = vld [vmem:[#allocation35_spill] sm:$0xff] }
 0x407   : > { %v1223_v41 = vpop.permute.xlu0 %1222  ;;  %v1472_v44 = vsel %vm1460_vm6, %v1439_v59, %v4731_v25 }
 0x408   : > { %v1505_v4 = vsel %vm1493_vm7, %v1472_v44, %v937_v21  ;;  %v1603_v11 = vsel %vm1592_vm10, %v1570_v45, %v1223_v41 }
 0x409   : > { %1158 = vrot.lane.b32.xlu0 %v4841_v17, %s3607_s29  ;;  %v1538_v25 = vsel %vm1526_vm8, %v1505_v4, %v4815_v12 }
 0x40a   : > { %v1571_v32 = vsel %vm1559_vm9, %v1538_v25, %v4849_v35 }
 0x40b   : > { %v939_v51 = vpop.permute.xlu0 %938  ;;  %v1604_v0 = vsel %vm1592_vm10, %v1571_v32, %v4883_v39  ;;  %v7180_v32 = vld [vmem:[#allocation22_spill] sm:$0xff] }
 0x40d   : > { %874 = vrot.lane.b32.xlu0 %v4841_v17, %s3606_s28 }
 0x40f   : > { %v1319_v60 = vpop.permute.xlu0 %1318 }
 0x410   : > { %v1636_v38 = vsel %vm1625_vm11, %v1603_v11, %v1319_v60  ;;  %v7179_v11 = vld [vmem:[#allocation81_spill] sm:$0xff] }
 0x411   : > { %1254 = vrot.lane.b32.xlu0 %v4862_v13, %s3608_s30  ;;  %3283 = vmatprep.mubr.msk.f32.mxu0 %vm1663_vm12, %v1636_v38  ;;  %v1412_v60 = vsel %vm1394_vm4, %v7179_v11, %v5049_v5 }
 0x413   : > { %v941_v40 = vpop.permute.xlu0 %940 }
 0x414   : > { %v1507_v44 = vsel %vm1493_vm7, %v1474_v54, %v941_v40  ;;  %v1445_v40 = vsel %vm1427_vm5, %v1412_v60, %v5065_v8  ;;  %v7190_v54 = vld [vmem:[#allocation26_spill] sm:$0xff]  ;;  %v7196_v60 = vld [vmem:[#allocation36_spill] sm:$0xff] }
 0x415   : > { %970 = vrot.lane.b32.xlu0 %v4862_v13, %s3609_s3  ;;  %v5123_v13 = vpop.permute.xlu1 %680 }
 0x417   : > { %v1321_v2 = vpop.permute.xlu0 %1320 }
 0x418   : > { %v1637_v12 = vsel %vm1625_vm11, %v1604_v0, %v1321_v2  ;;  %v7181_v2 = vld [vmem:[#allocation70_spill] sm:$0xff] }
 0x419   : > { %1350 = vrot.lane.b32.xlu0 %v4875_v57, %s3611_s5  ;;  %3284 = vmatmul.mubr.msk.f32.gmra.mrb[10].mxu0 %vm1663_vm12, %v1637_v12  ;;  %v5130_v21 = vpop.permute.xlu1 %1060  ;;  %v1410_v0 = vsel %vm1394_vm4, %v7181_v2, %v7180_v32  ;;  %v1540_v12 = vsel %vm1526_vm8, %v1507_v44, %v4940_v14  ;;  %v7197_v32 = vld [vmem:[#allocation39_spill] sm:$0xff] }
 0x41b   : > { %v751_v23 = vpop.permute.xlu0 %750 }
 0x41d   : > { %972 = vrot.lane.b32.xlu0 %v4852_v52, %s3609_s3  ;;  %v1473_v52 = vsel %vm1460_vm6, %v1440_v16, %v843_v28  ;;  %v5154_v59 = vpop.permute.xlu1 %776  ;;  %v7184_v16 = vld [vmem:[#allocation30_spill] sm:$0xff] }
 0x41f   : > { %v1131_v35 = vpop.permute.xlu0 %1130 }
 0x421   : > { %1352 = vrot.lane.b32.xlu0 %v4892_v48, %s3611_s5  ;;  %v7172_v48 = vld [vmem:[#allocation99_spill] sm:$0xff] }
 0x422   : > { %v1409_v6 = vsel %vm1394_vm4, %v7173_v47, %v7172_v48  ;;  %v1573_v47 = vsel %vm1559_vm9, %v1540_v12, %v4981_v42  ;;  %v7199_v12 = vld [vmem:[#allocation84_spill] sm:$0xff] }
 0x423   : > { %v847_v39 = vpop.permute.xlu0 %846  ;;  %v1442_v19 = vsel %vm1427_vm5, %v1409_v6, %v751_v23  ;;  %v1606_v55 = vsel %vm1592_vm10, %v1573_v47, %v4999_v29 }
 0x424   : > { %v1475_v28 = vsel %vm1460_vm6, %v1442_v19, %v847_v39  ;;  %v7187_v19 = vld [vmem:[#allocation48_spill] sm:$0xff] }
 0x425   : > { %782 = vrot.lane.b32.xlu0 %v4875_v57, %s3604_s27  ;;  %v1506_v57 = vsel %vm1493_vm7, %v1473_v52, %v939_v51  ;;  %v1478_v52 = vsel %vm1460_vm6, %v1445_v40, %v7184_v16  ;;  %s136_s27 = scalar_lea.vmem [#allocation2], %s3178_s26 }
 0x426   : > { %v1539_v63 = vsel %vm1526_vm8, %v1506_v57, %v7178_v10  ;;  %v7185_v57 = vld [vmem:[#allocation29_spill] sm:$0xff]  ;;  %v1511_v42 = vsel %vm1493_vm7, %v1478_v52, %v7187_v19  ;;  %v7191_v10 = vld [vmem:[#allocation46_spill] sm:$0xff] }
 0x427   : > { %v1227_v18 = vpop.permute.xlu0 %1226  ;;  %v1572_v20 = vsel %vm1559_vm9, %v1539_v63, %v1131_v35  ;;  %v7182_v35 = vld [vmem:[#allocation25_spill] sm:$0xff]  ;;  %v7203_v52 = vld [vmem:[#allocation50_spill] sm:$0xff] }
 0x428   : > { %v1605_v4 = vsel %vm1592_vm10, %v1572_v20, %v1227_v18  ;;  %v7193_v20 = vld [vmem:[#allocation33_spill] sm:$0xff] }
 0x429   : > { %1162 = vrot.lane.b32.xlu0 %v7171_v24, %s3607_s29  ;;  %s3220_s29 = sshll.u32 %s3650_s13, 10  ;;  %s3612_s13 = smov [#allocation2]  }
 0x42a   : > { %s3542_s8 = sshll.u32 %s3612_s13, 4  ;;  %s3543_s8 = int_to_ptr.vmem [resolvable:$false] %s3542_s8 }
 0x42b   : > { %v943_v41 = vpop.permute.xlu0 %942  ;;  %s3544_s14 = scalar_lea.vmem %s3543_s8, 2048 }
 0x42c   : > { %v1508_v51 = vsel %vm1493_vm7, %v1475_v28, %v943_v41  ;;  %v7189_v28 = vld [vmem:[#allocation10_spill] sm:$0xff] }
 0x42d   : > { %878 = vrot.lane.b32.xlu0 %v7171_v24, %s3606_s28  ;;  %v1541_v38 = vsel %vm1526_vm8, %v1508_v51, %v5032_v1  ;;  %v1443_v1 = vsel %vm1427_vm5, %v1410_v0, %v4969_v27  ;;  %v5189_v24 = vpop.permute.xlu1 %1156  ;;  %v1414_v31 = vsel %vm1394_vm4, %v7189_v28, %v7188_v7  ;;  %v7192_v51 = vld [vmem:[#allocation32_spill] sm:$0xff]  ;;  %v7212_v28 = vld [vmem:[#allocation55_spill] sm:$0xff]  ;;  %s3112_s28 = sshll.u32 %s136_s27, 4  ;;  %s6872_s28 = int_to_ptr.vmem [resolvable:$true] %s3112_s28 }
 0x42e   : > { %v1476_v39 = vsel %vm1460_vm6, %v1443_v1, %v4995_v46  ;;  %v1574_v8 = vsel %vm1559_vm9, %v1541_v38, %v7183_v26  ;;  %v1544_v38 = vsel %vm1526_vm8, %v1511_v42, %v7196_v60  ;;  %v7198_v0 = vld [vmem:[#allocation52_spill] sm:$0xff]  ;;  %v7201_v26 = vld [vmem:[#allocation11_spill] sm:$0xff]  ;;  %v7217_v60 = vld [vmem:[#allocation41_spill] sm:$0xff]  ;;  %s3538_s7 = scalar_lea.vmem %s6872_s28, 1024  ;;  %p3545_p0 = scmp.lt.s32.totalorder %s6872_s28, %s3543_s8 }
 0x42f   : > { %v1323_v45 = vpop.permute.xlu0 %1322  ;;  %v7209_v42 = vld [vmem:[#allocation44_spill] sm:$0xff]  ;;  %p3539_p11 = scmp.ne.s32.totalorder %s6872_s28, %s3538_s7  ;;  %p3546_p1 = scmp.lt.s32.totalorder %s3544_s14, %s3538_s7 }
 0x430   : > { %v1638_v25 = vsel %vm1625_vm11, %v1605_v4, %v1323_v45  ;;  %v7194_v4 = vld [vmem:[#allocation9_spill] sm:$0xff] }
 0x431   : > { %v5172_v23 = vpop.f32.mrb[2].mxu0  ;;  %1258 = vrot.lane.b32.xlu0 %v7182_v35, %s3608_s30  ;;  %3286 = vmatprep.mubr.msk.f32.mxu0 %vm1663_vm12, %v1638_v25  ;;  %v1413_v29 = vsel %vm1394_vm4, %v7194_v4, %v7193_v20  ;;  %v7195_v45 = vld [vmem:[#allocation37_spill] sm:$0xff]  ;;  %v5229_v25 = vpop.permute.xlu1 %872  ;;  %p3540_p12 = pnand %p3539_p11, %p3667_p5  ;;  %p3547_p2 = por %p3546_p1, %p3545_p0 }
 0x432   : > { %v5179_v5 = vpop.f32.mrb[3].mxu0  ;;  %v1993_v46 = vsel %vm1625_vm11, %v5172_v23, 0.0  ;;  %v1447_v11 = vsel %vm1427_vm5, %v1414_v31, %v7195_v45  ;;  %v1446_v40 = vsel %vm1427_vm5, %v1413_v29, %v7198_v0  ;;  %v7215_v20 = vld [vmem:[#allocation77_spill] sm:$0xff]  ;;  %v7216_v45 = vld [vmem:[#allocation54_spill] sm:$0xff] }
 0x433   : > { %v1991_v14 = vsel %vm1625_vm11, %v5179_v5, 0.0  ;;  %v945_v18 = vpop.permute.xlu0 %944  ;;  %v1480_v2 = vsel %vm1460_vm6, %v1447_v11, %v7197_v32  ;;  %v7218_v32 = vld [vmem:[#allocation45_spill] sm:$0xff]  ;;  %v7219_v0 = vld [vmem:[#allocation82_spill] sm:$0xff]  ;;  %p3541_p13 = pneg %p3540_p12 }
 0x434   : > { %v1992_v48 = vadd.f32 %v1991_v14, %v5011_v49  ;;  %v1509_v27 = vsel %vm1493_vm7, %v1476_v39, %v945_v18  ;;  %v1607_v49 = vsel %vm1592_vm10, %v1574_v8, %v7186_v30  ;;  %v7200_v39 = vld [vmem:[#allocation47_spill] sm:$0xff]  ;;  %v7202_v14 = vld [vmem:[#allocation57_spill] sm:$0xff] }
 0x435   : > { %v1542_v6 = vsel %vm1526_vm8, %v1509_v27, %v5057_v56  ;;  %974 = vrot.lane.b32.xlu0 %v7182_v35, %s3609_s3  ;;  %v1640_v63 = vsel %vm1625_vm11, %v1607_v49, %v7191_v10  ;;  %v1411_v35 = vsel %vm1394_vm4, %v7199_v12, %v5015_v22  ;;  %v1416_v8 = vsel %vm1394_vm4, %v7201_v26, %v7200_v39  ;;  %v7204_v27 = vld [vmem:[#allocation75_spill] sm:$0xff]  ;;  %v7206_v22 = vld [vmem:[#allocation38_spill] sm:$0xff]  ;;  %v7208_v49 = vld [vmem:[#allocation73_spill] sm:$0xff]  ;;  %v5275_v29 = vpop.permute.xlu1 %1252  ;;  %p3548_p3 = pnand %p3547_p2, %p3541_p13 }
 0x436   : > { %v1575_v50 = vsel %vm1559_vm9, %v1542_v6, %v7185_v57  ;;  %v5205_v36 = vadd.f32 %v1993_v46, %v1992_v48  ;;  %v1479_v18 = vsel %vm1460_vm6, %v1446_v40, %v7202_v14  ;;  %v1513_v47 = vsel %vm1493_vm7, %v1480_v2, %v7204_v27  ;;  %v7205_v46 = vld [vmem:[#allocation28_spill] sm:$0xff]  ;;  %v7213_v10 = vld [vmem:[#allocation34_spill] sm:$0xff]  ;;  %v7222_v26 = vld [vmem:[#allocation79_spill] sm:$0xff] }
 0x437   : > { %v1325_v41 = vpop.permute.xlu0 %1324  ;;  %v1608_v44 = vsel %vm1592_vm10, %v1575_v50, %v7192_v51  ;;  %v1577_v57 = vsel %vm1559_vm9, %v1544_v38, %v7206_v22  ;;  %v7207_v50 = vld [vmem:[#allocation51_spill] sm:$0xff]  ;;  %v1512_v19 = vsel %vm1493_vm7, %v1479_v18, %v7208_v49  ;;  %v7214_v51 = vld [vmem:[#allocation49_spill] sm:$0xff]  ;;  %v7220_v12 = vld [vmem:[#allocation92_spill] sm:$0xff] }
 0x438   : > { %v1639_v56 = vsel %vm1625_vm11, %v1606_v55, %v1325_v41  ;;  %v1641_v48 = vsel %vm1625_vm11, %v1608_v44, %v7203_v52  ;;  %v1449_v30 = vsel %vm1427_vm5, %v1416_v8, %v7207_v50  ;;  %v7210_v55 = vld [vmem:[#allocation43_spill] sm:$0xff]  ;;  %v1546_v44 = vsel %vm1526_vm8, %v1513_v47, %v7214_v51  ;;  %v7223_v14 = vld [vmem:[#allocation90_spill] sm:$0xff]  ;;  %v7226_v27 = vld [vmem:[#allocation24_spill] sm:$0xff] }
 0x439   : > { %1354 = vrot.lane.b32.xlu0 %v7190_v54, %s3611_s5  ;;  %3287 = vmatmul.mubr.msk.f32.gmra.mrb[12].mxu0 %vm1663_vm12, %v1639_v56  ;;  %v7211_v56 = vld [vmem:[#allocation12_spill] sm:$0xff]  ;;  %v1482_v31 = vsel %vm1460_vm6, %v1449_v30, %v7212_v28  ;;  %v1610_v38 = vsel %vm1592_vm10, %v1577_v57, %v7217_v60  ;;  %v1545_v2 = vsel %vm1526_vm8, %v1512_v19, %v7218_v32  ;;  %v7230_v49 = vld [vmem:[#allocation91_spill] sm:$0xff]  ;;  %v7236_v51 = vld [vmem:[#allocation61_spill] sm:$0xff]  ;;  %v5327_v60 = vpop.permute.xlu1 %682  ;;  %s6877_s5 = scalar_lea.hbm %s6923_s2, %s3220_s29 }
 0x43a   : > { %3289 = vmatprep.mubr.msk.f32.mxu0 %vm1663_vm12, %v1640_v63  ;;  %v1415_v7 = vsel %vm1394_vm4, %v7211_v56, %v7210_v55  ;;  %v1578_v8 = vsel %vm1559_vm9, %v1545_v2, %v7222_v26  ;;  %v7229_v50 = vld [vmem:[#allocation76_spill] sm:$0xff]  ;;  %v7232_v55 = vld [vmem:[#allocation13_spill] sm:$0xff]  ;;  %v7240_v2 = vld [vmem:[#allocation18_spill] sm:$0xff] }
 0x43b   : > { %v755_v1 = vpop.permute.xlu0 %754  ;;  %v1448_v4 = vsel %vm1427_vm5, %v1415_v7, %v7215_v20  ;;  %v1643_v30 = vsel %vm1625_vm11, %v1610_v38, %v7229_v50  ;;  %v7233_v7 = vld [vmem:[#allocation64_spill] sm:$0xff]  ;;  %v7237_v20 = vld [vmem:[#allocation94_spill] sm:$0xff]  ;;  %v7239_v38 = vld [vmem:[#allocation93_spill] sm:$0xff] }
 0x43c   : > { %v1444_v16 = vsel %vm1427_vm5, %v1411_v35, %v755_v1  ;;  %v1481_v40 = vsel %vm1460_vm6, %v1448_v4, %v7219_v0  ;;  %v1515_v35 = vsel %vm1493_vm7, %v1482_v31, %v7220_v12  ;;  %v7221_v1 = vld [vmem:[#allocation72_spill] sm:$0xff]  ;;  %v7234_v31 = vld [vmem:[#allocation95_spill] sm:$0xff] }
 0x43d   : > { %v1477_v6 = vsel %vm1460_vm6, %v1444_v16, %v7205_v46  ;;  %1070 = vrot.lane.b32.xlu0 %v7190_v54, %s3610_s4  ;;  %3290 = vmatmul.mubr.msk.f32.gmra.mrb[14].mxu0 %vm1663_vm12, %v1641_v48  ;;  %v1514_v18 = vsel %vm1493_vm7, %v1481_v40, %v7223_v14  ;;  %v7224_v16 = vld [vmem:[#allocation74_spill] sm:$0xff]  ;;  %v7225_v48 = vld [vmem:[#allocation63_spill] sm:$0xff]  ;;  %v7227_v46 = vld [vmem:[#allocation89_spill] sm:$0xff] }
 0x43e   : > { %v1510_v41 = vsel %vm1493_vm7, %v1477_v6, %v7209_v42  ;;  %v1417_v47 = vsel %vm1394_vm4, %v7226_v27, %v7225_v48  ;;  %v1611_v6 = vsel %vm1592_vm10, %v1578_v8, %v7227_v46  ;;  %v7231_v42 = vld [vmem:[#allocation66_spill] sm:$0xff]  ;;  %v1547_v28 = vsel %vm1526_vm8, %v1514_v18, %v7233_v7  ;;  %v7241_v40 = vld [vmem:[#allocation68_spill] sm:$0xff]  ;;  %v7243_v26 = vld [vmem:[#allocation83_spill] sm:$0xff] }
 0x43f   : > { %v5267_v54 = vpop.permute.xlu0 %866  ;;  %v1543_v63 = vsel %vm1526_vm8, %v1510_v41, %v7213_v10  ;;  %v1644_v19 = vsel %vm1625_vm11, %v1611_v6, %v7230_v49  ;;  %v1548_v41 = vsel %vm1526_vm8, %v1515_v35, %v7231_v42  ;;  %v1450_v56 = vsel %vm1427_vm5, %v1417_v47, %v7232_v55  ;;  %v7244_v14 = vld [vmem:[#allocation78_spill] sm:$0xff]  ;;  %v7247_v47 = vld [vmem:[#allocation101_spill] sm:$0xff]  ;;  %v7250_v42 = vld [vmem:[#allocation100_spill] sm:$0xff] }
 0x440   : > { %v1576_v11 = vsel %vm1559_vm9, %v1543_v63, %v7216_v45  ;;  %v1483_v10 = vsel %vm1460_vm6, %v1450_v56, %v7234_v31  ;;  %v7235_v63 = vld [vmem:[#allocation6_spill] sm:$0xff]  ;;  %v1580_v4 = vsel %vm1559_vm9, %v1547_v28, %v7237_v20  ;;  %v7238_v45 = vld [vmem:[#allocation97_spill] sm:$0xff]  ;;  %v1581_v12 = vsel %vm1559_vm9, %v1548_v41, %v7241_v40 }
 0x441   : > { %1072 = vrot.lane.b32.xlu0 %v4955_v15, %s3610_s4  ;;  %v1609_v39 = vsel %vm1592_vm10, %v1576_v11, %v7221_v1  ;;  %v7228_v15 = vld [vmem:[#allocation53_spill] sm:$0xff]  ;;  %v1516_v11 = vsel %vm1493_vm7, %v1483_v10, %v7238_v45  ;;  %v1613_v0 = vsel %vm1592_vm10, %v1580_v4, %v7240_v2  ;;  %v7242_v1 = vld [vmem:[#allocation98_spill] sm:$0xff]  ;;  %v1614_v18 = vsel %vm1592_vm10, %v1581_v12, %v7244_v14  ;;  %v7254_v2 = vld [vmem:[#allocation20_spill] sm:$0xff] }
 0x442   : > { %v1642_v52 = vsel %vm1625_vm11, %v1609_v39, %v7224_v16  ;;  %v1579_v22 = vsel %vm1559_vm9, %v1546_v44, %v7228_v15  ;;  %v1646_v39 = vsel %vm1625_vm11, %v1613_v0, %v7242_v1  ;;  %v1549_v8 = vsel %vm1526_vm8, %v1516_v11, %v7243_v26  ;;  %v7246_v48 = vld [vmem:[#allocation14_spill] sm:$0xff]  ;;  %v7252_v11 = vld [vmem:[#allocation80_spill] sm:$0xff]  ;;  %v7255_v1 = vld [vmem:[#allocation85_spill] sm:$0xff] }
 0x443   : > { %v1247_v57 = vpop.permute.xlu0 %1246  ;;  %3292 = vmatprep.mubr.msk.f32.mxu1 %vm1663_vm12, %v1642_v52  ;;  %v1612_v44 = vsel %vm1592_vm10, %v1579_v22, %v7236_v51  ;;  %v1582_v16 = vsel %vm1559_vm9, %v1549_v8, %v4928_v61  ;;  %v7245_v52 = vld [vmem:[#allocation65_spill] sm:$0xff]  ;;  %v1647_v46 = vsel %vm1625_vm11, %v1614_v18, %v7247_v47  ;;  %v7248_v22 = vld [vmem:[#allocation67_spill] sm:$0xff] }
 0x444   : > { %3293 = vmatmul.mubr.msk.f32.vlgmr.msra.gmra.mrb[0].mxu1 %vm1663_vm12, %v1643_v30  ;;  %v1645_v32 = vsel %vm1625_vm11, %v1612_v44, %v7239_v38  ;;  %v1418_v27 = vsel %vm1394_vm4, %v7246_v48, %v7245_v52  ;;  %v1615_v6 = vsel %vm1592_vm10, %v1582_v16, %v1247_v57  ;;  %v5353_v30 = vpop.permute.xlu1 %1062  ;;  %v7249_v61 = vld [vmem:[#allocation69_spill] sm:$0xff]  ;;  %v7251_v57 = vld [vmem:[#allocation86_spill] sm:$0xff]  ;;  %v7253_v38 = vld [vmem:[#allocation40_spill] sm:$0xff] }
 0x445   : > { %3396 = vrot.lane.b32.xlu0 %v7235_v63, %s3608_s30  ;;  %3295 = vmatprep.mubr.msk.f32.mxu1 %vm1663_vm12, %v1644_v19  ;;  %v1451_v50 = vsel %vm1427_vm5, %v1418_v27, %v7248_v22  ;;  %v7257_v14 = vld [vmem:[#allocation87_spill] sm:$0xff] }
 0x446   : > { %v1484_v19 = vsel %vm1460_vm6, %v1451_v50, %v7249_v61 }
 0x447   : > { %v963_v35 = vpop.permute.xlu0 %962  ;;  %v1517_v41 = vsel %vm1493_vm7, %v1484_v19, %v7250_v42 }
 0x448   : > { %3296 = vmatmul.mubr.msk.f32.gmra.mrb[2].mxu1 %vm1663_vm12, %v1645_v32  ;;  %v1550_v56 = vsel %vm1526_vm8, %v1517_v41, %v7251_v57  ;;  %v5366_v28 = vpop.permute.xlu1 %684 }
 0x449   : > { %3298 = vmatprep.mubr.msk.f32.mxu1 %vm1663_vm12, %v1646_v39  ;;  %v1583_v7 = vsel %vm1559_vm9, %v1550_v56, %v5069_v62  ;;  %v1419_v62 = vsel %vm1394_vm4, %v7253_v38, %v7252_v11  ;;  %v7256_v39 = vld [vmem:[#allocation31_spill] sm:$0xff]  ;;  %v7258_v38 = vld [vmem:[#allocation88_spill] sm:$0xff] }
 0x44a   : > { %v1616_v31 = vsel %vm1592_vm10, %v1583_v7, %v5097_v58  ;;  %v1452_v0 = vsel %vm1427_vm5, %v1419_v62, %v7254_v2  ;;  %v1420_v26 = vsel %vm1394_vm4, %v7256_v39, %v7255_v1  ;;  %v1422_v62 = vsel %vm1394_vm4, %v7258_v38, %v5123_v13 }
 0x44b   : > { %v1343_v15 = vpop.permute.xlu0 %1342  ;;  %v1485_v40 = vsel %vm1460_vm6, %v1452_v0, %v5267_v54  ;;  %v1453_v18 = vsel %vm1427_vm5, %v1420_v26, %v7257_v14  ;;  %v1455_v2 = vsel %vm1427_vm5, %v1422_v62, %v5154_v59 }
 0x44c   : > { %v1648_v49 = vsel %vm1625_vm11, %v1615_v6, %v1343_v15  ;;  %3299 = vmatmul.mubr.msk.f32.gmra.mrb[4].mxu1 %vm1663_vm12, %v1647_v46  ;;  %v1065_v44 = vpop.permute.xlu1 %1064  ;;  %v1518_v12 = vsel %vm1493_vm7, %v1485_v40, %v963_v35  ;;  %v1486_v16 = vsel %vm1460_vm6, %v1453_v18, %v5080_v34  ;;  %v1488_v40 = vsel %vm1460_vm6, %v1455_v2, %v5229_v25 }
 0x44d   : > { %3301 = vmatprep.mubr.msk.f32.mxu1 %vm1663_vm12, %v1648_v49  ;;  %v1551_v52 = vsel %vm1526_vm8, %v1518_v12, %v5117_v9 }
 0x44f   : > { %v965_v55 = vpop.permute.xlu0 %964 }
 0x450   : > { %v5372_v4 = vpop.permute.xlu1 %780  ;;  %v1519_v27 = vsel %vm1493_vm7, %v1486_v16, %v965_v55 }
 0x451   : > { %v1552_v6 = vsel %vm1526_vm8, %v1519_v27, %v5130_v21  ;;  %v7259_v27 = vld [vmem:[#allocation15_spill] sm:$0xff] }
 0x452   : > { %v1585_v9 = vsel %vm1559_vm9, %v1552_v6, %v5189_v24  ;;  %v1423_v6 = vsel %vm1394_vm4, %v4749_v53, %v5327_v60 }
 0x453   : > { %v1345_v10 = vpop.permute.xlu0 %1344  ;;  %v1618_v19 = vsel %vm1592_vm10, %v1585_v9, %v5275_v29 }
 0x454   : > { %v1649_v63 = vsel %vm1625_vm11, %v1616_v31, %v1345_v10  ;;  %v1161_v58 = vpop.permute.xlu1 %1160 }
 0x455   : > { %3302 = vmatmul.mubr.msk.f32.gmra.mrb[6].mxu1 %vm1663_vm12, %v1649_v63 }
 0x457   : > { %v775_v51 = vpop.permute.xlu0 %774 }
 0x458   : > { %v877_v48 = vpop.permute.xlu1 %876 }
 0x45b   : > { %v1155_v20 = vpop.permute.xlu0 %1154 }
 0x45c   : > { %v1584_v54 = vsel %vm1559_vm9, %v1551_v52, %v1155_v20  ;;  %v1257_v34 = vpop.permute.xlu1 %1256 }
 0x45f   : > { %v871_v45 = vpop.permute.xlu0 %870 }
 0x460   : > { %v5413_v24 = vpop.permute.xlu1 %686 }
 0x461   : > { %v1425_v62 = vsel %vm1394_vm4, %v4841_v17, %v5413_v24 }
 0x463   : > { %v1251_v32 = vpop.permute.xlu0 %1250 }
 0x464   : > { %v1617_v35 = vsel %vm1592_vm10, %v1584_v54, %v1251_v32  ;;  %v1067_v7 = vpop.permute.xlu1 %1066 }
 0x467   : > { %v967_v8 = vpop.permute.xlu0 %966 }
 0x468   : > { %v5417_v10 = vpop.permute.xlu1 %688 }
 0x46b   : > { %v1347_v47 = vpop.permute.xlu0 %1346 }
 0x46c   : > { %v1650_v46 = vsel %vm1625_vm11, %v1617_v35, %v1347_v47  ;;  %v1069_v0 = vpop.permute.xlu1 %1068 }
 0x46d   : > { %3304 = vmatprep.mubr.msk.f32.mxu1 %vm1663_vm12, %v1650_v46 }
 0x46f   : > { %v969_v15 = vpop.permute.xlu0 %968 }
 0x470   : > { %v785_v59 = vpop.permute.xlu1 %784 }
 0x471   : > { %v5400_v22 = vpop.f32.mrb[4].mxu0 }
 0x472   : > { %v5402_v50 = vpop.f32.mrb[5].mxu0  ;;  %v1997_v41 = vsel %vm1625_vm11, %v5400_v22, 0.0 }
 0x473   : > { %v1995_v49 = vsel %vm1625_vm11, %v5402_v50, 0.0  ;;  %v1349_v61 = vpop.permute.xlu0 %1348 }
 0x474   : > { %v1996_v21 = vadd.f32 %v1995_v49, %v5205_v36  ;;  %v1651_v42 = vsel %vm1625_vm11, %v1618_v19, %v1349_v61  ;;  %v1421_v36 = vsel %vm1394_vm4, %v4601_v43, %v5109_v37  ;;  %v1521_v37 = vsel %vm1493_vm7, %v1488_v40, %v969_v15 }
 0x475   : > { %3305 = vmatmul.mubr.msk.f32.gmra.mrb[8].mxu1 %vm1663_vm12, %v1651_v42  ;;  %v1454_v63 = vsel %vm1427_vm5, %v1421_v36, %v775_v51  ;;  %v1554_v1 = vsel %vm1526_vm8, %v1521_v37, %v1065_v44  ;;  %v1424_v44 = vsel %vm1394_vm4, %v7259_v27, %v5366_v28 }
 0x476   : > { %v5415_v55 = vadd.f32 %v1997_v41, %v1996_v21  ;;  %v1487_v20 = vsel %vm1460_vm6, %v1454_v63, %v871_v45  ;;  %v1587_v25 = vsel %vm1559_vm9, %v1554_v1, %v1161_v58  ;;  %v1457_v54 = vsel %vm1427_vm5, %v1424_v44, %v5372_v4 }
 0x477   : > { %v779_v57 = vpop.permute.xlu0 %778  ;;  %v1520_v11 = vsel %vm1493_vm7, %v1487_v20, %v967_v8  ;;  %v1165_v8 = vpop.permute.xlu1 %1164  ;;  %v1490_v58 = vsel %vm1460_vm6, %v1457_v54, %v877_v48 }
 0x478   : > { %v1553_v43 = vsel %vm1526_vm8, %v1520_v11, %v5353_v30  ;;  %v1620_v30 = vsel %vm1592_vm10, %v1587_v25, %v1257_v34  ;;  %v1456_v34 = vsel %vm1427_vm5, %v1423_v6, %v779_v57 }
 0x47b   : > { %v1159_v56 = vpop.permute.xlu0 %1158  ;;  %v881_v16 = vpop.permute.xlu1 %880 }
 0x47c   : > { %v1586_v51 = vsel %vm1559_vm9, %v1553_v43, %v1159_v56 }
 0x47f   : > { %v875_v31 = vpop.permute.xlu0 %874  ;;  %v1261_v47 = vpop.permute.xlu1 %1260 }
 0x480   : > { %v1489_v28 = vsel %vm1460_vm6, %v1456_v34, %v875_v31 }
 0x483   : > { %v1255_v29 = vpop.permute.xlu0 %1254  ;;  %v977_v49 = vpop.permute.xlu1 %976 }
 0x484   : > { %v1619_v45 = vsel %vm1592_vm10, %v1586_v51, %v1255_v29 }
 0x487   : > { %v971_v32 = vpop.permute.xlu0 %970  ;;  %v1357_v41 = vpop.permute.xlu1 %1356 }
 0x488   : > { %v1522_v4 = vsel %vm1493_vm7, %v1489_v28, %v971_v32  ;;  %v7260_v32 = vld [vmem:[#allocation58_spill] sm:$0xff] }
 0x489   : > { %v1555_v19 = vsel %vm1526_vm8, %v1522_v4, %v1067_v7  ;;  %v1426_v2 = vsel %vm1394_vm4, %v7260_v32, %v5417_v10 }
 0x48b   : > { %v1351_v12 = vpop.permute.xlu0 %1350  ;;  %v3392_v11 = vpop.permute.xlu1 %3391 }
 0x48c   : > { %v1652_v13 = vsel %vm1625_vm11, %v1619_v45, %v1351_v12  ;;  %v3393_v17 = vunpack.i.l.bf16 %v3392_v11 }
 0x48d   : > { %3307 = vmatprep.mubr.msk.f32.mxu1 %vm1663_vm12, %v1652_v13  ;;  %v3394_v13 = vunpack.i.h.bf16 %v3392_v11 }
 0x48f   : > { %v973_v39 = vpop.permute.xlu0 %972  ;;  %v3402_v51 = vpop.permute.xlu1 %3401 }
 0x490   : > { %v1523_v46 = vsel %vm1493_vm7, %v1490_v58, %v973_v39  ;;  %v3403_v39 = vunpack.i.l.bf16 %v3402_v51 }
 0x491   : > { %v1556_v9 = vsel %vm1526_vm8, %v1523_v46, %v1069_v0  ;;  %v1459_v0 = vsel %vm1427_vm5, %v1426_v2, %v785_v59  ;;  %v3404_v59 = vunpack.i.h.bf16 %v3402_v51 }
 0x492   : > { %v1589_v61 = vsel %vm1559_vm9, %v1556_v9, %v1165_v8 }
 0x493   : > { %v1353_v26 = vpop.permute.xlu0 %1352  ;;  %v1622_v42 = vsel %vm1592_vm10, %v1589_v61, %v1261_v47 }
 0x494   : > { %v1653_v14 = vsel %vm1625_vm11, %v1620_v30, %v1353_v26  ;;  %v1655_v36 = vsel %vm1625_vm11, %v1622_v42, %v1357_v41 }
 0x495   : > { %3308 = vmatmul.mubr.msk.f32.gmra.mrb[10].mxu1 %vm1663_vm12, %v1653_v14 }
 0x497   : > { %v783_v18 = vpop.permute.xlu0 %782 }
 0x498   : > { %v1458_v40 = vsel %vm1427_vm5, %v1425_v62, %v783_v18 }
 0x49b   : > { %v1163_v52 = vpop.permute.xlu0 %1162 }
 0x49c   : > { %v1588_v21 = vsel %vm1559_vm9, %v1555_v19, %v1163_v52 }
 0x49f   : > { %v879_v35 = vpop.permute.xlu0 %878 }
 0x4a0   : > { %v1491_v37 = vsel %vm1460_vm6, %v1458_v40, %v879_v35 }
 0x4a3   : > { %v1259_v15 = vpop.permute.xlu0 %1258 }
 0x4a4   : > { %v1621_v53 = vsel %vm1592_vm10, %v1588_v21, %v1259_v15 }
 0x4a7   : > { %v975_v48 = vpop.permute.xlu0 %974 }
 0x4a8   : > { %v1524_v12 = vsel %vm1493_vm7, %v1491_v37, %v975_v48 }
 0x4ab   : > { %v1355_v60 = vpop.permute.xlu0 %1354 }
 0x4ac   : > { %v1654_v57 = vsel %vm1625_vm11, %v1621_v53, %v1355_v60  ;;  %v5464_v56 = vpop.f32.mrb[6].mxu0 }
 0x4ad   : > { %v5466_v31 = vpop.f32.mrb[7].mxu0  ;;  %3310 = vmatprep.mubr.msk.f32.mxu1 %vm1663_vm12, %v1654_v57  ;;  %v2001_v20 = vsel %vm1625_vm11, %v5464_v56, 0.0 }
 0x4ae   : > { %v1999_v7 = vsel %vm1625_vm11, %v5466_v31, 0.0  ;;  %3311 = vmatmul.mubr.msk.f32.gmra.mrb[12].mxu1 %vm1663_vm12, %v1655_v36 }
 0x4af   : > { %v2000_v29 = vadd.f32 %v1999_v7, %v5415_v55  ;;  %v1071_v63 = vpop.permute.xlu0 %1070  ;;  %v1492_v55 = vsel %vm1460_vm6, %v1459_v0, %v881_v16 }
 0x4b0   : > { %v1525_v45 = vsel %vm1493_vm7, %v1492_v55, %v977_v49  ;;  %v1557_v24 = vsel %vm1526_vm8, %v1524_v12, %v1071_v63 }
 0x4b1   : > { %v2002_v38 = vadd.f32 %v2001_v20, %v2000_v29  ;;  %v1590_v30 = vsel %vm1559_vm9, %v1557_v24, %v3393_v17 }
 0x4b3   : > { %v1073_v43 = vpop.permute.xlu0 %1072 }
 0x4b4   : > { %v1558_v10 = vsel %vm1526_vm8, %v1525_v45, %v1073_v43 }
 0x4b5   : > { %v1591_v8 = vsel %vm1559_vm9, %v1558_v10, %v3394_v13 }
 0x4b7   : > { %v3397_v1 = vpop.permute.xlu0 %3396 }
 0x4b8   : > { %v3399_v25 = vunpack.i.h.bf16 %v3397_v1  ;;  %v3398_v26 = vunpack.i.l.bf16 %v3397_v1 }
 0x4ba   : > { %v1623_v14 = vsel %vm1592_vm10, %v1590_v30, %v3398_v26  ;;  %v1624_v18 = vsel %vm1592_vm10, %v1591_v8, %v3399_v25 }
 0x4bb   : > { %v1656_v16 = vsel %vm1625_vm11, %v1623_v14, %v3403_v39  ;;  %v1657_v52 = vsel %vm1625_vm11, %v1624_v18, %v3404_v59 }
 0x4bc   : > { %3313 = vmatprep.mubr.msk.f32.mxu1 %vm1663_vm12, %v1656_v16 }
 0x4bd   : > { %3314 = vmatmul.mubr.msk.f32.gmra.mrb[14].mxu1 %vm1663_vm12, %v1657_v52 }
 0x4cc   : > { %v5498_v27 = vpop.f32.mrb[8].mxu0 }
 0x4cd   : > { %v5500_v44 = vpop.f32.mrb[9].mxu0  ;;  %v2005_v58 = vsel %vm1625_vm11, %v5498_v27, 0.0 }
 0x4ce   : > { %v2003_v54 = vsel %vm1625_vm11, %v5500_v44, 0.0 }
 0x4cf   : > { %v2004_v35 = vadd.f32 %v2003_v54, %v2002_v38 }
 0x4d1   : > { %v2006_v47 = vadd.f32 %v2005_v58, %v2004_v35 }
 0x4ec   : > { %v5506_v46 = vpop.f32.mrb[10].mxu0 }
 0x4ed   : > { %v5508_v6 = vpop.f32.mrb[11].mxu0  ;;  %v2009_v9 = vsel %vm1625_vm11, %v5506_v46, 0.0 }
 0x4ee   : > { %v2007_v15 = vsel %vm1625_vm11, %v5508_v6, 0.0 }
 0x4ef   : > { %v2008_v34 = vadd.f32 %v2007_v15, %v2006_v47 }
 0x4f1   : > { %v2010_v28 = vadd.f32 %v2009_v9, %v2008_v34 }
 0x50c   : > { %v5514_v49 = vpop.f32.mrb[12].mxu0 }
 0x50d   : > { %v5516_v4 = vpop.f32.mrb[13].mxu0  ;;  %v2013_v19 = vsel %vm1625_vm11, %v5514_v49, 0.0 }
 0x50e   : > { %v2011_v61 = vsel %vm1625_vm11, %v5516_v4, 0.0 }
 0x50f   : > { %v2012_v48 = vadd.f32 %v2011_v61, %v2010_v28 }
 0x510   : > { %v5522_v21 = vpop.f32.mrb[14].mxu0 }
 0x511   : > { %v5524_v42 = vpop.f32.mrb[15].mxu0  ;;  %v2014_v53 = vadd.f32 %v2013_v19, %v2012_v48  ;;  %v2017_v57 = vsel %vm1625_vm11, %v5522_v21, 0.0 }
 0x512   : > { %v2015_v60 = vsel %vm1625_vm11, %v5524_v42, 0.0 }
 0x513   : > { %v2016_v41 = vadd.f32 %v2015_v60, %v2014_v53 }
 0x515   : > { %v2018_v36 = vadd.f32 %v2017_v57, %v2016_v41 }
 0x517   : > { %v5530_v7 = vpop.f32.mrb[0].mxu1 }
 0x518   : > { %v5532_v29 = vpop.f32.mrb[1].mxu1  ;;  %v2021_v11 = vsel %vm1625_vm11, %v5530_v7, 0.0 }
 0x519   : > { %v2019_v63 = vsel %vm1625_vm11, %v5532_v29, 0.0 }
 0x51a   : > { %v2020_v20 = vadd.f32 %v2019_v63, %v2018_v36 }
 0x51b   : > { %v5538_v38 = vpop.f32.mrb[2].mxu1 }
 0x51c   : > { %v5540_v62 = vpop.f32.mrb[3].mxu1  ;;  %v2022_v32 = vadd.f32 %v2021_v11, %v2020_v20  ;;  %v2025_v40 = vsel %vm1625_vm11, %v5538_v38, 0.0 }
 0x51d   : > { %v2023_v2 = vsel %vm1625_vm11, %v5540_v62, 0.0 }
 0x51e   : > { %v2024_v0 = vadd.f32 %v2023_v2, %v2022_v32 }
 0x51f   : > { %v5546_v43 = vpop.f32.mrb[4].mxu1 }
 0x520   : > { %v5548_v55 = vpop.f32.mrb[5].mxu1  ;;  %v2026_v37 = vadd.f32 %v2025_v40, %v2024_v0  ;;  %v2029_v12 = vsel %vm1625_vm11, %v5546_v43, 0.0 }
 0x521   : > { %v2027_v51 = vsel %vm1625_vm11, %v5548_v55, 0.0 }
 0x522   : > { %v2028_v45 = vadd.f32 %v2027_v51, %v2026_v37 }
 0x524   : > { %v2030_v13 = vadd.f32 %v2029_v12, %v2028_v45 }
 0x528   : > { %v3303_v17 = vpop.f32.mrb[6].mxu1 }
 0x529   : > { %v1939_v24 = vpop.f32.mrb[7].mxu1  ;;  %v2033_v59 = vsel %vm1625_vm11, %v3303_v17, 0.0 }
 0x52a   : > { %v2031_v10 = vsel %vm1625_vm11, %v1939_v24, 0.0 }
 0x52b   : > { %v2032_v1 = vadd.f32 %v2031_v10, %v2030_v13 }
 0x52d   : > { %v2034_v39 = vadd.f32 %v2033_v59, %v2032_v1 }
 0x548   : > { %v3306_v25 = vpop.f32.mrb[8].mxu1 }
 0x549   : > { %v1949_v26 = vpop.f32.mrb[9].mxu1  ;;  %v2037_v14 = vsel %vm1625_vm11, %v3306_v25, 0.0 }
 0x54a   : > { %v2035_v30 = vsel %vm1625_vm11, %v1949_v26, 0.0 }
 0x54b   : > { %v2036_v8 = vadd.f32 %v2035_v30, %v2034_v39 }
 0x54d   : > { %v2038_v18 = vadd.f32 %v2037_v14, %v2036_v8 }
 0x568   : > { %v3309_v16 = vpop.f32.mrb[10].mxu1 }
 0x569   : > { %v1959_v52 = vpop.f32.mrb[11].mxu1  ;;  %v2041_v58 = vsel %vm1625_vm11, %v3309_v16, 0.0 }
 0x56a   : > { %v2039_v54 = vsel %vm1625_vm11, %v1959_v52, 0.0 }
 0x56b   : > { %v2040_v35 = vadd.f32 %v2039_v54, %v2038_v18 }
 0x56d   : > { %v2042_v47 = vadd.f32 %v2041_v58, %v2040_v35 }
 0x581   : > { %v3312_v15 = vpop.f32.mrb[12].mxu1 }
 0x582   : > { %v1969_v34 = vpop.f32.mrb[13].mxu1  ;;  %v2045_v61 = vsel %vm1625_vm11, %v3312_v15, 0.0 }
 0x583   : > { %v2043_v9 = vsel %vm1625_vm11, %v1969_v34, 0.0 }
 0x584   : > { %v2044_v28 = vadd.f32 %v2043_v9, %v2042_v47 }
 0x586   : > { %v2046_v48 = vadd.f32 %v2045_v61, %v2044_v28 }
 0x590   : > { %v3315_v19 = vpop.f32.mrb[14].mxu1 }
 0x591   : > { %v1979_v53 = vpop.f32.mrb[15].mxu1  ;;  %v2049_v57 = vsel %vm1625_vm11, %v3315_v19, 0.0 }
 0x592   : > { %v2047_v60 = vsel %vm1625_vm11, %v1979_v53, 0.0 }
 0x593   : > { %v2048_v41 = vadd.f32 %v2047_v60, %v2046_v48 }
 0x595   : > { %v2050_v36 = vadd.f32 %v2049_v57, %v2048_v41 }
 0x597   : > { %v2051_v63 = vrot.slane %v2050_v36, 4 }
 0x599   : > { %v2052_v20 = vadd.f32 %v2051_v63, %v2050_v36 }
 0x59b   : > { %v2053_v11 = vrot.slane %v2052_v20, 2 }
 0x59d   : > { %v2054_v32 = vadd.f32 %v2053_v11, %v2052_v20 }
 0x59f   : > { %v2055_v2 = vrot.slane %v2054_v32, 1 }
 0x5a1   : > { %v2056_v0 = vadd.f32 %v2055_v2, %v2054_v32 }
 0x5a3   : > { %v2057_v40 = vmul.f32 0.00390625, %v2056_v0 }
 0x5a5   : > { %v5565_v37 = vsub.f32 %v5007_v33, %v2057_v40  ;;  %v5568_v51 = vsub.f32 %v5001_v3, %v2057_v40  ;;  %v5571_v45 = vsub.f32 %v5179_v5, %v2057_v40  ;;  %v5574_v12 = vsub.f32 %v5172_v23, %v2057_v40 }
 0x5a6   : > { %v5577_v13 = vsub.f32 %v5402_v50, %v2057_v40  ;;  %v5580_v10 = vsub.f32 %v5400_v22, %v2057_v40  ;;  %v5583_v1 = vsub.f32 %v5466_v31, %v2057_v40  ;;  %v5586_v33 = vsub.f32 %v5464_v56, %v2057_v40 }
 0x5a7   : > { %v5589_v3 = vsub.f32 %v5500_v44, %v2057_v40  ;;  %v5592_v5 = vsub.f32 %v5498_v27, %v2057_v40  ;;  %v5595_v23 = vsub.f32 %v5508_v6, %v2057_v40  ;;  %v5598_v50 = vsub.f32 %v5506_v46, %v2057_v40 }
 0x5a8   : > { %v5601_v22 = vsub.f32 %v5516_v4, %v2057_v40  ;;  %v5604_v31 = vsub.f32 %v5514_v49, %v2057_v40  ;;  %v5607_v56 = vsub.f32 %v5524_v42, %v2057_v40  ;;  %v5610_v44 = vsub.f32 %v5522_v21, %v2057_v40 }
 0x5a9   : > { %v5613_v27 = vsub.f32 %v5532_v29, %v2057_v40  ;;  %v5616_v6 = vsub.f32 %v5530_v7, %v2057_v40  ;;  %v5619_v46 = vsub.f32 %v5540_v62, %v2057_v40  ;;  %v5622_v4 = vsub.f32 %v5538_v38, %v2057_v40 }
 0x5aa   : > { %v5625_v49 = vsub.f32 %v5548_v55, %v2057_v40  ;;  %v5628_v42 = vsub.f32 %v5546_v43, %v2057_v40  ;;  %v5630_v21 = vsub.f32 %v1939_v24, %v2057_v40  ;;  %v5632_v59 = vsub.f32 %v3303_v17, %v2057_v40 }
 0x5ab   : > { %v5634_v29 = vsub.f32 %v1949_v26, %v2057_v40  ;;  %v5636_v7 = vsub.f32 %v3306_v25, %v2057_v40  ;;  %v5638_v39 = vsub.f32 %v1959_v52, %v2057_v40  ;;  %v5640_v62 = vsub.f32 %v3309_v16, %v2057_v40 }
 0x5ac   : > { %v5642_v38 = vsub.f32 %v1969_v34, %v2057_v40  ;;  %v5644_v30 = vsub.f32 %v3312_v15, %v2057_v40  ;;  %v5646_v55 = vsub.f32 %v1979_v53, %v2057_v40  ;;  %v5648_v43 = vsub.f32 %v3315_v19, %v2057_v40 }
 0x5ad   : > { %v2090_v17 = vmul.f32 %v5565_v37, %v5565_v37  ;;  %v2091_v24 = vmul.f32 %v5568_v51, %v5568_v51  ;;  %v2092_v25 = vmul.f32 %v5571_v45, %v5571_v45  ;;  %v2093_v26 = vmul.f32 %v5574_v12, %v5574_v12 }
 0x5ae   : > { %v2094_v16 = vmul.f32 %v5577_v13, %v5577_v13  ;;  %v2095_v35 = vmul.f32 %v5580_v10, %v5580_v10  ;;  %v2096_v15 = vmul.f32 %v5583_v1, %v5583_v1  ;;  %v2097_v28 = vmul.f32 %v5586_v33, %v5586_v33 }
 0x5af   : > { %v2122_v8 = vsel %vm1625_vm11, %v2090_v17, 0.0  ;;  %v2123_v14 = vsel %vm1625_vm11, %v2091_v24, 0.0  ;;  %v2125_v52 = vsel %vm1625_vm11, %v2092_v25, 0.0  ;;  %v2127_v58 = vsel %vm1625_vm11, %v2093_v26, 0.0 }
 0x5b0   : > { %v2124_v18 = vadd.f32 %v2123_v14, %v2122_v8  ;;  %v2129_v34 = vsel %vm1625_vm11, %v2094_v16, 0.0  ;;  %v2131_v61 = vsel %vm1625_vm11, %v2095_v35, 0.0  ;;  %v2098_v19 = vmul.f32 %v5589_v3, %v5589_v3 }
 0x5b1   : > { %v2133_v53 = vsel %vm1625_vm11, %v2096_v15, 0.0  ;;  %v2099_v41 = vmul.f32 %v5592_v5, %v5592_v5  ;;  %v2135_v57 = vsel %vm1625_vm11, %v2097_v28, 0.0  ;;  %v2100_v63 = vmul.f32 %v5595_v23, %v5595_v23 }
 0x5b2   : > { %v2126_v54 = vadd.f32 %v2125_v52, %v2124_v18  ;;  %v2137_v20 = vsel %vm1625_vm11, %v2098_v19, 0.0  ;;  %v2101_v32 = vmul.f32 %v5598_v50, %v5598_v50  ;;  %v2102_v40 = vmul.f32 %v5601_v22, %v5601_v22 }
 0x5b3   : > { %v2139_v2 = vsel %vm1625_vm11, %v2099_v41, 0.0  ;;  %v2141_v17 = vsel %vm1625_vm11, %v2100_v63, 0.0  ;;  %v2103_v25 = vmul.f32 %v5604_v31, %v5604_v31  ;;  %v2104_v14 = vmul.f32 %v5607_v56, %v5607_v56 }
 0x5b4   : > { %v2128_v47 = vadd.f32 %v2127_v58, %v2126_v54  ;;  %v2143_v26 = vsel %vm1625_vm11, %v2101_v32, 0.0  ;;  %v2145_v18 = vsel %vm1625_vm11, %v2102_v40, 0.0  ;;  %v2105_v52 = vmul.f32 %v5610_v44, %v5610_v44 }
 0x5b5   : > { %v2147_v54 = vsel %vm1625_vm11, %v2103_v25, 0.0  ;;  %v2106_v58 = vmul.f32 %v5613_v27, %v5613_v27 }
 0x5b6   : > { %v2130_v9 = vadd.f32 %v2129_v34, %v2128_v47  ;;  %v2149_v47 = vsel %vm1625_vm11, %v2104_v14, 0.0  ;;  %v2107_v34 = vmul.f32 %v5616_v6, %v5616_v6 }
 0x5b8   : > { %v2132_v48 = vadd.f32 %v2131_v61, %v2130_v9  ;;  %v2151_v9 = vsel %vm1625_vm11, %v2105_v52, 0.0  ;;  %v2108_v61 = vmul.f32 %v5619_v46, %v5619_v46 }
 0x5ba   : > { %v2134_v60 = vadd.f32 %v2133_v53, %v2132_v48  ;;  %v2153_v48 = vsel %vm1625_vm11, %v2106_v58, 0.0  ;;  %v2109_v53 = vmul.f32 %v5622_v4, %v5622_v4 }
 0x5bc   : > { %v2136_v36 = vadd.f32 %v2135_v57, %v2134_v60  ;;  %v2155_v60 = vsel %vm1625_vm11, %v2107_v34, 0.0  ;;  %v2110_v57 = vmul.f32 %v5625_v49, %v5625_v49 }
 0x5be   : > { %v2138_v11 = vadd.f32 %v2137_v20, %v2136_v36  ;;  %v2157_v36 = vsel %vm1625_vm11, %v2108_v61, 0.0  ;;  %v2111_v20 = vmul.f32 %v5628_v42, %v5628_v42 }
 0x5c0   : > { %v2140_v0 = vadd.f32 %v2139_v2, %v2138_v11  ;;  %v2159_v11 = vsel %vm1625_vm11, %v2109_v53, 0.0  ;;  %v2112_v2 = vmul.f32 %v5630_v21, %v5630_v21 }
 0x5c2   : > { %v2142_v24 = vadd.f32 %v2141_v17, %v2140_v0  ;;  %v2161_v0 = vsel %vm1625_vm11, %v2110_v57, 0.0  ;;  %v2113_v17 = vmul.f32 %v5632_v59, %v5632_v59 }
 0x5c4   : > { %v2144_v8 = vadd.f32 %v2143_v26, %v2142_v24  ;;  %v2163_v24 = vsel %vm1625_vm11, %v2111_v20, 0.0  ;;  %v2114_v26 = vmul.f32 %v5634_v29, %v5634_v29 }
 0x5c6   : > { %v2146_v16 = vadd.f32 %v2145_v18, %v2144_v8  ;;  %v2165_v8 = vsel %vm1625_vm11, %v2112_v2, 0.0  ;;  %v2115_v18 = vmul.f32 %v5636_v7, %v5636_v7 }
 0x5c8   : > { %v2148_v35 = vadd.f32 %v2147_v54, %v2146_v16  ;;  %v2167_v16 = vsel %vm1625_vm11, %v2113_v17, 0.0  ;;  %v2116_v54 = vmul.f32 %v5638_v39, %v5638_v39 }
 0x5ca   : > { %v2150_v15 = vadd.f32 %v2149_v47, %v2148_v35  ;;  %v2169_v35 = vsel %vm1625_vm11, %v2114_v26, 0.0  ;;  %v2117_v47 = vmul.f32 %v5640_v62, %v5640_v62 }
 0x5cc   : > { %v2152_v28 = vadd.f32 %v2151_v9, %v2150_v15  ;;  %v2171_v15 = vsel %vm1625_vm11, %v2115_v18, 0.0  ;;  %v2118_v9 = vmul.f32 %v5642_v38, %v5642_v38 }
 0x5ce   : > { %v2154_v19 = vadd.f32 %v2153_v48, %v2152_v28  ;;  %v2173_v28 = vsel %vm1625_vm11, %v2116_v54, 0.0  ;;  %v2119_v48 = vmul.f32 %v5644_v30, %v5644_v30 }
 0x5d0   : > { %v2156_v41 = vadd.f32 %v2155_v60, %v2154_v19  ;;  %v2175_v19 = vsel %vm1625_vm11, %v2117_v47, 0.0  ;;  %v2120_v60 = vmul.f32 %v5646_v55, %v5646_v55 }
 0x5d2   : > { %v2158_v63 = vadd.f32 %v2157_v36, %v2156_v41  ;;  %v2177_v41 = vsel %vm1625_vm11, %v2118_v9, 0.0  ;;  %v2121_v36 = vmul.f32 %v5648_v43, %v5648_v43 }
 0x5d4   : > { %v2160_v32 = vadd.f32 %v2159_v11, %v2158_v63  ;;  %v2179_v63 = vsel %vm1625_vm11, %v2119_v48, 0.0  ;;  %v2181_v11 = vsel %vm1625_vm11, %v2120_v60, 0.0  ;;  %v2183_v2 = vsel %vm1625_vm11, %v2121_v36, 0.0 }
 0x5d6   : > { %v2162_v40 = vadd.f32 %v2161_v0, %v2160_v32 }
 0x5d8   : > { %v2164_v25 = vadd.f32 %v2163_v24, %v2162_v40 }
 0x5da   : > { %v2166_v14 = vadd.f32 %v2165_v8, %v2164_v25 }
 0x5dc   : > { %v2168_v52 = vadd.f32 %v2167_v16, %v2166_v14 }
 0x5de   : > { %v2170_v58 = vadd.f32 %v2169_v35, %v2168_v52 }
 0x5e0   : > { %v2172_v34 = vadd.f32 %v2171_v15, %v2170_v58 }
 0x5e2   : > { %v2174_v61 = vadd.f32 %v2173_v28, %v2172_v34 }
 0x5e4   : > { %v2176_v53 = vadd.f32 %v2175_v19, %v2174_v61 }
 0x5e6   : > { %v2178_v57 = vadd.f32 %v2177_v41, %v2176_v53 }
 0x5e8   : > { %v2180_v20 = vadd.f32 %v2179_v63, %v2178_v57 }
 0x5ea   : > { %v2182_v32 = vadd.f32 %v2181_v11, %v2180_v20 }
 0x5ec   : > { %v2184_v0 = vadd.f32 %v2183_v2, %v2182_v32 }
 0x5ee   : > { %v2185_v40 = vrot.slane %v2184_v0, 4 }
 0x5f0   : > { %v2186_v17 = vadd.f32 %v2185_v40, %v2184_v0 }
 0x5f2   : > { %v2187_v24 = vrot.slane %v2186_v17, 2 }
 0x5f4   : > { %v2188_v25 = vadd.f32 %v2187_v24, %v2186_v17 }
 0x5f6   : > { %v2189_v26 = vrot.slane %v2188_v25, 1 }
 0x5f8   : > { %v2190_v8 = vadd.f32 %v2189_v26, %v2188_v25 }
 0x5fa   : > { %v2191_v14 = vmul.f32 0.00390625, %v2190_v8 }
 0x5fc   : > { %v2192_v18 = vadd.f32 1e-05, %v2191_v14 }
 0x5fe   : > { %3408 = vrsqrt.f32 %v2192_v18 }
 0x608   : > { %v5746_v16 = vpop.eup %3408 }
 0x609   : > { %v5750_v52 = vmul.f32 %v5746_v16, %v5646_v55  ;;  %v5758_v58 = vmul.f32 %v5746_v16, %v5613_v27  ;;  %v5766_v55 = vmul.f32 %v5746_v16, %v5565_v37  ;;  %v5770_v61 = vmul.f32 %v5746_v16, %v5568_v51 }
 0x60a   : > { %v5774_v27 = vmul.f32 %v5746_v16, %v5571_v45  ;;  %v5778_v48 = vmul.f32 %v5746_v16, %v5574_v12  ;;  %v5782_v53 = vmul.f32 %v5746_v16, %v5577_v13  ;;  %v5786_v37 = vmul.f32 %v5746_v16, %v5580_v10 }
 0x60b   : > { %v5753_v54 = vmul.f32 0.70710677, %v5750_v52  ;;  %v5761_v34 = vmul.f32 0.70710677, %v5758_v58  ;;  %7261 = vst [vmem:[#allocation16_spill] sm:$0xff] %v5770_v61  ;;  %v5790_v51 = vmul.f32 %v5746_v16, %v5583_v1  ;;  %v5794_v45 = vmul.f32 %v5746_v16, %v5586_v33 }
 0x60c   : > { %7262 = vst [vmem:[#allocation59_spill] sm:$0xff] %v5774_v27  ;;  %7263 = vst [vmem:[#allocation60_spill] sm:$0xff] %v5778_v48  ;;  %v5798_v12 = vmul.f32 %v5746_v16, %v5589_v3  ;;  %v5802_v13 = vmul.f32 %v5746_v16, %v5592_v5  ;;  %v5806_v10 = vmul.f32 %v5746_v16, %v5595_v23  ;;  %v5870_v20 = vmul.f32 0.70710677, %v5770_v61 }
 0x60d   : > { %v2288_v35 = vand.u32 2147483647, %v5753_v54  ;;  %v2274_v9 = vand.u32 2147483647, %v5761_v34  ;;  %7264 = vst [vmem:[#allocation8_spill] sm:$0xff] %v5782_v53  ;;  %7265 = vst [vmem:[#allocation5_spill] sm:$0xff] %v5786_v37  ;;  %v5810_v1 = vmul.f32 %v5746_v16, %v5598_v50  ;;  %v5814_v33 = vmul.f32 %v5746_v16, %v5601_v22 }
 0x60e   : > { %7266 = vst [vmem:[#allocation7_spill] sm:$0xff] %v5790_v51  ;;  %7267 = vst [vmem:[#allocation21_spill] sm:$0xff] %v5794_v45  ;;  %v5818_v3 = vmul.f32 %v5746_v16, %v5604_v31  ;;  %v5822_v5 = vmul.f32 %v5746_v16, %v5607_v56  ;;  %v5826_v23 = vmul.f32 %v5746_v16, %v5610_v44  ;;  %v5845_v44 = vmul.f32 0.70710677, %v5766_v55 }
 0x60f   : > { %v2320_v47 = vmul.f32 0.3275911, %v2288_v35  ;;  %v2768_v28 = vsub.f32 0.0, %v2288_v35  ;;  %v2306_v19 = vmul.f32 0.3275911, %v2274_v9  ;;  %7268 = vst [vmem:[#allocation56_spill] sm:$0xff] %v5798_v12  ;;  %v5830_v50 = vmul.f32 %v5746_v16, %v5616_v6 }
 0x610   : > { %7269 = vst [vmem:[#allocation23_spill] sm:$0xff] %v5802_v13  ;;  %7270 = vst [vmem:[#allocation99_spill] sm:$0xff] %v5806_v10  ;;  %v5834_v22 = vmul.f32 %v5746_v16, %v5619_v46  ;;  %v5838_v31 = vmul.f32 %v5746_v16, %v5622_v4  ;;  %v5842_v56 = vmul.f32 %v5746_v16, %v5625_v49  ;;  %v2754_v4 = vsub.f32 0.0, %v2274_v9 }
 0x611   : > { %v2352_v15 = vadd.f32 1.0, %v2320_v47  ;;  %v2338_v60 = vadd.f32 1.0, %v2306_v19  ;;  %v2800_v41 = vmul.f32 %v2768_v28, %v2288_v35  ;;  %7271 = vst [vmem:[#allocation71_spill] sm:$0xff] %v5810_v1  ;;  %7272 = vst [vmem:[#allocation96_spill] sm:$0xff] %v5814_v33  ;;  %v5849_v6 = vmul.f32 %v5746_v16, %v5628_v42 }
 0x612   : > { %7273 = vst [vmem:[#allocation62_spill] sm:$0xff] %v5818_v3  ;;  %7274 = vst [vmem:[#allocation19_spill] sm:$0xff] %v5822_v5  ;;  %v5853_v57 = vmul.f32 %v5746_v16, %v5630_v21  ;;  %v5857_v46 = vmul.f32 %v5746_v16, %v5632_v59  ;;  %v5863_v63 = vmul.f32 %v5746_v16, %v5634_v29  ;;  %v5878_v11 = vmul.f32 0.70710677, %v5774_v27 }
 0x613   : > { %3410 = vrcp.f32 %v2352_v15  ;;  %7275 = vst [vmem:[#allocation17_spill] sm:$0xff] %v5826_v23  ;;  %7276 = vst [vmem:[#allocation102_spill] sm:$0xff] %v5830_v50  ;;  %v2862_v49 = vmul.f32 1.442695, %v2800_v41  ;;  %v5867_v42 = vmul.f32 %v5746_v16, %v5636_v7  ;;  %v5875_v59 = vmul.f32 %v5746_v16, %v5638_v39 }
 0x614   : > { %3412 = vrcp.f32 %v2338_v60  ;;  %7277 = vst [vmem:[#allocation81_spill] sm:$0xff] %v5834_v22  ;;  %7278 = vst [vmem:[#allocation22_spill] sm:$0xff] %v5838_v31  ;;  %v5881_v32 = vmul.f32 0.70710677, %v5778_v48  ;;  %v5885_v29 = vmul.f32 %v5746_v16, %v5640_v62  ;;  %v5888_v7 = vmul.f32 0.70710677, %v5782_v53 }
 0x615   : > { %7279 = vst [vmem:[#allocation70_spill] sm:$0xff] %v5842_v56  ;;  %7280 = vst [vmem:[#allocation25_spill] sm:$0xff] %v5849_v6  ;;  %v5891_v2 = vmul.f32 0.70710677, %v5786_v37  ;;  %v2258_v0 = vand.u32 2147483647, %v5845_v44  ;;  %v2786_v40 = vmul.f32 %v2754_v4, %v2274_v9  ;;  %v5902_v62 = vmul.f32 %v5746_v16, %v5642_v38 }
 0x616   : > { %7281 = vst [vmem:[#allocation27_spill] sm:$0xff] %v5853_v57  ;;  %7282 = vst [vmem:[#allocation30_spill] sm:$0xff] %v5857_v46  ;;  %v5895_v17 = vmul.f32 0.70710677, %v5790_v51  ;;  %v5898_v24 = vmul.f32 0.70710677, %v5794_v45  ;;  %v5922_v38 = vmul.f32 %v5746_v16, %v5644_v30  ;;  %v5934_v41 = vmul.f32 %v5746_v16, %v5648_v43 }
 0x617   : > { %7283 = vst [vmem:[#allocation29_spill] sm:$0xff] %v5863_v63  ;;  %7284 = vst [vmem:[#allocation42_spill] sm:$0xff] %v5867_v42  ;;  %v5905_v25 = vmul.f32 0.70710677, %v5798_v12  ;;  %v5908_v26 = vmul.f32 0.70710677, %v5802_v13 }
 0x618   : > { %7285 = vst [vmem:[#allocation48_spill] sm:$0xff] %v5870_v20  ;;  %7286 = vst [vmem:[#allocation35_spill] sm:$0xff] %v5875_v59  ;;  %v2290_v8 = vmul.f32 0.3275911, %v2258_v0  ;;  %v5912_v18 = vmul.f32 0.70710677, %v5806_v10 }
 0x619   : > { %7287 = vst [vmem:[#allocation10_spill] sm:$0xff] %v5878_v11  ;;  %7288 = vst [vmem:[#allocation26_spill] sm:$0xff] %v5881_v32  ;;  %v5915_v35 = vmul.f32 0.70710677, %v5810_v1  ;;  %v5918_v47 = vmul.f32 0.70710677, %v5814_v33 }
 0x61a   : > { %7289 = vst [vmem:[#allocation46_spill] sm:$0xff] %v5885_v29  ;;  %7290 = vst [vmem:[#allocation32_spill] sm:$0xff] %v5888_v7  ;;  %v5925_v15 = vmul.f32 0.70710677, %v5818_v3  ;;  %v5928_v9 = vmul.f32 0.70710677, %v5822_v5 }
 0x61b   : > { %7291 = vst [vmem:[#allocation33_spill] sm:$0xff] %v5891_v2  ;;  %7292 = vst [vmem:[#allocation9_spill] sm:$0xff] %v5895_v17  ;;  %v2322_v28 = vadd.f32 1.0, %v2290_v8  ;;  %v2834_v4 = vmul.f32 1.442695, %v2786_v40  ;;  %v2738_v3 = vsub.f32 0.0, %v2258_v0 }
 0x61c   : > { %7293 = vst [vmem:[#allocation37_spill] sm:$0xff] %v5898_v24  ;;  %7294 = vst [vmem:[#allocation36_spill] sm:$0xff] %v5902_v62  ;;  %v5944_v5 = vmul.f32 0.70710677, %v5834_v22  ;;  %v5951_v43 = vmul.f32 0.70710677, %v5842_v56 }
 0x61d   : > { %v5859_v36 = vpop.eup %3410  ;;  %7295 = vst [vmem:[#allocation39_spill] sm:$0xff] %v5905_v25  ;;  %7296 = vst [vmem:[#allocation52_spill] sm:$0xff] %v5908_v26  ;;  %3414 = vrcp.f32 %v2322_v28  ;;  %v5954_v16 = vmul.f32 0.70710677, %v5849_v6  ;;  %v5960_v28 = vmul.f32 0.70710677, %v5857_v46 }
 0x61e   : > { %v2448_v21 = vmul.f32 1.0614054, %v5859_v36  ;;  %7297 = vst [vmem:[#allocation84_spill] sm:$0xff] %v5912_v18  ;;  %7298 = vst [vmem:[#allocation47_spill] sm:$0xff] %v5915_v35  ;;  %v5930_v19 = vpop.eup %3412  ;;  %3416 = vpow2.f32 %v2862_v49  ;;  %v5967_v10 = vmul.f32 0.70710677, %v5867_v42  ;;  %v2770_v42 = vmul.f32 %v2738_v3, %v2258_v0 }
 0x61f   : > { %7299 = vst [vmem:[#allocation11_spill] sm:$0xff] %v5918_v47  ;;  %7300 = vst [vmem:[#allocation57_spill] sm:$0xff] %v5922_v38  ;;  %v2434_v30 = vmul.f32 1.0614054, %v5930_v19  ;;  %v5970_v13 = vmul.f32 0.70710677, %v5875_v59  ;;  %3418 = vpow2.f32 %v2834_v4 }
 0x620   : > { %v2480_v39 = vadd.f32 -1.4531521, %v2448_v21  ;;  %7301 = vst [vmem:[#allocation50_spill] sm:$0xff] %v5925_v15  ;;  %7302 = vst [vmem:[#allocation75_spill] sm:$0xff] %v5928_v9  ;;  %v5937_v21 = vmul.f32 0.70710677, %v5826_v23 }
 0x621   : > { %7303 = vst [vmem:[#allocation28_spill] sm:$0xff] %v5934_v41  ;;  %7305 = vst [vmem:[#allocation51_spill] sm:$0xff] %v5944_v5  ;;  %v2466_v40 = vadd.f32 -1.4531521, %v2434_v30  ;;  %v5957_v23 = vmul.f32 0.70710677, %v5853_v57 }
 0x622   : > { %v2512_v14 = vmul.f32 %v5859_v36, %v2480_v39  ;;  %7304 = vst [vmem:[#allocation38_spill] sm:$0xff] %v5937_v21  ;;  %v5941_v39 = vmul.f32 0.70710677, %v5830_v50  ;;  %7307 = vst [vmem:[#allocation44_spill] sm:$0xff] %v5951_v43  ;;  %v5973_v30 = vmul.f32 0.70710677, %v5885_v29 }
 0x623   : > { %7308 = vst [vmem:[#allocation43_spill] sm:$0xff] %v5954_v16  ;;  %7309 = vst [vmem:[#allocation12_spill] sm:$0xff] %v5957_v23  ;;  %v2498_v1 = vmul.f32 %v5930_v19, %v2466_v40  ;;  %v5977_v49 = vmul.f32 0.70710677, %v5902_v62  ;;  %v5980_v12 = vmul.f32 0.70710677, %v5922_v38 }
 0x624   : > { %v2544_v60 = vadd.f32 1.4214138, %v2512_v14  ;;  %v5948_v14 = vmul.f32 0.70710677, %v5838_v31  ;;  %7310 = vst [vmem:[#allocation55_spill] sm:$0xff] %v5960_v28  ;;  %7312 = vst [vmem:[#allocation49_spill] sm:$0xff] %v5967_v10 }
 0x625   : > { %7313 = vst [vmem:[#allocation77_spill] sm:$0xff] %v5970_v13  ;;  %7314 = vst [vmem:[#allocation54_spill] sm:$0xff] %v5973_v30  ;;  %v5983_v45 = vmul.f32 0.70710677, %v5934_v41  ;;  %v2530_v40 = vadd.f32 1.4214138, %v2498_v1 }
 0x626   : > { %v2576_v8 = vmul.f32 %v5859_v36, %v2544_v60  ;;  %7306 = vst [vmem:[#allocation73_spill] sm:$0xff] %v5948_v14  ;;  %v5963_v60 = vmul.f32 0.70710677, %v5863_v63  ;;  %7315 = vst [vmem:[#allocation41_spill] sm:$0xff] %v5977_v49  ;;  %v5986_v51 = vand.u32 2147483647, %v5870_v20 }
 0x627   : > { %7316 = vst [vmem:[#allocation45_spill] sm:$0xff] %v5980_v12  ;;  %7317 = vst [vmem:[#allocation82_spill] sm:$0xff] %v5983_v45  ;;  %v5989_v59 = vand.u32 2147483647, %v5878_v11  ;;  %v5995_v62 = vand.u32 2147483647, %v5888_v7  ;;  %v2562_v38 = vmul.f32 %v5930_v19, %v2530_v40  ;;  %v6015_v40 = vpop.eup %3414 }
 0x628   : > { %v2608_v33 = vadd.f32 -0.28449672, %v2576_v8  ;;  %7311 = vst [vmem:[#allocation34_spill] sm:$0xff] %v5963_v60  ;;  %v5999_v41 = vand.u32 2147483647, %v5891_v2  ;;  %vm2928_vm13 = vcmp.ge.f32.partialorder %v5753_v54, 0.0 }
 0x629   : > { %v6002_v1 = vand.u32 2147483647, %v5895_v17  ;;  %v6005_v3 = vand.u32 2147483647, %v5898_v24  ;;  %v6009_v4 = vand.u32 2147483647, %v5905_v25 }
 0x62a   : > { %v2640_v8 = vmul.f32 %v5859_v36, %v2608_v33  ;;  %v5992_v33 = vand.u32 2147483647, %v5881_v32  ;;  %v2275_v63 = vand.u32 2147483647, %v5941_v39  ;;  %v2594_v46 = vadd.f32 -0.28449672, %v2562_v38 }
 0x62b   : > { %v2802_v37 = vmul.f32 1.442695, %v2770_v42  ;;  %v6018_v17 = vand.u32 2147483647, %v5912_v18  ;;  %v2418_v24 = vmul.f32 1.0614054, %v6015_v40  ;;  %v3417_v42 = vpop.eup %3416 }
 0x62c   : > { %v2672_v29 = vadd.f32 0.2548296, %v2640_v8  ;;  %v6012_v8 = vand.u32 2147483647, %v5908_v26  ;;  %v6026_v26 = vand.u32 2147483647, %v5918_v47  ;;  %v3419_v31 = vpop.eup %3418 }
 0x62d   : > { %v6029_v25 = vand.u32 2147483647, %v5925_v15  ;;  %v6032_v38 = vand.u32 2147483647, %v5928_v9  ;;  %v2450_v18 = vadd.f32 -1.4531521, %v2418_v24 }
 0x62e   : > { %v2704_v0 = vmul.f32 %v5859_v36, %v2672_v29  ;;  %v6022_v36 = vand.u32 2147483647, %v5915_v35  ;;  %v2626_v29 = vmul.f32 %v5930_v19, %v2594_v46  ;;  %v2307_v6 = vmul.f32 0.3275911, %v2275_v63 }
 0x62f   : > { %v6039_v46 = vand.u32 2147483647, %v5944_v5  ;;  %v6042_v47 = vand.u32 2147483647, %v5948_v14  ;;  %vm2914_vm14 = vcmp.ge.f32.partialorder %v5761_v34, 0.0  ;;  %v2482_v9 = vmul.f32 %v6015_v40, %v2450_v18 }
 0x630   : > { %v2736_v57 = vmul.f32 0.5, %v2704_v0  ;;  %v6035_v0 = vand.u32 2147483647, %v5937_v21  ;;  %v2658_v35 = vadd.f32 0.2548296, %v2626_v29  ;;  %v2339_v2 = vadd.f32 1.0, %v2307_v6 }
 0x631   : > { %v2755_v24 = vsub.f32 0.0, %v2275_v63  ;;  %v6048_v56 = vand.u32 2147483647, %v5951_v43  ;;  %v6051_v29 = vand.u32 2147483647, %v5954_v16  ;;  %vm2898_vm15 = vcmp.ge.f32.partialorder %v5845_v44, 0.0 }
 0x632   : > { %v2896_v15 = vmul.f32 %v3417_v42, %v2736_v57  ;;  %v2690_v21 = vmul.f32 %v5930_v19, %v2658_v35  ;;  %v6054_v53 = vand.u32 2147483647, %v5957_v23  ;;  %v2514_v7 = vadd.f32 1.4214138, %v2482_v9 }
 0x633   : > { %v6057_v57 = vand.u32 2147483647, %v5960_v28  ;;  %v6060_v18 = vand.u32 2147483647, %v5963_v60  ;;  %3420 = vrcp.f32 %v2339_v2  ;;  %v6063_v35 = vand.u32 2147483647, %v5967_v10 }
 0x634   : > { %v2722_v6 = vmul.f32 0.5, %v2690_v21  ;;  %3422 = vpow2.f32 %v2802_v37  ;;  %v6066_v19 = vand.u32 2147483647, %v5970_v13  ;;  %v2960_v42 = vsub.f32 1.0, %v2896_v15 }
 0x635   : > { %v2546_v23 = vmul.f32 %v6015_v40, %v2514_v7  ;;  %v6070_v9 = vand.u32 2147483647, %v5973_v30  ;;  %v2787_v28 = vmul.f32 %v2755_v24, %v2275_v63  ;;  %v6073_v60 = vand.u32 2147483647, %v5977_v49 }
 0x636   : > { %v2882_v16 = vmul.f32 %v3419_v31, %v2722_v6  ;;  %v6076_v2 = vand.u32 2147483647, %v5980_v12  ;;  %v6079_v37 = vand.u32 2147483647, %v5983_v45  ;;  %v6082_v13 = vmul.f32 0.3275911, %v5986_v51 }
 0x637   : > { %v2578_v21 = vadd.f32 -0.28449672, %v2546_v23  ;;  %v6085_v7 = vmul.f32 0.3275911, %v5989_v59  ;;  %v6088_v63 = vmul.f32 0.3275911, %v5992_v33  ;;  %v2992_v6 = vsel %vm2928_vm13, %v2960_v42, %v2896_v15 }
 0x638   : > { %v2946_v30 = vsub.f32 1.0, %v2882_v16  ;;  %v6091_v31 = vmul.f32 0.3275911, %v5995_v62  ;;  %v2739_v24 = vsub.f32 0.0, %v5986_v51  ;;  %v2836_v45 = vmul.f32 1.442695, %v2787_v28 }
 0x639   : > { %v2610_v23 = vmul.f32 %v6015_v40, %v2578_v21  ;;  %v6098_v12 = vmul.f32 0.3275911, %v5999_v41  ;;  %v6103_v10 = vmul.f32 0.3275911, %v6002_v1  ;;  %v6106_v43 = vmul.f32 0.3275911, %v6005_v3 }
 0x63a   : > { %v2978_v49 = vsel %vm2914_vm14, %v2946_v30, %v2882_v16  ;;  %v6109_v48 = vmul.f32 0.3275911, %v6009_v4  ;;  %v6113_v28 = vmul.f32 0.3275911, %v6012_v8  ;;  %v6116_v42 = vmul.f32 0.3275911, %v6018_v17 }
 0x63b   : > { %v3010_v54 = vmul.f32 %v2978_v49, %v5758_v58  ;;  %v2642_v15 = vadd.f32 0.2548296, %v2610_v23  ;;  %v6120_v34 = vmul.f32 0.3275911, %v6022_v36  ;;  %v6123_v16 = vmul.f32 0.3275911, %v6026_v26 }
 0x63c   : > { %v6126_v30 = vmul.f32 0.3275911, %v6029_v25  ;;  %v6132_v49 = vmul.f32 0.3275911, %v6032_v38  ;;  %v6135_v23 = vmul.f32 0.3275911, %v6035_v0  ;;  %v6139_v32 = vmul.f32 %v2992_v6, %v5750_v52 }
 0x63d   : > { %v6128_v21 = vpop.eup %3420  ;;  %3058 = vxpose.xlu1.b32.start [1/16] (narrow) %v3010_v54, 32  ;;  %v2674_v58 = vmul.f32 %v6015_v40, %v2642_v15  ;;  %v2740_v14 = vsub.f32 0.0, %v5989_v59  ;;  %v6143_v11 = vmul.f32 0.3275911, %v6039_v46  ;;  %v6146_v54 = vmul.f32 0.3275911, %v6042_v47 }
 0x63e   : > { %v3423_v27 = vpop.eup %3422  ;;  %7318 = vst [vmem:[#allocation92_spill] sm:$0xff] %v6139_v32  ;;  %v2435_v22 = vmul.f32 1.0614054, %v6128_v21  ;;  %3424 = vpow2.f32 %v2836_v45  ;;  %v6149_v15 = vmul.f32 0.3275911, %v6048_v56  ;;  %v2771_v32 = vmul.f32 %v2739_v24, %v5986_v51 }
 0x63f   : > { %v2706_v40 = vmul.f32 0.5, %v2674_v58  ;;  %v6152_v5 = vmul.f32 0.3275911, %v6051_v29  ;;  %v6155_v52 = vmul.f32 0.3275911, %v6054_v53  ;;  %v6178_v51 = vmul.f32 %v2740_v14, %v5989_v59 }
 0x640   : > { %v2467_v61 = vadd.f32 -1.4531521, %v2435_v22  ;;  %v6158_v6 = vmul.f32 0.3275911, %v6057_v57  ;;  %v6162_v50 = vmul.f32 0.3275911, %v6060_v18 }
 0x641   : > { %7319 = vst [vmem:[#allocation72_spill] sm:$0xff] %v6152_v5  ;;  %7320 = vst [vmem:[#allocation79_spill] sm:$0xff] %v6155_v52  ;;  %v2866_v20 = vmul.f32 %v3423_v27, %v2706_v40  ;;  %v6165_v45 = vmul.f32 0.3275911, %v6063_v35  ;;  %v6168_v58 = vmul.f32 0.3275911, %v6066_v19 }
 0x642   : > { %7321 = vst [vmem:[#allocation90_spill] sm:$0xff] %v6162_v50  ;;  %v2499_v22 = vmul.f32 %v6128_v21, %v2467_v61  ;;  %v6172_v5 = vmul.f32 0.3275911, %v6070_v9  ;;  %v6175_v52 = vmul.f32 0.3275911, %v6073_v60  ;;  %7325 = vst [vmem:[#allocation89_spill] sm:$0xff] %v6178_v51 }
 0x643   : > { %7322 = vst [vmem:[#allocation74_spill] sm:$0xff] %v6165_v45  ;;  %7323 = vst [vmem:[#allocation63_spill] sm:$0xff] %v6168_v58  ;;  %v2930_v27 = vsub.f32 1.0, %v2866_v20  ;;  %v6181_v24 = vmul.f32 0.3275911, %v6076_v2  ;;  %v2323_v61 = vadd.f32 1.0, %v6082_v13 }
 0x644   : > { %7324 = vst [vmem:[#allocation24_spill] sm:$0xff] %v6172_v5  ;;  %v6184_v40 = vmul.f32 0.3275911, %v6079_v37  ;;  %v2531_v45 = vadd.f32 1.4214138, %v2499_v22  ;;  %vm2915_vm0 = vcmp.ge.f32.partialorder %v5941_v39, 0.0 }
 0x645   : > { %7326 = vst [vmem:[#allocation53_spill] sm:$0xff] %v6181_v24  ;;  %v2962_v59 = vsel %vm2898_vm15, %v2930_v27, %v2866_v20  ;;  %3426 = vrcp.f32 %v2323_v61  ;;  %v2804_v22 = vmul.f32 1.442695, %v2771_v32  ;;  %v6222_v24 = vadd.f32 1.0, %v6091_v31 }
 0x646   : > { %7327 = vst [vmem:[#allocation76_spill] sm:$0xff] %v6184_v40  ;;  %v2994_v40 = vmul.f32 %v2962_v59, %v5766_v55  ;;  %v2563_v58 = vmul.f32 %v6128_v21, %v2531_v45  ;;  %v6225_v61 = vadd.f32 1.0, %v6098_v12  ;;  %v6232_v32 = vadd.f32 1.0, %v6106_v43 }
 0x647   : > { %3428 = vpow2.f32 %v2804_v22  ;;  %v6238_v22 = vadd.f32 1.0, %v6113_v28  ;;  %v6244_v12 = vadd.f32 1.0, %v6120_v34  ;;  %v6247_v31 = vadd.f32 1.0, %v6123_v16 }
 0x648   : > { %3026 = vxpose.xlu0.b32.start [1/16] (narrow) %v2994_v40, 32  ;;  %v2595_v27 = vadd.f32 -0.28449672, %v2563_v58  ;;  %v3425_v45 = vpop.eup %3424  ;;  %v2325_v58 = vadd.f32 1.0, %v6088_v63  ;;  %v6241_v63 = vadd.f32 1.0, %v6116_v42  ;;  %v6253_v43 = vadd.f32 1.0, %v6132_v49 }
 0x649   : > { %v2340_v28 = vadd.f32 1.0, %v6143_v11  ;;  %v6260_v42 = vadd.f32 1.0, %v6146_v54  ;;  %v6263_v34 = vadd.f32 1.0, %v6149_v15  ;;  %v7331_v16 = vld [vmem:[#allocation72_spill] sm:$0xff]  ;;  %v7332_v5 = vld [vmem:[#allocation79_spill] sm:$0xff]  ;;  %v7333_v20 = vld [vmem:[#allocation90_spill] sm:$0xff] }
 0x64a   : > { %v2627_v50 = vmul.f32 %v6128_v21, %v2595_v27  ;;  %v2324_v27 = vadd.f32 1.0, %v6085_v7  ;;  %v6235_v7 = vadd.f32 1.0, %v6109_v48  ;;  %7329 = vst [vmem:[#allocation66_spill] sm:$0xff] %v6253_v43  ;;  %v6256_v48 = vadd.f32 1.0, %v6135_v23  ;;  %v7334_v40 = vld [vmem:[#allocation74_spill] sm:$0xff]  ;;  %v7335_v44 = vld [vmem:[#allocation63_spill] sm:$0xff] }
 0x64b   : > { %v6271_v49 = vadd.f32 1.0, %v7332_v5  ;;  %v6274_v23 = vadd.f32 1.0, %v6158_v6  ;;  %v6277_v11 = vadd.f32 1.0, %v7333_v20  ;;  %v6281_v15 = vadd.f32 1.0, %v7334_v40  ;;  %v7336_v55 = vld [vmem:[#allocation24_spill] sm:$0xff] }
 0x64c   : > { %v2659_v13 = vadd.f32 0.2548296, %v2627_v50  ;;  %v6229_v50 = vadd.f32 1.0, %v6103_v10  ;;  %7330 = vst [vmem:[#allocation13_spill] sm:$0xff] %v6256_v48  ;;  %v6287_v51 = vadd.f32 1.0, %v7336_v55  ;;  %v6290_v5 = vadd.f32 1.0, %v6175_v52 }
 0x64d   : > { %v7338_v6 = vld [vmem:[#allocation53_spill] sm:$0xff]  ;;  %v7340_v20 = vld [vmem:[#allocation76_spill] sm:$0xff]  ;;  %v7342_v40 = vsub.f32 0.0, %v5992_v33  ;;  %v7349_v39 = vsub.f32 0.0, %v6012_v8  ;;  %3430 = vrcp.f32 %v2340_v28  ;;  %v7358_v28 = vsub.f32 0.0, %v6048_v56 }
 0x64e   : > { %v2691_v59 = vmul.f32 %v6128_v21, %v2659_v13  ;;  %v6250_v21 = vadd.f32 1.0, %v6126_v30  ;;  %v6266_v13 = vadd.f32 1.0, %v7331_v16  ;;  %v6284_v16 = vadd.f32 1.0, %v7335_v44  ;;  %7337 = vst [vmem:[#allocation64_spill] sm:$0xff] %v6290_v5 }
 0x64f   : > { %v6296_v14 = vadd.f32 1.0, %v7340_v20  ;;  %v2773_v43 = vmul.f32 %v7342_v40, %v5992_v33  ;;  %v7343_v44 = vsub.f32 0.0, %v5995_v62  ;;  %v7345_v20 = vsub.f32 0.0, %v6002_v1 }
 0x650   : > { %v2723_v10 = vmul.f32 0.5, %v2691_v59  ;;  %7328 = vst [vmem:[#allocation91_spill] sm:$0xff] %v6250_v21  ;;  %v6268_v59 = vpop.eup %3426  ;;  %v7344_v21 = vsub.f32 0.0, %v5999_v41  ;;  %v7347_v33 = vsub.f32 0.0, %v6009_v4  ;;  %3432 = vrcp.f32 %v2324_v27 }
 0x651   : > { %v2419_v54 = vmul.f32 1.0614054, %v6268_v59  ;;  %7341 = vst [vmem:[#allocation6_spill] sm:$0xff] %v6296_v14  ;;  %v2774_v55 = vmul.f32 %v7343_v44, %v5995_v62  ;;  %v2776_v14 = vmul.f32 %v7345_v20, %v6002_v1  ;;  %v6318_v62 = vpop.eup %3428  ;;  %v7348_v44 = vld [vmem:[#allocation102_spill] sm:$0xff]  ;;  %v7350_v1 = vsub.f32 0.0, %v6018_v17 }
 0x652   : > { %v2883_v30 = vmul.f32 %v3425_v45, %v2723_v10  ;;  %v6293_v10 = vadd.f32 1.0, %v7338_v6  ;;  %v2775_v52 = vmul.f32 %v7344_v21, %v5999_v41  ;;  %v2778_v40 = vmul.f32 %v7347_v33, %v6009_v4 }
 0x653   : > { %v2451_v48 = vadd.f32 -1.4531521, %v2419_v54  ;;  %v7346_v54 = vsub.f32 0.0, %v6005_v3  ;;  %v2779_v21 = vmul.f32 %v7349_v39, %v6012_v8  ;;  %v7352_v4 = vsub.f32 0.0, %v6026_v26 }
 0x654   : > { %v2947_v45 = vsub.f32 1.0, %v2883_v30  ;;  %7339 = vst [vmem:[#allocation95_spill] sm:$0xff] %v6293_v10  ;;  %v7354_v8 = vsub.f32 0.0, %v6029_v25  ;;  %v7357_v39 = vsub.f32 0.0, %v6042_v47  ;;  %3434 = vrcp.f32 %v2325_v58 }
 0x655   : > { %v2777_v10 = vmul.f32 %v7346_v54, %v6005_v3  ;;  %v2483_v41 = vmul.f32 %v6268_v59, %v2451_v48  ;;  %v7351_v3 = vsub.f32 0.0, %v6022_v36  ;;  %v2782_v20 = vmul.f32 %v7352_v4, %v6026_v26 }
 0x656   : > { %v2979_v6 = vsel %vm2915_vm0, %v2947_v45, %v2883_v30  ;;  %v2780_v30 = vmul.f32 %v7350_v1, %v6018_v17  ;;  %v2783_v33 = vmul.f32 %v7354_v8, %v6029_v25  ;;  %v7355_v17 = vsub.f32 0.0, %v6032_v38 }
 0x657   : > { %v3011_v5 = vmul.f32 %v2979_v6, %v7348_v44  ;;  %v2781_v45 = vmul.f32 %v7351_v3, %v6022_v36  ;;  %v7353_v6 = vsub.f32 0.0, %v6039_v46  ;;  %v2515_v54 = vadd.f32 1.4214138, %v2483_v41 }
 0x658   : > { %v2784_v44 = vmul.f32 %v7355_v17, %v6032_v38  ;;  %v7356_v36 = vsub.f32 0.0, %v6035_v0  ;;  %v7359_v25 = vsub.f32 0.0, %v6051_v29  ;;  %v7360_v38 = vsub.f32 0.0, %v6054_v53 }
 0x659   : > { %v2788_v48 = vmul.f32 %v7353_v6, %v6039_v46  ;;  %3059 = vxpose.xlu1.b32.cont [2/16] (narrow) %v3011_v5, 32  ;;  %v2789_v46 = vmul.f32 %v7357_v39, %v6042_v47  ;;  %v2790_v5 = vmul.f32 %v7358_v28, %v6048_v56  ;;  %v2547_v1 = vmul.f32 %v6268_v59, %v2515_v54 }
 0x65a   : > { %v2785_v26 = vmul.f32 %v7356_v36, %v6035_v0  ;;  %v2791_v41 = vmul.f32 %v7359_v25, %v6051_v29  ;;  %v6359_v27 = vmul.f32 %v7360_v38, %v6054_v53  ;;  %v7361_v0 = vsub.f32 0.0, %v6057_v57  ;;  %v7369_v36 = vld [vmem:[#allocation89_spill] sm:$0xff] }
 0x65b   : > { %v7362_v56 = vsub.f32 0.0, %v6060_v18  ;;  %v7363_v29 = vsub.f32 0.0, %v6063_v35  ;;  %v2838_v6 = vmul.f32 1.442695, %v2788_v48  ;;  %3436 = vrcp.f32 %v6222_v24 }
 0x65c   : > { %v6364_v3 = vmul.f32 %v7361_v0, %v6057_v57  ;;  %v2579_v53 = vadd.f32 -0.28449672, %v2547_v1  ;;  %v7364_v54 = vsub.f32 0.0, %v6066_v19  ;;  %v7365_v58 = vsub.f32 0.0, %v6070_v9 }
 0x65d   : > { %v6369_v47 = vmul.f32 %v7362_v56, %v6060_v18  ;;  %v6374_v4 = vmul.f32 %v7363_v29, %v6063_v35  ;;  %3438 = vrcp.f32 %v6225_v61  ;;  %v7366_v18 = vsub.f32 0.0, %v6073_v60 }
 0x65e   : > { %v6380_v57 = vmul.f32 %v7364_v54, %v6066_v19  ;;  %v6385_v8 = vmul.f32 %v7365_v58, %v6070_v9  ;;  %v7367_v24 = vsub.f32 0.0, %v6076_v2  ;;  %v7368_v19 = vsub.f32 0.0, %v6079_v37 }
 0x65f   : > { %v6391_v35 = vmul.f32 %v7366_v18, %v6073_v60  ;;  %v6404_v9 = vmul.f32 1.442695, %v7369_v36  ;;  %v2611_v61 = vmul.f32 %v6268_v59, %v2579_v53  ;;  %v6407_v39 = vmul.f32 1.442695, %v2773_v43  ;;  %v6424_v43 = vpop.eup %3430 }
 0x660   : > { %v6396_v48 = vmul.f32 %v7367_v24, %v6076_v2  ;;  %v6401_v17 = vmul.f32 %v7368_v19, %v6079_v37  ;;  %v6409_v28 = vmul.f32 1.442695, %v2774_v55  ;;  %v6411_v60 = vmul.f32 1.442695, %v2775_v52  ;;  %v7374_v55 = vld [vmem:[#allocation48_spill] sm:$0xff] }
 0x661   : > { %3440 = vpow2.f32 %v2838_v6  ;;  %v6413_v25 = vmul.f32 1.442695, %v2776_v14  ;;  %v6415_v2 = vmul.f32 1.442695, %v2777_v10  ;;  %v6417_v1 = vmul.f32 1.442695, %v2778_v40  ;;  %v6434_v40 = vpop.eup %3432 }
 0x662   : > { %v2643_v37 = vadd.f32 0.2548296, %v2611_v61  ;;  %3442 = vrcp.f32 %v6229_v50  ;;  %v6420_v38 = vmul.f32 1.442695, %v2779_v21  ;;  %v6422_v0 = vmul.f32 1.442695, %v2780_v30 }
 0x663   : > { %7370 = vst [vmem:[#allocation61_spill] sm:$0xff] %v6415_v2  ;;  %7371 = vst [vmem:[#allocation94_spill] sm:$0xff] %v6417_v1  ;;  %vm2899_vm1 = vcmp.ge.f32.partialorder %v7374_v55, 0.0  ;;  %3444 = vrcp.f32 %v6232_v32  ;;  %v6428_v52 = vmul.f32 1.442695, %v2781_v45 }
 0x664   : > { %7372 = vst [vmem:[#allocation97_spill] sm:$0xff] %v6420_v38  ;;  %7373 = vst [vmem:[#allocation93_spill] sm:$0xff] %v6422_v0  ;;  %v6430_v14 = vmul.f32 1.442695, %v2782_v20  ;;  %v6432_v10 = vmul.f32 1.442695, %v2783_v33  ;;  %v2675_v50 = vmul.f32 %v6268_v59, %v2643_v37  ;;  %3446 = vrcp.f32 %v6235_v7  ;;  %v6447_v20 = vpop.eup %3434 }
 0x665   : > { %7375 = vst [vmem:[#allocation18_spill] sm:$0xff] %v6428_v52  ;;  %v2436_v21 = vmul.f32 1.0614054, %v6424_v43  ;;  %v6439_v30 = vmul.f32 1.442695, %v2784_v44  ;;  %3448 = vrcp.f32 %v6238_v22  ;;  %v6452_v6 = vpop.eup %3436 }
 0x666   : > { %7376 = vst [vmem:[#allocation68_spill] sm:$0xff] %v6430_v14  ;;  %7377 = vst [vmem:[#allocation98_spill] sm:$0xff] %v6432_v10  ;;  %v6442_v56 = vmul.f32 1.442695, %v2785_v26  ;;  %v6444_v32 = vmul.f32 1.442695, %v2789_v46  ;;  %3450 = vrcp.f32 %v6241_v63 }
 0x667   : > { %7378 = vst [vmem:[#allocation83_spill] sm:$0xff] %v6439_v30  ;;  %v2420_v45 = vmul.f32 1.0614054, %v6434_v40  ;;  %v2707_v33 = vmul.f32 0.5, %v2675_v50  ;;  %v2468_v29 = vadd.f32 -1.4531521, %v2436_v21  ;;  %3452 = vrcp.f32 %v6244_v12  ;;  %v6458_v26 = vpop.eup %3438 }
 0x668   : > { %7379 = vst [vmem:[#allocation78_spill] sm:$0xff] %v6442_v56  ;;  %v6450_v59 = vmul.f32 1.442695, %v2790_v5  ;;  %v6455_v7 = vmul.f32 1.442695, %v2791_v41  ;;  %3454 = vrcp.f32 %v6247_v31  ;;  %v7381_v50 = vld [vmem:[#allocation16_spill] sm:$0xff] }
 0x669   : > { %v2452_v22 = vadd.f32 -1.4531521, %v2420_v45  ;;  %v2421_v44 = vmul.f32 1.0614054, %v6447_v20  ;;  %v2867_v46 = vmul.f32 %v6318_v62, %v2707_v33  ;;  %v2500_v53 = vmul.f32 %v6424_v43, %v2468_v29  ;;  %v7395_v10 = vld [vmem:[#allocation26_spill] sm:$0xff] }
 0x66a   : > { %v2422_v63 = vmul.f32 1.0614054, %v6452_v6  ;;  %3456 = vrcp.f32 %v6260_v42  ;;  %v2423_v41 = vmul.f32 1.0614054, %v6458_v26  ;;  %v6488_v55 = vmul.f32 1.442695, %v6359_v27 }
 0x66b   : > { %v2484_v5 = vmul.f32 %v6434_v40, %v2452_v22  ;;  %v2453_v12 = vadd.f32 -1.4531521, %v2421_v44  ;;  %v2931_v54 = vsub.f32 1.0, %v2867_v46  ;;  %v2532_v58 = vadd.f32 1.4214138, %v2500_v53  ;;  %v6468_v24 = vpop.eup %3440 }
 0x66c   : > { %3458 = vrcp.f32 %v6263_v34  ;;  %v2454_v18 = vadd.f32 -1.4531521, %v2422_v63  ;;  %v2455_v19 = vadd.f32 -1.4531521, %v2423_v41  ;;  %v6472_v36 = vpop.eup %3442  ;;  %v6505_v27 = vmul.f32 1.442695, %v6374_v4 }
 0x66d   : > { %3460 = vrcp.f32 %v6266_v13  ;;  %v2516_v62 = vadd.f32 1.4214138, %v2484_v5  ;;  %v2485_v31 = vmul.f32 %v6447_v20, %v2453_v12  ;;  %v2963_v42 = vsel %vm2899_vm1, %v2931_v54, %v2867_v46  ;;  %v6479_v37 = vpop.eup %3444  ;;  %v7387_v54 = vld [vmem:[#allocation64_spill] sm:$0xff] }
 0x66e   : > { %v2564_v61 = vmul.f32 %v6424_v43, %v2532_v58  ;;  %3462 = vrcp.f32 %v6271_v49  ;;  %v2486_v34 = vmul.f32 %v6452_v6, %v2454_v18  ;;  %7380 = vst [vmem:[#allocation65_spill] sm:$0xff] %v6479_v37  ;;  %v2995_v21 = vmul.f32 %v2963_v42, %v7381_v50  ;;  %v6484_v33 = vpop.eup %3446  ;;  %v7388_v18 = vld [vmem:[#allocation51_spill] sm:$0xff] }
 0x66f   : > { %3464 = vrcp.f32 %v6274_v23  ;;  %v2548_v13 = vmul.f32 %v6434_v40, %v2516_v62  ;;  %v2517_v45 = vadd.f32 1.4214138, %v2485_v31  ;;  %7382 = vst [vmem:[#allocation14_spill] sm:$0xff] %v6484_v33  ;;  %v6491_v49 = vmul.f32 1.442695, %v6364_v3  ;;  %v6493_v22 = vpop.eup %3448 }
 0x670   : > { %v2596_v29 = vadd.f32 -0.28449672, %v2564_v61  ;;  %3466 = vrcp.f32 %v6277_v11  ;;  %7383 = vst [vmem:[#allocation101_spill] sm:$0xff] %v6493_v22  ;;  %3027 = vxpose.xlu0.b32.cont [2/16] (narrow) %v2995_v21, 32  ;;  %v6497_v23 = vmul.f32 1.442695, %v6369_v47  ;;  %v6500_v53 = vpop.eup %3450  ;;  %v2487_v5 = vmul.f32 %v6458_v26, %v2455_v19 }
 0x671   : > { %3468 = vrcp.f32 %v6281_v15  ;;  %v2580_v44 = vadd.f32 -0.28449672, %v2548_v13  ;;  %v2549_v46 = vmul.f32 %v6447_v20, %v2517_v45  ;;  %7384 = vst [vmem:[#allocation67_spill] sm:$0xff] %v6500_v53  ;;  %v2518_v3 = vadd.f32 1.4214138, %v2486_v34  ;;  %v6507_v63 = vpop.eup %3452  ;;  %v7390_v61 = vld [vmem:[#allocation6_spill] sm:$0xff] }
 0x672   : > { %v2628_v11 = vmul.f32 %v6424_v43, %v2596_v29  ;;  %3470 = vrcp.f32 %v6284_v16  ;;  %7385 = vst [vmem:[#allocation69_spill] sm:$0xff] %v6507_v63  ;;  %v6512_v12 = vpop.eup %3454  ;;  %v6516_v16 = vmul.f32 1.442695, %v6380_v57  ;;  %v6519_v4 = vmul.f32 1.442695, %v6385_v8  ;;  %v7394_v53 = vld [vmem:[#allocation81_spill] sm:$0xff] }
 0x673   : > { %3472 = vrcp.f32 %v6287_v51  ;;  %v2612_v15 = vmul.f32 %v6434_v40, %v2580_v44  ;;  %v2581_v47 = vadd.f32 -0.28449672, %v2549_v46  ;;  %7386 = vst [vmem:[#allocation100_spill] sm:$0xff] %v6512_v12  ;;  %vm2916_vm2 = vcmp.ge.f32.partialorder %v7388_v18, 0.0  ;;  %v7389_v51 = vld [vmem:[#allocation95_spill] sm:$0xff] }
 0x674   : > { %v2660_v41 = vadd.f32 0.2548296, %v2628_v11  ;;  %3474 = vrcp.f32 %v7387_v54  ;;  %v6521_v58 = vpop.eup %3456  ;;  %v6526_v62 = vmul.f32 1.442695, %v6391_v35  ;;  %v2424_v19 = vmul.f32 1.0614054, %v6472_v36 }
 0x675   : > { %3476 = vrcp.f32 %v7389_v51  ;;  %v2644_v31 = vadd.f32 0.2548296, %v2612_v15  ;;  %v6534_v8 = vmul.f32 1.442695, %v6396_v48  ;;  %v2437_v34 = vmul.f32 1.0614054, %v6521_v58 }
 0x676   : > { %v6529_v42 = vpop.eup %3458  ;;  %v2692_v57 = vmul.f32 %v6424_v43, %v2660_v41  ;;  %3478 = vrcp.f32 %v7390_v61  ;;  %v2613_v35 = vmul.f32 %v6447_v20, %v2581_v47  ;;  %v2550_v21 = vmul.f32 %v6452_v6, %v2518_v3  ;;  %v7391_v43 = vld [vmem:[#allocation91_spill] sm:$0xff]  ;;  %v7392_v11 = vld [vmem:[#allocation66_spill] sm:$0xff] }
 0x677   : > { %v6537_v50 = vpop.eup %3460  ;;  %3480 = vpow2.f32 %v6404_v9  ;;  %v2519_v13 = vadd.f32 1.4214138, %v2487_v5  ;;  %v2676_v44 = vmul.f32 %v6434_v40, %v2644_v31  ;;  %v2469_v48 = vadd.f32 -1.4531521, %v2437_v34 }
 0x678   : > { %v6542_v45 = vpop.eup %3462  ;;  %v2724_v29 = vmul.f32 0.5, %v2692_v57  ;;  %3482 = vrcp.f32 %v7391_v43  ;;  %v2438_v15 = vmul.f32 1.0614054, %v6529_v42  ;;  %v2439_v9 = vmul.f32 1.0614054, %v6537_v50 }
 0x679   : > { %v6546_v46 = vpop.eup %3464  ;;  %3484 = vrcp.f32 %v7392_v11  ;;  %v2456_v47 = vadd.f32 -1.4531521, %v2424_v19  ;;  %v6555_v5 = vmul.f32 1.442695, %v6401_v17  ;;  %v2501_v40 = vmul.f32 %v6521_v58, %v2469_v48 }
 0x67a   : > { %v6551_v41 = vpop.eup %3466  ;;  %v2884_v3 = vmul.f32 %v6468_v24, %v2724_v29  ;;  %3486 = vpow2.f32 %v6407_v39  ;;  %v2440_v51 = vmul.f32 1.0614054, %v6542_v45  ;;  %v2645_v31 = vadd.f32 0.2548296, %v2613_v35  ;;  %v7393_v39 = vld [vmem:[#allocation10_spill] sm:$0xff] }
 0x67b   : > { %v6559_v54 = vpop.eup %3468  ;;  %v2582_v57 = vadd.f32 -0.28449672, %v2550_v21  ;;  %v6563_v61 = vmul.f32 %v6458_v26, %v2519_v13  ;;  %v2708_v24 = vmul.f32 0.5, %v2676_v44  ;;  %v2441_v17 = vmul.f32 1.0614054, %v6546_v46 }
 0x67c   : > { %v6565_v19 = vpop.eup %3470  ;;  %v2948_v34 = vsub.f32 1.0, %v2884_v3  ;;  %v2533_v29 = vadd.f32 1.4214138, %v2501_v40  ;;  %vm2900_vm3 = vcmp.ge.f32.partialorder %v7393_v39, 0.0  ;;  %v2442_v48 = vmul.f32 1.0614054, %v6551_v41 }
 0x67d   : > { %v6568_v43 = vpop.eup %3472  ;;  %v2470_v11 = vadd.f32 -1.4531521, %v2438_v15  ;;  %v2471_v56 = vadd.f32 -1.4531521, %v2439_v9  ;;  %v6573_v35 = vmul.f32 %v6472_v36, %v2456_v47  ;;  %v2443_v44 = vmul.f32 1.0614054, %v6559_v54 }
 0x67e   : > { %v6575_v21 = vpop.eup %3474  ;;  %v2980_v13 = vsel %vm2916_vm2, %v2948_v34, %v2884_v3  ;;  %v2444_v40 = vmul.f32 1.0614054, %v6565_v19  ;;  %v2565_v12 = vmul.f32 %v6521_v58, %v2533_v29  ;;  %v2445_v15 = vmul.f32 1.0614054, %v6568_v43 }
 0x67f   : > { %v6582_v63 = vpop.eup %3476  ;;  %v3012_v22 = vmul.f32 %v2980_v13, %v7394_v53  ;;  %v2446_v9 = vmul.f32 1.0614054, %v6575_v21  ;;  %v2472_v47 = vadd.f32 -1.4531521, %v2440_v51  ;;  %v2473_v34 = vadd.f32 -1.4531521, %v2441_v17 }
 0x680   : > { %v6587_v30 = vpop.eup %3478  ;;  %v2447_v18 = vmul.f32 1.0614054, %v6582_v63  ;;  %v2597_v3 = vadd.f32 -0.28449672, %v2565_v12  ;;  %vm2901_vm4 = vcmp.ge.f32.partialorder %v7395_v10, 0.0  ;;  %v6592_v14 = vmul.f32 %v6452_v6, %v2582_v57 }
 0x681   : > { %v3481_v29 = vpop.eup %3480  ;;  %3060 = vxpose.xlu1.b32.cont [3/16] (narrow) %v3012_v22, 32  ;;  %v2449_v53 = vmul.f32 1.0614054, %v6587_v30  ;;  %3488 = vpow2.f32 %v6409_v28  ;;  %v2474_v13 = vadd.f32 -1.4531521, %v2442_v48  ;;  %v2677_v51 = vmul.f32 %v6447_v20, %v2645_v31 }
 0x682   : > { %v6597_v33 = vpop.eup %3482  ;;  %v2868_v52 = vmul.f32 %v3481_v29, %v2708_v24  ;;  %v2629_v12 = vmul.f32 %v6521_v58, %v2597_v3  ;;  %v2475_v17 = vadd.f32 -1.4531521, %v2443_v44  ;;  %v2476_v0 = vadd.f32 -1.4531521, %v2444_v40 }
 0x683   : > { %v6600_v38 = vpop.eup %3484  ;;  %3490 = vpow2.f32 %v6411_v60  ;;  %v2477_v57 = vadd.f32 -1.4531521, %v2445_v15  ;;  %v2478_v22 = vadd.f32 -1.4531521, %v2446_v9  ;;  %v2709_v1 = vmul.f32 0.5, %v2677_v51  ;;  %v7396_v15 = vld [vmem:[#allocation59_spill] sm:$0xff] }
 0x684   : > { %v3487_v2 = vpop.eup %3486  ;;  %v2932_v37 = vsub.f32 1.0, %v2868_v52  ;;  %3492 = vpow2.f32 %v6413_v25  ;;  %v2661_v28 = vadd.f32 0.2548296, %v2629_v12  ;;  %v2479_v20 = vadd.f32 -1.4531521, %v2447_v18 }
 0x685   : > { %3494 = vpow2.f32 %v6444_v32  ;;  %v2481_v31 = vadd.f32 -1.4531521, %v2449_v53  ;;  %v2869_v24 = vmul.f32 %v3487_v2, %v2709_v1  ;;  %v2502_v48 = vmul.f32 %v6529_v42, %v2470_v11  ;;  %v7397_v11 = vld [vmem:[#allocation73_spill] sm:$0xff] }
 0x686   : > { %v2964_v44 = vsel %vm2900_vm3, %v2932_v37, %v2868_v52  ;;  %3496 = vpow2.f32 %v6450_v59  ;;  %v2693_v60 = vmul.f32 %v6521_v58, %v2661_v28  ;;  %v2503_v40 = vmul.f32 %v6537_v50, %v2471_v56 }
 0x687   : > { %v2996_v9 = vmul.f32 %v2964_v44, %v7396_v15  ;;  %3498 = vpow2.f32 %v6455_v7  ;;  %v2933_v25 = vsub.f32 1.0, %v2869_v24  ;;  %v2504_v32 = vmul.f32 %v6542_v45, %v2472_v47  ;;  %v7398_v47 = vld [vmem:[#allocation60_spill] sm:$0xff] }
 0x688   : > { %3500 = vpow2.f32 %v6488_v55  ;;  %v2725_v2 = vmul.f32 0.5, %v2693_v60  ;;  %v2505_v1 = vmul.f32 %v6546_v46, %v2473_v34  ;;  %v2506_v52 = vmul.f32 %v6551_v41, %v2474_v13 }
 0x689   : > { %3028 = vxpose.xlu0.b32.cont [3/16] (narrow) %v2996_v9, 32  ;;  %3502 = vpow2.f32 %v6491_v49  ;;  %v2965_v56 = vsel %vm2901_vm4, %v2933_v25, %v2869_v24  ;;  %v2507_v59 = vmul.f32 %v6559_v54, %v2475_v17  ;;  %v2508_v7 = vmul.f32 %v6565_v19, %v2476_v0 }
 0x68a   : > { %3504 = vpow2.f32 %v6497_v23  ;;  %v2509_v37 = vmul.f32 %v6568_v43, %v2477_v57  ;;  %v2510_v55 = vmul.f32 %v6575_v21, %v2478_v22  ;;  %v2511_v58 = vmul.f32 %v6582_v63, %v2479_v20 }
 0x68b   : > { %v3489_v39 = vpop.eup %3488  ;;  %vm2917_vm5 = vcmp.ge.f32.partialorder %v7397_v11, 0.0  ;;  %v2997_v49 = vmul.f32 %v2965_v56, %v7398_v47  ;;  %v2513_v10 = vmul.f32 %v6587_v30, %v2481_v31  ;;  %v2534_v18 = vadd.f32 1.4214138, %v2502_v48  ;;  %v7399_v48 = vld [vmem:[#allocation32_spill] sm:$0xff] }
 0x68c   : > { %v2535_v3 = vadd.f32 1.4214138, %v2503_v40  ;;  %3506 = vpow2.f32 %v6505_v27  ;;  %v2536_v0 = vadd.f32 1.4214138, %v2504_v32  ;;  %v2537_v34 = vadd.f32 1.4214138, %v2505_v1 }
 0x68d   : > { %v2538_v23 = vadd.f32 1.4214138, %v2506_v52  ;;  %v6630_v29 = vpop.eup %3490  ;;  %3508 = vpow2.f32 %v6516_v16  ;;  %3029 = vxpose.xlu0.b32.cont [4/16] (narrow) %v2997_v49, 32  ;;  %v2566_v53 = vmul.f32 %v6529_v42, %v2534_v18  ;;  %v2539_v13 = vadd.f32 1.4214138, %v2507_v59 }
 0x68e   : > { %v2540_v51 = vadd.f32 1.4214138, %v2508_v7  ;;  %v6634_v12 = vpop.eup %3492  ;;  %3510 = vpow2.f32 %v6519_v4  ;;  %v2541_v17 = vadd.f32 1.4214138, %v2509_v37  ;;  %v2542_v57 = vadd.f32 1.4214138, %v2510_v55 }
 0x68f   : > { %v2543_v22 = vadd.f32 1.4214138, %v2511_v58  ;;  %v3495_v27 = vpop.eup %3494  ;;  %3512 = vpow2.f32 %v6526_v62  ;;  %v2598_v28 = vadd.f32 -0.28449672, %v2566_v53  ;;  %v2545_v20 = vadd.f32 1.4214138, %v2513_v10 }
 0x690   : > { %v2646_v31 = vadd.f32 0.2548296, %v6592_v14  ;;  %v3497_v16 = vpop.eup %3496  ;;  %v2885_v24 = vmul.f32 %v3495_v27, %v2725_v2  ;;  %vm2902_vm6 = vcmp.ge.f32.partialorder %v7399_v48, 0.0  ;;  %v2567_v44 = vmul.f32 %v6537_v50, %v2535_v3  ;;  %v7400_v58 = vld [vmem:[#allocation44_spill] sm:$0xff]  ;;  %v7401_v3 = vld [vmem:[#allocation22_spill] sm:$0xff] }
 0x691   : > { %v2568_v60 = vmul.f32 %v6542_v45, %v2536_v0  ;;  %v2569_v4 = vmul.f32 %v6546_v46, %v2537_v34  ;;  %v6643_v40 = vpop.eup %3498  ;;  %v2630_v15 = vmul.f32 %v6529_v42, %v2598_v28  ;;  %v2570_v9 = vmul.f32 %v6551_v41, %v2538_v23 }
 0x692   : > { %v2678_v62 = vmul.f32 %v6452_v6, %v2646_v31  ;;  %v2571_v14 = vmul.f32 %v6559_v54, %v2539_v13  ;;  %v6649_v25 = vpop.eup %3500  ;;  %v2949_v32 = vsub.f32 1.0, %v2885_v24  ;;  %v2572_v2 = vmul.f32 %v6565_v19, %v2540_v51 }
 0x693   : > { %v2573_v1 = vmul.f32 %v6568_v43, %v2541_v17  ;;  %v2574_v52 = vmul.f32 %v6575_v21, %v2542_v57  ;;  %v6654_v56 = vpop.eup %3502  ;;  %v2662_v59 = vadd.f32 0.2548296, %v2630_v15  ;;  %v2575_v37 = vmul.f32 %v6582_v63, %v2543_v22  ;;  %v7402_v15 = vld [vmem:[#allocation43_spill] sm:$0xff] }
 0x694   : > { %v2710_v7 = vmul.f32 0.5, %v2678_v62  ;;  %v2577_v6 = vmul.f32 %v6587_v30, %v2545_v20  ;;  %v6658_v55 = vpop.eup %3504  ;;  %vm2918_vm7 = vcmp.ge.f32.partialorder %v7400_v58, 0.0  ;;  %v2981_v47 = vsel %vm2917_vm5, %v2949_v32, %v2885_v24 }
 0x695   : > { %v2599_v49 = vadd.f32 -0.28449672, %v2567_v44  ;;  %v2600_v10 = vadd.f32 -0.28449672, %v2568_v60  ;;  %v2601_v18 = vadd.f32 -0.28449672, %v2569_v4  ;;  %v3013_v0 = vmul.f32 %v2981_v47, %v7401_v3 }
 0x696   : > { %v2694_v34 = vmul.f32 %v6529_v42, %v2662_v59  ;;  %v2870_v23 = vmul.f32 %v3489_v39, %v2710_v7  ;;  %v2602_v53 = vadd.f32 -0.28449672, %v2570_v9  ;;  %v6665_v13 = vpop.eup %3506  ;;  %v2603_v17 = vadd.f32 -0.28449672, %v2571_v14 }
 0x697   : > { %v2631_v51 = vmul.f32 %v6537_v50, %v2599_v49  ;;  %v2604_v57 = vadd.f32 -0.28449672, %v2572_v2  ;;  %v2605_v22 = vadd.f32 -0.28449672, %v2573_v1  ;;  %v6668_v27 = vpop.eup %3508  ;;  %3061 = vxpose.xlu1.b32.cont [4/16] (narrow) %v3013_v0, 32  ;;  %v2632_v31 = vmul.f32 %v6542_v45, %v2600_v10  ;;  %v7403_v2 = vld [vmem:[#allocation8_spill] sm:$0xff] }
 0x698   : > { %v2726_v11 = vmul.f32 0.5, %v2694_v34  ;;  %v2934_v28 = vsub.f32 1.0, %v2870_v23  ;;  %v2606_v20 = vadd.f32 -0.28449672, %v2574_v52  ;;  %v6671_v24 = vpop.eup %3510  ;;  %v2607_v39 = vadd.f32 -0.28449672, %v2575_v37 }
 0x699   : > { %v2663_v42 = vadd.f32 0.2548296, %v2631_v51  ;;  %v2609_v44 = vadd.f32 -0.28449672, %v2577_v6  ;;  %v2633_v60 = vmul.f32 %v6546_v46, %v2601_v18  ;;  %v6674_v4 = vpop.eup %3512  ;;  %vm2919_vm8 = vcmp.ge.f32.partialorder %v7402_v15, 0.0  ;;  %v7404_v18 = vld [vmem:[#allocation12_spill] sm:$0xff] }
 0x69a   : > { %v2886_v62 = vmul.f32 %v3497_v16, %v2726_v11  ;;  %v2966_v9 = vsel %vm2902_vm6, %v2934_v28, %v2870_v23  ;;  %v2583_v14 = vadd.f32 -0.28449672, %v6563_v61  ;;  %v2634_v32 = vmul.f32 %v6551_v41, %v2602_v53  ;;  %v7405_v23 = vld [vmem:[#allocation70_spill] sm:$0xff] }
 0x69b   : > { %v2998_v1 = vmul.f32 %v2966_v9, %v7403_v2  ;;  %v2695_v52 = vmul.f32 %v6537_v50, %v2663_v42  ;;  %v2635_v59 = vmul.f32 %v6559_v54, %v2603_v17  ;;  %v2636_v7 = vmul.f32 %v6565_v19, %v2604_v57  ;;  %v7406_v17 = vld [vmem:[#allocation33_spill] sm:$0xff] }
 0x69c   : > { %v2950_v37 = vsub.f32 1.0, %v2886_v62  ;;  %v2615_v6 = vmul.f32 %v6458_v26, %v2583_v14  ;;  %v2637_v16 = vmul.f32 %v6568_v43, %v2605_v22  ;;  %v2638_v48 = vmul.f32 %v6575_v21, %v2606_v20 }
 0x69d   : > { %3030 = vxpose.xlu0.b32.cont [5/16] (narrow) %v2998_v1, 32  ;;  %v2727_v47 = vmul.f32 0.5, %v2695_v52  ;;  %v2639_v61 = vmul.f32 %v6582_v63, %v2607_v39  ;;  %v2641_v49 = vmul.f32 %v6587_v30, %v2609_v44  ;;  %v2664_v10 = vadd.f32 0.2548296, %v2632_v31 }
 0x69e   : > { %vm2920_vm9 = vcmp.ge.f32.partialorder %v7404_v18, 0.0  ;;  %v2982_v50 = vsel %vm2918_vm7, %v2950_v37, %v2886_v62  ;;  %v2647_v3 = vadd.f32 0.2548296, %v2615_v6  ;;  %v2665_v0 = vadd.f32 0.2548296, %v2633_v60 }
 0x69f   : > { %v2666_v34 = vadd.f32 0.2548296, %v2634_v32  ;;  %v3014_v53 = vmul.f32 %v2982_v50, %v7405_v23  ;;  %v2887_v51 = vmul.f32 %v6643_v40, %v2727_v47  ;;  %vm2903_vm10 = vcmp.ge.f32.partialorder %v7406_v17, 0.0  ;;  %v7408_v32 = vld [vmem:[#allocation25_spill] sm:$0xff] }
 0x6a0   : > { %v2696_v57 = vmul.f32 %v6542_v45, %v2664_v10  ;;  %v2667_v22 = vadd.f32 0.2548296, %v2635_v59  ;;  %v2679_v11 = vmul.f32 %v6458_v26, %v2647_v3  ;;  %v2668_v28 = vadd.f32 0.2548296, %v2636_v7  ;;  %v7407_v45 = vld [vmem:[#allocation55_spill] sm:$0xff]  ;;  %v7409_v59 = vld [vmem:[#allocation34_spill] sm:$0xff] }
 0x6a1   : > { %v2669_v20 = vadd.f32 0.2548296, %v2637_v16  ;;  %v2670_v31 = vadd.f32 0.2548296, %v2638_v48  ;;  %3514 = vpow2.f32 %v6534_v8  ;;  %3062 = vxpose.xlu1.b32.cont [5/16] (narrow) %v3014_v53, 32  ;;  %v2951_v58 = vsub.f32 1.0, %v2887_v51 }
 0x6a2   : > { %v2728_v42 = vmul.f32 0.5, %v2696_v57  ;;  %v2671_v39 = vadd.f32 0.2548296, %v2639_v61  ;;  %v2711_v44 = vmul.f32 0.5, %v2679_v11  ;;  %v2520_v60 = vadd.f32 1.4214138, %v6573_v35 }
 0x6a3   : > { %v2697_v40 = vmul.f32 %v6546_v46, %v2665_v0  ;;  %v2698_v62 = vmul.f32 %v6551_v41, %v2666_v34  ;;  %vm2921_vm11 = vcmp.ge.f32.partialorder %v7407_v45, 0.0  ;;  %v2983_v26 = vsel %vm2919_vm8, %v2951_v58, %v2887_v51  ;;  %v7411_v61 = vld [vmem:[#allocation49_spill] sm:$0xff] }
 0x6a4   : > { %v2888_v9 = vmul.f32 %v6649_v25, %v2728_v42  ;;  %v2673_v14 = vadd.f32 0.2548296, %v2641_v49  ;;  %v2699_v8 = vmul.f32 %v6559_v54, %v2667_v22  ;;  %3516 = vpow2.f32 %v6555_v5  ;;  %v7412_v49 = vld [vmem:[#allocation13_spill] sm:$0xff]  ;;  %v7419_v42 = vld [vmem:[#allocation94_spill] sm:$0xff] }
 0x6a5   : > { %v3015_v2 = vmul.f32 %v2983_v26, %v7408_v32  ;;  %v2871_v35 = vmul.f32 %v6630_v29, %v2711_v44  ;;  %v2552_v46 = vmul.f32 %v6472_v36, %v2520_v60  ;;  %v2700_v41 = vmul.f32 %v6565_v19, %v2668_v28  ;;  %v7413_v10 = vld [vmem:[#allocation5_spill] sm:$0xff] }
 0x6a6   : > { %v2952_v1 = vsub.f32 1.0, %v2888_v9  ;;  %v2701_v52 = vmul.f32 %v6568_v43, %v2669_v20  ;;  %v2702_v15 = vmul.f32 %v6575_v21, %v2670_v31  ;;  %vm2922_vm12 = vcmp.ge.f32.partialorder %v7409_v59, 0.0  ;;  %v7410_v43 = vld [vmem:[#allocation27_spill] sm:$0xff]  ;;  %v7414_v0 = vld [vmem:[#allocation65_spill] sm:$0xff] }
 0x6a7   : > { %3063 = vxpose.xlu1.b32.cont [6/16] (narrow) %v3015_v2, 32  ;;  %v2935_v25 = vsub.f32 1.0, %v2871_v35  ;;  %v2584_v54 = vadd.f32 -0.28449672, %v2552_v46  ;;  %v2729_v7 = vmul.f32 0.5, %v2697_v40  ;;  %v2730_v5 = vmul.f32 0.5, %v2698_v62 }
 0x6a8   : > { %v2984_v37 = vsel %vm2920_vm9, %v2952_v1, %v2888_v9  ;;  %v2703_v29 = vmul.f32 %v6582_v63, %v2671_v39  ;;  %v2705_v6 = vmul.f32 %v6587_v30, %v2673_v14  ;;  %v2731_v16 = vmul.f32 0.5, %v2699_v8  ;;  %v7415_v51 = vld [vmem:[#allocation61_spill] sm:$0xff]  ;;  %v7420_v39 = vld [vmem:[#allocation30_spill] sm:$0xff] }
 0x6a9   : > { %v2967_v19 = vsel %vm2903_vm10, %v2935_v25, %v2871_v35  ;;  %v3016_v21 = vmul.f32 %v2984_v37, %v7410_v43  ;;  %v2616_v48 = vmul.f32 %v6472_v36, %v2584_v54  ;;  %v2889_v47 = vmul.f32 %v6654_v56, %v2729_v7  ;;  %v7416_v56 = vld [vmem:[#allocation9_spill] sm:$0xff]  ;;  %v7423_v8 = vld [vmem:[#allocation82_spill] sm:$0xff] }
 0x6aa   : > { %vm2923_vm13 = vcmp.ge.f32.partialorder %v7411_v61, 0.0  ;;  %3518 = vrcp.f32 %v7412_v49  ;;  %v2999_v18 = vmul.f32 %v2967_v19, %v7413_v10  ;;  %v2732_v50 = vmul.f32 0.5, %v2700_v41  ;;  %v7417_v11 = vld [vmem:[#allocation77_spill] sm:$0xff]  ;;  %v7428_v7 = vld [vmem:[#allocation14_spill] sm:$0xff] }
 0x6ab   : > { %v2733_v63 = vmul.f32 0.5, %v2701_v52  ;;  %3064 = vxpose.xlu1.b32.cont [7/16] (narrow) %v3016_v21, 32  ;;  %v2648_v30 = vadd.f32 0.2548296, %v2616_v48  ;;  %v2953_v3 = vsub.f32 1.0, %v2889_v47  ;;  %v2890_v23 = vmul.f32 %v6658_v55, %v2730_v5  ;;  %v3515_v53 = vpop.eup %3514  ;;  %v7418_v55 = vld [vmem:[#allocation54_spill] sm:$0xff] }
 0x6ac   : > { %v2425_v34 = vmul.f32 1.0614054, %v7414_v0  ;;  %3520 = vpow2.f32 %v7415_v51  ;;  %3031 = vxpose.xlu0.b32.cont [6/16] (narrow) %v2999_v18, 32  ;;  %vm2904_vm14 = vcmp.ge.f32.partialorder %v7416_v56, 0.0  ;;  %v2734_v17 = vmul.f32 0.5, %v2702_v15  ;;  %v7422_v26 = vld [vmem:[#allocation45_spill] sm:$0xff] }
 0x6ad   : > { %v2735_v57 = vmul.f32 0.5, %v2703_v29  ;;  %v2891_v22 = vmul.f32 %v6665_v13, %v2731_v16  ;;  %vm2924_vm15 = vcmp.ge.f32.partialorder %v7417_v11, 0.0  ;;  %v2680_v28 = vmul.f32 %v6472_v36, %v2648_v30  ;;  %v7421_v13 = vld [vmem:[#allocation41_spill] sm:$0xff]  ;;  %v7426_v15 = vld [vmem:[#allocation18_spill] sm:$0xff]  ;;  %v7429_v16 = vld [vmem:[#allocation68_spill] sm:$0xff] }
 0x6ae   : > { %v2985_v20 = vsel %vm2921_vm11, %v2953_v3, %v2889_v47  ;;  %v2737_v31 = vmul.f32 0.5, %v2705_v6  ;;  %v2457_v58 = vadd.f32 -1.4531521, %v2425_v34  ;;  %vm2925_vm0 = vcmp.ge.f32.partialorder %v7418_v55, 0.0  ;;  %v3517_v62 = vpop.eup %3516  ;;  %v7424_v32 = vld [vmem:[#allocation97_spill] sm:$0xff]  ;;  %v7430_v21 = vld [vmem:[#allocation98_spill] sm:$0xff] }
 0x6af   : > { %3522 = vpow2.f32 %v7419_v42  ;;  %v3017_v44 = vmul.f32 %v2985_v20, %v7420_v39  ;;  %v2892_v60 = vmul.f32 %v6668_v27, %v2732_v50  ;;  %v2954_v40 = vsub.f32 1.0, %v2890_v23  ;;  %v7425_v46 = vld [vmem:[#allocation93_spill] sm:$0xff]  ;;  %v7431_v18 = vld [vmem:[#allocation7_spill] sm:$0xff]  ;;  %v7432_v30 = vld [vmem:[#allocation42_spill] sm:$0xff] }
 0x6b0   : > { %vm2926_vm1 = vcmp.ge.f32.partialorder %v7421_v13, 0.0  ;;  %vm2927_vm2 = vcmp.ge.f32.partialorder %v7422_v26, 0.0  ;;  %v2712_v36 = vmul.f32 0.5, %v2680_v28  ;;  %v2489_v45 = vmul.f32 %v7414_v0, %v2457_v58  ;;  %v7433_v34 = vld [vmem:[#allocation83_spill] sm:$0xff]  ;;  %v7434_v51 = vld [vmem:[#allocation101_spill] sm:$0xff] }
 0x6b1   : > { %v2893_v9 = vmul.f32 %v6671_v24, %v2733_v63  ;;  %v2955_v14 = vsub.f32 1.0, %v2891_v22  ;;  %vm2929_vm3 = vcmp.ge.f32.partialorder %v7423_v8, 0.0  ;;  %3524 = vpow2.f32 %v7424_v32  ;;  %3065 = vxpose.xlu1.b32.cont [8/16] (narrow) %v3017_v44, 32  ;;  %v7427_v24 = vld [vmem:[#allocation29_spill] sm:$0xff]  ;;  %v7435_v28 = vld [vmem:[#allocation67_spill] sm:$0xff]  ;;  %v7440_v8 = vld [vmem:[#allocation46_spill] sm:$0xff] }
 0x6b2   : > { %v2894_v2 = vmul.f32 %v6674_v4, %v2734_v17  ;;  %v2895_v27 = vmul.f32 %v3515_v53, %v2735_v57  ;;  %v2986_v35 = vsel %vm2922_vm12, %v2954_v40, %v2890_v23  ;;  %3526 = vpow2.f32 %v7425_v46  ;;  %v7436_v55 = vld [vmem:[#allocation35_spill] sm:$0xff]  ;;  %v7438_v13 = vld [vmem:[#allocation69_spill] sm:$0xff] }
 0x6b3   : > { %v2872_v1 = vmul.f32 %v6634_v12, %v2712_v36  ;;  %v2521_v41 = vadd.f32 1.4214138, %v2489_v45  ;;  %v2897_v52 = vmul.f32 %v3517_v62, %v2737_v31  ;;  %3528 = vpow2.f32 %v7426_v15  ;;  %v7439_v36 = vld [vmem:[#allocation100_spill] sm:$0xff] }
 0x6b4   : > { %v3018_v25 = vmul.f32 %v2986_v35, %v7427_v24  ;;  %v2956_v54 = vsub.f32 1.0, %v2892_v60  ;;  %v2426_v5 = vmul.f32 1.0614054, %v7428_v7  ;;  %v2957_v29 = vsub.f32 1.0, %v2893_v9  ;;  %v6757_v6 = vpop.eup %3518 }
 0x6b5   : > { %v2936_v37 = vsub.f32 1.0, %v2872_v1  ;;  %v2553_v4 = vmul.f32 %v7414_v0, %v2521_v41  ;;  %v2987_v59 = vsel %vm2923_vm13, %v2955_v14, %v2891_v22  ;;  %3530 = vpow2.f32 %v7429_v16 }
 0x6b6   : > { %3066 = vxpose.xlu1.b32.cont [9/16] (narrow) %v3018_v25, 32  ;;  %v2958_v12 = vsub.f32 1.0, %v2894_v2  ;;  %v2959_v19 = vsub.f32 1.0, %v2895_v27  ;;  %v2458_v43 = vadd.f32 -1.4531521, %v2426_v5  ;;  %3532 = vpow2.f32 %v7430_v21  ;;  %v3521_v10 = vpop.eup %3520  ;;  %v7442_v25 = vld [vmem:[#allocation57_spill] sm:$0xff] }
 0x6b7   : > { %v2968_v48 = vsel %vm2904_vm14, %v2936_v37, %v2872_v1  ;;  %v2585_v47 = vadd.f32 -0.28449672, %v2553_v4  ;;  %v2961_v49 = vsub.f32 1.0, %v2897_v52  ;;  %v2988_v63 = vsel %vm2924_vm15, %v2956_v54, %v2892_v60  ;;  %v7437_v60 = vld [vmem:[#allocation37_spill] sm:$0xff]  ;;  %v7441_v1 = vld [vmem:[#allocation36_spill] sm:$0xff] }
 0x6b8   : > { %v3000_v50 = vmul.f32 %v2968_v48, %v7431_v18  ;;  %v2490_v61 = vmul.f32 %v7428_v7, %v2458_v43  ;;  %v3019_v3 = vmul.f32 %v2987_v59, %v7432_v30  ;;  %3534 = vpow2.f32 %v7433_v34  ;;  %v7443_v30 = vld [vmem:[#allocation39_spill] sm:$0xff] }
 0x6b9   : > { %v2617_v23 = vmul.f32 %v7414_v0, %v2585_v47  ;;  %v2989_v53 = vsel %vm2925_vm0, %v2957_v29, %v2893_v9  ;;  %v2427_v56 = vmul.f32 1.0614054, %v7434_v51  ;;  %v6773_v17 = vpop.eup %3522  ;;  %v2990_v22 = vsel %vm2926_vm1, %v2958_v12, %v2894_v2 }
 0x6ba   : > { %3032 = vxpose.xlu0.b32.cont [7/16] (narrow) %v3000_v50, 32  ;;  %v2522_v57 = vadd.f32 1.4214138, %v2490_v61  ;;  %v2991_v11 = vsel %vm2927_vm2, %v2959_v19, %v2895_v27  ;;  %3067 = vxpose.xlu1.b32.cont [10/16] (narrow) %v3019_v3, 32  ;;  %v2428_v20 = vmul.f32 1.0614054, %v7435_v28  ;;  %v2993_v58 = vsel %vm2929_vm3, %v2961_v49, %v2897_v52 }
 0x6bb   : > { %v2649_v31 = vadd.f32 0.2548296, %v2617_v23  ;;  %v3020_v42 = vmul.f32 %v2988_v63, %v7436_v55  ;;  %v2459_v39 = vadd.f32 -1.4531521, %v2427_v56  ;;  %v6783_v44 = vpop.eup %3524  ;;  %vm2905_vm4 = vcmp.ge.f32.partialorder %v7437_v60, 0.0  ;;  %v7444_v3 = vld [vmem:[#allocation28_spill] sm:$0xff] }
 0x6bc   : > { %v2554_v40 = vmul.f32 %v7428_v7, %v2522_v57  ;;  %v2460_v62 = vadd.f32 -1.4531521, %v2428_v20  ;;  %v2429_v26 = vmul.f32 1.0614054, %v7438_v13  ;;  %v2430_v45 = vmul.f32 1.0614054, %v7439_v36  ;;  %v6789_v9 = vpop.eup %3526 }
 0x6bd   : > { %v2681_v14 = vmul.f32 %v7414_v0, %v2649_v31  ;;  %v3021_v32 = vmul.f32 %v2989_v53, %v7440_v8  ;;  %v2491_v2 = vmul.f32 %v7434_v51, %v2459_v39  ;;  %v2431_v27 = vmul.f32 1.0614054, %v6597_v33  ;;  %v6795_v35 = vpop.eup %3528 }
 0x6be   : > { %v2586_v46 = vadd.f32 -0.28449672, %v2554_v40  ;;  %v3022_v41 = vmul.f32 %v2990_v22, %v7441_v1  ;;  %3068 = vxpose.xlu1.b32.cont [11/16] (narrow) %v3020_v42, 32  ;;  %v2492_v52 = vmul.f32 %v7435_v28, %v2460_v62  ;;  %v2461_v15 = vadd.f32 -1.4531521, %v2429_v26  ;;  %v7445_v42 = vld [vmem:[#allocation21_spill] sm:$0xff] }
 0x6bf   : > { %v2713_v24 = vmul.f32 0.5, %v2681_v14  ;;  %v3023_v54 = vmul.f32 %v2991_v11, %v7442_v25  ;;  %v2523_v5 = vadd.f32 1.4214138, %v2491_v2  ;;  %v2462_v0 = vadd.f32 -1.4531521, %v2430_v45  ;;  %v6800_v37 = vpop.eup %3530 }
 0x6c0   : > { %v2618_v4 = vmul.f32 %v7428_v7, %v2586_v46  ;;  %v2524_v29 = vadd.f32 1.4214138, %v2492_v52  ;;  %v2493_v59 = vmul.f32 %v7438_v13, %v2461_v15  ;;  %v2463_v16 = vadd.f32 -1.4531521, %v2431_v27  ;;  %v6804_v12 = vpop.eup %3532 }
 0x6c1   : > { %v2873_v19 = vmul.f32 %v3521_v10, %v2713_v24  ;;  %v2555_v43 = vmul.f32 %v7434_v51, %v2523_v5  ;;  %v2494_v21 = vmul.f32 %v7439_v36, %v2462_v0  ;;  %v2432_v48 = vmul.f32 1.0614054, %v6600_v38 }
 0x6c2   : > { %v2650_v47 = vadd.f32 0.2548296, %v2618_v4  ;;  %v2556_v49 = vmul.f32 %v7435_v28, %v2524_v29  ;;  %3069 = vxpose.xlu1.b32.cont [12/16] (narrow) %v3021_v32, 32  ;;  %v2525_v18 = vadd.f32 1.4214138, %v2493_v59  ;;  %v2495_v50 = vmul.f32 %v6597_v33, %v2463_v16  ;;  %v6811_v61 = vpop.eup %3534 }
 0x6c3   : > { %v2937_v63 = vsub.f32 1.0, %v2873_v19  ;;  %vm2906_vm5 = vcmp.ge.f32.partialorder %v7443_v30, 0.0  ;;  %v6815_v10 = vmul.f32 %v2993_v58, %v7444_v3  ;;  %v2587_v34 = vadd.f32 -0.28449672, %v2555_v43 }
 0x6c4   : > { %v2526_v23 = vadd.f32 1.4214138, %v2494_v21  ;;  %v2682_v53 = vmul.f32 %v7428_v7, %v2650_v47  ;;  %v2588_v56 = vadd.f32 -0.28449672, %v2556_v49  ;;  %v2557_v57 = vmul.f32 %v7438_v13, %v2525_v18  ;;  %v7447_v49 = vld [vmem:[#allocation92_spill] sm:$0xff] }
 0x6c5   : > { %v2527_v22 = vadd.f32 1.4214138, %v2495_v50  ;;  %v2969_v11 = vsel %vm2905_vm4, %v2937_v63, %v2873_v19  ;;  %v2619_v20 = vmul.f32 %v7434_v51, %v2587_v34  ;;  %v2464_v55 = vadd.f32 -1.4531521, %v2432_v48  ;;  %v7446_v19 = vld [vmem:[#allocation56_spill] sm:$0xff] }
 0x6c6   : > { %v2558_v31 = vmul.f32 %v7439_v36, %v2526_v23  ;;  %v3001_v39 = vmul.f32 %v2969_v11, %v7445_v42  ;;  %v2714_v58 = vmul.f32 0.5, %v2682_v53  ;;  %v2620_v40 = vmul.f32 %v7435_v28, %v2588_v56  ;;  %3070 = vxpose.xlu1.b32.cont [13/16] (narrow) %v3022_v41, 32  ;;  %v7448_v63 = vld [vmem:[#allocation52_spill] sm:$0xff]  ;;  %v7449_v53 = vld [vmem:[#allocation23_spill] sm:$0xff]  ;;  %v7451_v42 = vld [vmem:[#allocation78_spill] sm:$0xff] }
 0x6c7   : > { %v2589_v62 = vadd.f32 -0.28449672, %v2557_v57  ;;  %v2651_v7 = vadd.f32 0.2548296, %v2619_v20  ;;  %v2559_v45 = vmul.f32 %v6597_v33, %v2527_v22  ;;  %v2496_v14 = vmul.f32 %v6600_v38, %v2464_v55  ;;  %v7450_v57 = vld [vmem:[#allocation84_spill] sm:$0xff] }
 0x6c8   : > { %v2590_v26 = vadd.f32 -0.28449672, %v2558_v31  ;;  %3033 = vxpose.xlu0.b32.cont [8/16] (narrow) %v3001_v39, 32  ;;  %v2874_v60 = vmul.f32 %v6773_v17, %v2714_v58  ;;  %v2652_v8 = vadd.f32 0.2548296, %v2620_v40  ;;  %vm2907_vm6 = vcmp.ge.f32.partialorder %v7448_v63, 0.0 }
 0x6c9   : > { %v2621_v32 = vmul.f32 %v7438_v13, %v2589_v62  ;;  %v2433_v2 = vmul.f32 1.0614054, %v6757_v6  ;;  %v2683_v27 = vmul.f32 %v7434_v51, %v2651_v7  ;;  %v2591_v1 = vadd.f32 -0.28449672, %v2559_v45  ;;  %v7452_v58 = vld [vmem:[#allocation99_spill] sm:$0xff] }
 0x6ca   : > { %v2622_v46 = vmul.f32 %v7439_v36, %v2590_v26  ;;  %v2528_v41 = vadd.f32 1.4214138, %v2496_v14  ;;  %v2938_v52 = vsub.f32 1.0, %v2874_v60  ;;  %v2684_v15 = vmul.f32 %v7435_v28, %v2652_v8  ;;  %3071 = vxpose.xlu1.b32.cont [14/16] (narrow) %v3023_v54, 32  ;;  %v7453_v62 = vld [vmem:[#allocation47_spill] sm:$0xff] }
 0x6cb   : > { %v2653_v24 = vadd.f32 0.2548296, %v2621_v32  ;;  %v2465_v25 = vadd.f32 -1.4531521, %v2433_v2  ;;  %v2715_v5 = vmul.f32 0.5, %v2683_v27  ;;  %v2623_v17 = vmul.f32 %v6597_v33, %v2591_v1  ;;  %v7455_v32 = vld [vmem:[#allocation11_spill] sm:$0xff] }
 0x6cc   : > { %v2654_v0 = vadd.f32 0.2548296, %v2622_v46  ;;  %v2560_v4 = vmul.f32 %v6600_v38, %v2528_v41  ;;  %v2970_v29 = vsel %vm2906_vm5, %v2938_v52, %v2874_v60  ;;  %v2716_v51 = vmul.f32 0.5, %v2684_v15  ;;  %v7454_v60 = vld [vmem:[#allocation71_spill] sm:$0xff]  ;;  %v7456_v41 = vld [vmem:[#allocation96_spill] sm:$0xff]  ;;  %v7457_v15 = vld [vmem:[#allocation50_spill] sm:$0xff] }
 0x6cd   : > { %v2685_v59 = vmul.f32 %v7438_v13, %v2653_v24  ;;  %v2497_v16 = vmul.f32 %v6757_v6, %v2465_v25  ;;  %v3002_v43 = vmul.f32 %v2970_v29, %v7446_v19  ;;  %v2875_v28 = vmul.f32 %v6783_v44, %v2715_v5  ;;  %v7459_v5 = vld [vmem:[#allocation62_spill] sm:$0xff] }
 0x6ce   : > { %v2686_v54 = vmul.f32 %v7439_v36, %v2654_v0  ;;  %v2655_v21 = vadd.f32 0.2548296, %v2623_v17  ;;  %v2876_v48 = vmul.f32 %v6789_v9, %v2716_v51  ;;  %3072 = vxpose.xlu1.b32.cont [15/16] (narrow) %v7447_v49, 32  ;;  %v2592_v18 = vadd.f32 -0.28449672, %v2560_v4  ;;  %v7461_v51 = vld [vmem:[#allocation38_spill] sm:$0xff] }
 0x6cf   : > { %v2717_v47 = vmul.f32 0.5, %v2685_v59  ;;  %v2529_v50 = vadd.f32 1.4214138, %v2497_v16  ;;  %3034 = vxpose.xlu0.b32.cont [9/16] (narrow) %v3002_v43, 32  ;;  %v2939_v13 = vsub.f32 1.0, %v2875_v28  ;;  %vm2908_vm7 = vcmp.ge.f32.partialorder %v7450_v57, 0.0 }
 0x6d0   : > { %v2718_v30 = vmul.f32 0.5, %v2686_v54  ;;  %v2687_v3 = vmul.f32 %v6597_v33, %v2655_v21  ;;  %v2940_v34 = vsub.f32 1.0, %v2876_v48  ;;  %v2624_v36 = vmul.f32 %v6600_v38, %v2592_v18  ;;  %v7462_v16 = vld [vmem:[#allocation17_spill] sm:$0xff] }
 0x6d1   : > { %v2877_v44 = vmul.f32 %v6795_v35, %v2717_v47  ;;  %v2561_v23 = vmul.f32 %v6757_v6, %v2529_v50  ;;  %v2971_v9 = vsel %vm2907_vm6, %v2939_v13, %v2875_v28  ;;  %3536 = vpow2.f32 %v7451_v42 }
 0x6d2   : > { %v3003_v56 = vmul.f32 %v2971_v9, %v7449_v53  ;;  %v2878_v22 = vmul.f32 %v6800_v37, %v2718_v30  ;;  %v2656_v11 = vadd.f32 0.2548296, %v2624_v36  ;;  %3073 = vxpose.xlu1.b32.end [16/16] (narrow) %v6815_v10, 32  ;;  %v2972_v20 = vsel %vm2908_vm7, %v2940_v34, %v2876_v48 }
 0x6d3   : > { %v2941_v31 = vsub.f32 1.0, %v2877_v44  ;;  %v2719_v33 = vmul.f32 0.5, %v2687_v3  ;;  %v2593_v55 = vadd.f32 -0.28449672, %v2561_v23  ;;  %v3004_v40 = vmul.f32 %v2972_v20, %v7452_v58 }
 0x6d4   : > { %3035 = vxpose.xlu0.b32.cont [10/16] (narrow) %v3003_v56, 32  ;;  %v2688_v35 = vmul.f32 %v6600_v38, %v2656_v11  ;;  %vm2909_vm8 = vcmp.ge.f32.partialorder %v7453_v62, 0.0  ;;  %v2942_v7 = vsub.f32 1.0, %v2878_v22  ;;  %vm2910_vm9 = vcmp.ge.f32.partialorder %v7455_v32, 0.0 }
 0x6d5   : > { %v2625_v39 = vmul.f32 %v6757_v6, %v2593_v55  ;;  %v2973_v37 = vsel %vm2909_vm8, %v2941_v31, %v2877_v44  ;;  %v2879_v26 = vmul.f32 %v6804_v12, %v2719_v33  ;;  %vm2911_vm10 = vcmp.ge.f32.partialorder %v7457_v15, 0.0 }
 0x6d6   : > { %v2720_v10 = vmul.f32 0.5, %v2688_v35  ;;  %v3005_v8 = vmul.f32 %v2973_v37, %v7454_v60  ;;  %v2974_v38 = vsel %vm2910_vm9, %v2942_v7, %v2878_v22  ;;  %vm2913_vm12 = vcmp.ge.f32.partialorder %v7461_v51, 0.0 }
 0x6d7   : > { %v2657_v45 = vadd.f32 0.2548296, %v2625_v39  ;;  %v2943_v2 = vsub.f32 1.0, %v2879_v26  ;;  %v3006_v52 = vmul.f32 %v2974_v38, %v7456_v41 }
 0x6d8   : > { %3036 = vxpose.xlu0.b32.cont [11/16] (narrow) %v3004_v40, 32  ;;  %v2880_v27 = vmul.f32 %v6811_v61, %v2720_v10  ;;  %v7460_v61 = vld [vmem:[#allocation19_spill] sm:$0xff] }
 0x6d9   : > { %v2689_v14 = vmul.f32 %v6757_v6, %v2657_v45  ;;  %v2975_v12 = vsel %vm2911_vm10, %v2943_v2, %v2879_v26  ;;  %v7458_v6 = vld [vmem:[#allocation75_spill] sm:$0xff] }
 0x6da   : > { %v2944_v24 = vsub.f32 1.0, %v2880_v27  ;;  %vm2912_vm11 = vcmp.ge.f32.partialorder %v7458_v6, 0.0  ;;  %v3007_v0 = vmul.f32 %v2975_v12, %v7459_v5 }
 0x6db   : > { %v2721_v46 = vmul.f32 0.5, %v2689_v14  ;;  %v3537_v1 = vpop.eup %3536 }
 0x6dc   : > { %3037 = vxpose.xlu0.b32.cont [12/16] (narrow) %v3005_v8, 32  ;;  %v2976_v17 = vsel %vm2912_vm11, %v2944_v24, %v2880_v27 }
 0x6dd   : > { %v2881_v25 = vmul.f32 %v3537_v1, %v2721_v46  ;;  %v3008_v29 = vmul.f32 %v2976_v17, %v7460_v61 }
 0x6df   : > { %v2945_v4 = vsub.f32 1.0, %v2881_v25 }
 0x6e0   : > { %3038 = vxpose.xlu0.b32.cont [13/16] (narrow) %v3006_v52, 32 }
 0x6e1   : > { %v2977_v59 = vsel %vm2913_vm12, %v2945_v4, %v2881_v25 }
 0x6e2   : > { %v3009_v19 = vmul.f32 %v2977_v59, %v7462_v16 }
 0x6e4   : > { %3039 = vxpose.xlu0.b32.cont [14/16] (narrow) %v3007_v0, 32 }
 0x6e8   : > { %3040 = vxpose.xlu0.b32.cont [15/16] (narrow) %v3008_v29, 32 }
 0x6ec   : > { %3041 = vxpose.xlu0.b32.end [16/16] (narrow) %v3009_v19, 32 }
 0x716   : > { %v3074_v43 = vpop.trf.xlu1 }
 0x717   : > { %3091 = vst [vmem:[%s136_s27 + $0x8] sm:$0xff] %v3074_v43 }
 0x71a   : > { %v3075_v28 = vpop.trf.xlu1 }
 0x71b   : > { %3093 = vst [vmem:[%s136_s27 + $0x18] sm:$0xff] %v3075_v28 }
 0x71e   : > { %v3076_v54 = vpop.trf.xlu1 }
 0x71f   : > { %3095 = vst [vmem:[%s136_s27 + $0x28] sm:$0xff] %v3076_v54 }
 0x722   : > { %v3077_v21 = vpop.trf.xlu1 }
 0x723   : > { %3097 = vst [vmem:[%s136_s27 + $0x38] sm:$0xff] %v3077_v21 }
 0x730   : > { %v3042_v48 = vpop.trf.xlu0 }
 0x731   : > { %3090 = vst [vmem:[%s136_s27] sm:$0xff] %v3042_v48 }
 0x734   : > { %v3043_v47 = vpop.trf.xlu0 }
 0x735   : > { %3092 = vst [vmem:[%s136_s27 + $0x10] sm:$0xff] %v3043_v47 }
 0x738   : > { %v3044_v49 = vpop.trf.xlu0 }
 0x739   : > { %3094 = vst [vmem:[%s136_s27 + $0x20] sm:$0xff] %v3044_v49 }
 0x73c   : > { %v3045_v18 = vpop.trf.xlu0 }
 0x73d   : > { %3096 = vst [vmem:[%s136_s27 + $0x30] sm:$0xff] %v3045_v18 }
 0x73e   : > { %3551 = shalt.err (!%p3548_p3)
}
 0x73f   : > { %s3552_s16 = scalar_lea.hbm %s6877_s5, 1024  ;;  %s3556_s22 = scalar_lea.hbm %s6923_s2, 2048 }
 0x740   : > { %p3553_p4 = scmp.ne.s32.totalorder %s6877_s5, %s3552_s16  ;;  %p3557_p9 = scmp.lt.u32.totalorder %s6877_s5, %s6923_s2 }
 0x741   : > { %p3558_p10 = scmp.lt.u32.totalorder %s3556_s22, %s3552_s16  ;;  %p3560_p12 = scmp.lt.u32.totalorder %s3552_s16, %s6877_s5 }
 0x742   : > { %p3554_p7 = pnand %p3553_p4, %p3667_p5 }
 0x743   : > { %p3559_p11 = por %p3558_p10, %p3557_p9 }
 0x744   : > { %p3555_p8 = pneg %p3554_p7 }
 0x745   : > { %p3561_p13 = por %p3560_p12, %p3559_p11 }
 0x747   : > { %p3562_p0 = pnand %p3561_p13, %p3555_p8 }
 0x749   : > { %3565 = shalt.err (!%p3562_p0)
}
 0x74a   : > { %s3613_s25 = smov 256  }
 0x74b   : > { %3330 = dma.vmem_to_hbm [thread:$0]  (%p3667_p5), %s6872_s28, 1024, %s6877_s5, %s6879_s6, %s3613_s25, %s3613_s25, %s3609_s3  }
 0x74c PF: > { %p3336_p1 = scmp.ge.s32.totalorder %s3600_s12, 2  ;;  %s3127_s26 = sand.u32 1, %s3588_s9  }
 0x74d   : > { %s3128_s27 = scalar_lea.sflag [#allocation3], %s3127_s26 }
 0x74e   : > { %p3333_p2 = pnand %p3336_p1, %p3671_p6 }
 0x750   : > { %3583 = dma.done.wait (!%p3333_p2), %s3128_s27, 1024  }
 0x751   : > { %3585 = vsyncadd (!%p3333_p2), %s3128_s27, 4294966272  ;;  %p12_p3 = scmp.ge.s32.totalorder %s3654_s15, 4   ;;  %s7463_s9 = smov %s3592_s10 }
 0x752   : > { %s7464_s10 = smov %s3596_s11  ;;  %s7465_s11 = smov %s3665_s18 }
 0x753   : > { %s7466_s12 = smov %s3654_s15  ;;  %14 = sbr.rel (!%p12_p3) target bundleno = 3 (0x3), region = 63 }
 0x75a   :  { %3133 = vsyncpa [#allocation3], 1 }
 0x75b   :  { %3135 = vsyncpa [#allocation3 + $0x1], 1 }

</bundles_post_ra>
